<compile_context>
chip_gen: v6e
topology: v6e:2x2x1
jax: 0.10.0
libtpu: 0.0.40
codegen_flags: <defaults>
</compile_context>

<pallas_src>
import functools
import math

import jax
import jax.numpy as jnp
from jax.experimental import pallas as pl
from jax.experimental.pallas import tpu as pltpu


# ----------------------------------------------------------------------------
# Fused Pallas kernel: QKV linears + attention(s) + output projections
# ----------------------------------------------------------------------------
def _fused_mmmdit_kernel(*refs, num_heads, head_dim, num_main, num_mod,
                         seqlens, scale):
    M = num_mod
    x_refs = refs[0 * M:1 * M]
    wq_refs = refs[1 * M:2 * M]
    wk_refs = refs[2 * M:3 * M]
    wv_refs = refs[3 * M:4 * M]
    bq_refs = refs[4 * M:5 * M]
    bk_refs = refs[5 * M:6 * M]
    bv_refs = refs[6 * M:7 * M]
    wp_refs = refs[7 * M:8 * M]
    bp_refs = refs[8 * M:9 * M]
    out_refs = refs[9 * M:10 * M]
    mq_scr, mk_scr, mv_scr = refs[10 * M:10 * M + 3]

    bf16 = jnp.bfloat16

    def head_split(y):
        # (L, H*Dh) f32 -> (H, L, Dh) bf16: one relayout per tensor, heads
        # become the leading batch dim (no per-head lane slices, no concat).
        y3 = jnp.transpose(y.reshape(y.shape[0], num_heads, head_dim), (1, 0, 2))
        return y3.astype(bf16)

    def qkv(i):
        """Per-modality QKV projections -> (H, L_i, Dh) bf16; q pre-scaled."""
        x = x_refs[i][0].astype(bf16)                               # (L_i, Din_i)
        q = jnp.dot(x, wq_refs[i][...], preferred_element_type=jnp.float32)
        q = (q + bq_refs[i][...]) * scale          # fold softmax scale into q
        k = jnp.dot(x, wk_refs[i][...], preferred_element_type=jnp.float32)
        k = k + bk_refs[i][...]
        v = jnp.dot(x, wv_refs[i][...], preferred_element_type=jnp.float32)
        v = v + bv_refs[i][...]
        return head_split(q), head_split(k), head_split(v)

    def attend(q3, kvs):
        """softmax(q3 . [k_0|k_1|..]^T) . [v_0|v_1|..] without concatenating.

        q3: (H, Lq, Dh) bf16 (already scaled); kvs: list of (k3, v3) pairs,
        each (H, Lk_j, Dh) bf16.  Exact single-pass online-softmax combine.
        """
        ss = [jnp.einsum("hqd,hkd->hqk", q3, k3,
                         preferred_element_type=jnp.float32) for k3, _ in kvs]
        m = ss[0].max(axis=-1, keepdims=True)
        for s in ss[1:]:
            m = jnp.maximum(m, s.max(axis=-1, keepdims=True))
        ps = [jnp.exp(s - m) for s in ss]
        denom = ps[0].sum(axis=-1, keepdims=True)
        for p in ps[1:]:
            denom = denom + p.sum(axis=-1, keepdims=True)
        o = None
        for p, (_, v3) in zip(ps, kvs):
            pv = jnp.einsum("hqk,hkd->hqd", p.astype(bf16), v3,
                            preferred_element_type=jnp.float32)
            o = pv if o is None else o + pv
        # Deferred normalization: Lq*Dh multiplies instead of Lq*Lk; the
        # reciprocal runs on the EUP slot.
        return o * pl.reciprocal(denom, approx=True)                # (H, Lq, Dh) f32

    def project(i, o):
        """Head-merge + output projection + store for modality i."""
        # sum_h o[h] @ proj_w[h]  ==  concat_h(o_h) @ proj_w  (no transpose back)
        po = jnp.einsum("hqd,hdo->hqo", o.astype(bf16), wp_refs[i][...],
                        preferred_element_type=jnp.float32)
        out = jnp.sum(po, axis=0) + bp_refs[i][...]                 # (L_i, Dout_i)
        out_refs[i][0] = out.astype(out_refs[i].dtype)

    # ---- phase 1: main-modality QKV -> shared scratch at row offsets ----
    off = 0
    for i in range(num_main):
        q3, k3, v3 = qkv(i)
        L = seqlens[i]
        mq_scr[:, off:off + L, :] = q3
        mk_scr[:, off:off + L, :] = k3
        mv_scr[:, off:off + L, :] = v3
        off += L

    # ---- phase 2: main attention over the concatenated main sequences ----
    o_main = attend(mq_scr[...], [(mk_scr[...], mv_scr[...])])      # (H, Lmain, Dh)

    # ---- phase 3: main output projections (per-modality row slices) ----
    off = 0
    for i in range(num_main):
        L = seqlens[i]
        project(i, o_main[:, off:off + L, :])
        off += L

    # ---- phase 4: optional modalities attend over [main K/V ; own K/V] ----
    # (.detach() in the reference only affects gradients; forward is identical)
    for i in range(num_main, num_mod):
        q3, k3, v3 = qkv(i)
        o = attend(q3, [(mk_scr[...], mv_scr[...]), (k3, v3)])
        project(i, o)


# ----------------------------------------------------------------------------
# VMEM budget: parameterize per TPU generation (v7x only has 64 MiB / TC)
# ----------------------------------------------------------------------------
def _vmem_limit_bytes(default=32 * 1024 * 1024):
    try:
        info = pltpu.get_tpu_info()
        cap = getattr(info, "vmem_capacity_bytes", None)
        if cap:
            # leave ~25% headroom for compiler-internal scratch
            return int(min(cap - cap // 4, 100 * 1024 * 1024))
    except Exception:
        pass
    return default


# ----------------------------------------------------------------------------
# Wrapper: one pallas_call for the whole forward
# ----------------------------------------------------------------------------
def mmm_dit_attention(xs, params, *, num_heads, num_main_modalities):
    num_mod = len(xs)
    attn_dim = params["proj_w"][0].shape[0]
    assert attn_dim % num_heads == 0
    head_dim = attn_dim // num_heads
    scale = 1.0 / math.sqrt(head_dim)

    B = xs[0].shape[0]
    seqlens = tuple(int(x.shape[1]) for x in xs)
    dims_in = [int(x.shape[2]) for x in xs]
    dims_out = [int(params["proj_w"][i].shape[1]) for i in range(num_mod)]
    l_main = sum(seqlens[:num_main_modalities])

    # One-time parameter re-layout (outside the kernel): split the fused QKV
    # weight into lane-dense w_q/w_k/w_v (bf16 for the MXU), reshape proj_w to
    # (H, Dh, Dout) for the batched head-merge matmul; biases stay f32.
    bf16 = jnp.bfloat16
    f32 = jnp.float32
    wq = [params["qkv_w"][i][:, 0:attn_dim].astype(bf16) for i in range(num_mod)]
    wk = [params["qkv_w"][i][:, attn_dim:2 * attn_dim].astype(bf16)
          for i in range(num_mod)]
    wv = [params["qkv_w"][i][:, 2 * attn_dim:3 * attn_dim].astype(bf16)
          for i in range(num_mod)]
    bq = [params["qkv_b"][i][0:attn_dim].reshape(1, attn_dim).astype(f32)
          for i in range(num_mod)]
    bk = [params["qkv_b"][i][attn_dim:2 * attn_dim].reshape(1, attn_dim).astype(f32)
          for i in range(num_mod)]
    bv = [params["qkv_b"][i][2 * attn_dim:3 * attn_dim].reshape(1, attn_dim).astype(f32)
          for i in range(num_mod)]
    wp = [params["proj_w"][i].reshape(num_heads, head_dim, dims_out[i]).astype(bf16)
          for i in range(num_mod)]
    bp = [params["proj_b"][i].reshape(1, dims_out[i]).astype(f32)
          for i in range(num_mod)]

    const2 = lambda b: (0, 0)
    const3 = lambda b: (0, 0, 0)

    in_specs = []
    # per-batch activation blocks
    for i in range(num_mod):
        in_specs.append(
            pl.BlockSpec((1, seqlens[i], dims_in[i]), lambda b: (b, 0, 0)))
    # weights / biases: full blocks, constant index_map -> VMEM-resident,
    # single-buffered (never refetched, so a second buffer is wasted VMEM).
    for arrs, cmap in ((wq, const2), (wk, const2), (wv, const2),
                       (bq, const2), (bk, const2), (bv, const2),
                       (wp, const3), (bp, const2)):
        for a in arrs:
            in_specs.append(
                pl.BlockSpec(a.shape, cmap, pipeline_mode=pl.Buffered(1)))

    out_specs = tuple(
        pl.BlockSpec((1, seqlens[i], dims_out[i]), lambda b: (b, 0, 0))
        for i in range(num_mod))
    out_shape = tuple(
        jax.ShapeDtypeStruct((B, seqlens[i], dims_out[i]), xs[i].dtype)
        for i in range(num_mod))

    kernel = functools.partial(
        _fused_mmmdit_kernel,
        num_heads=num_heads,
        head_dim=head_dim,
        num_main=num_main_modalities,
        num_mod=num_mod,
        seqlens=seqlens,
        scale=scale,
    )

    outs = pl.pallas_call(
        kernel,
        out_shape=out_shape,
        grid=(B,),
        in_specs=in_specs,
        out_specs=out_specs,
        scratch_shapes=[
            pltpu.VMEM((num_heads, l_main, head_dim), bf16),   # main Q
            pltpu.VMEM((num_heads, l_main, head_dim), bf16),   # main K
            pltpu.VMEM((num_heads, l_main, head_dim), bf16),   # main V
        ],
        compiler_params=pltpu.CompilerParams(
            dimension_semantics=("parallel",),   # batch shards across v7x's 2 TCs
            vmem_limit_bytes=_vmem_limit_bytes(),
        ),
    )(*xs, *wq, *wk, *wv, *bq, *bk, *bv, *wp, *bp)
    return list(outs)


# ----------------------------------------------------------------------------
# Pure-JAX f32 reference (for correctness check)
# ----------------------------------------------------------------------------
def reference(xs, params, *, num_heads, num_main_modalities):
    num_modalities = len(xs)
    attn_dim = params["proj_w"][0].shape[0]
    head_dim = attn_dim // num_heads
    seqlens = [x.shape[1] for x in xs]
    B = xs[0].shape[0]

    def sdpa_ref(q, k, v):
        s = jnp.einsum("bhqd,bhkd->bhqk", q, k) / math.sqrt(q.shape[-1])
        p = jax.nn.softmax(s, axis=-1)
        return jnp.einsum("bhqk,bhkd->bhqd", p, v)

    qs, ks, vs = [], [], []
    for i in range(num_modalities):
        y = xs[i] @ params["qkv_w"][i] + params["qkv_b"][i]
        y = y.reshape(B, seqlens[i], 3, num_heads, head_dim)
        y = jnp.transpose(y, (2, 0, 3, 1, 4))
        qs.append(y[0]); ks.append(y[1]); vs.append(y[2])

    mq = jnp.concatenate(qs[:num_main_modalities], axis=2)
    mk = jnp.concatenate(ks[:num_main_modalities], axis=2)
    mv = jnp.concatenate(vs[:num_main_modalities], axis=2)
    mo = sdpa_ref(mq, mk, mv)
    mo = jnp.transpose(mo, (0, 2, 1, 3)).reshape(B, -1, attn_dim)

    outs, off = [], 0
    for i in range(num_main_modalities):
        outs.append(mo[:, off:off + seqlens[i], :]); off += seqlens[i]
    for i in range(num_main_modalities, num_modalities):
        o = sdpa_ref(qs[i], jnp.concatenate([mk, ks[i]], axis=2),
                     jnp.concatenate([mv, vs[i]], axis=2))
        outs.append(jnp.transpose(o, (0, 2, 1, 3)).reshape(B, seqlens[i], attn_dim))
    return [outs[i] @ params["proj_w"][i] + params["proj_b"][i]
            for i in range(num_modalities)]


# ----------------------------------------------------------------------------
# main
# ----------------------------------------------------------------------------
if __name__ == "__main__":
    # Module config (small):
    dim = 32                      # same dim for every modality (to_ntuple of an int)
    num_heads = 4
    num_main_modalities = 2
    num_optional_modalities = 1
    num_modalities = num_main_modalities + num_optional_modalities
    attn_dim = dim

    batch = 2
    seqlens = [8, 16, 8]          # one per modality

    key = jax.random.PRNGKey(0)

    def trunc_normal(k, shape, std=0.02):
        return std * jax.random.truncated_normal(k, -2.0, 2.0, shape, dtype=jnp.float32)

    # Deterministic 'truncnormal002' init: trunc-normal(std=0.02) weights, zero bias.
    params = {"qkv_w": [], "qkv_b": [], "proj_w": [], "proj_b": []}
    for i in range(num_modalities):
        key, k1, k2 = jax.random.split(key, 3)
        params["qkv_w"].append(trunc_normal(k1, (dim, attn_dim * 3)))
        params["qkv_b"].append(jnp.zeros((attn_dim * 3,), jnp.float32))
        params["proj_w"].append(trunc_normal(k2, (attn_dim, dim)))
        params["proj_b"].append(jnp.zeros((dim,), jnp.float32))

    xs = []
    for i in range(num_modalities):
        key, kx = jax.random.split(key)
        xs.append(jax.random.normal(kx, (batch, seqlens[i], dim), dtype=jnp.float32))

    outs = mmm_dit_attention(
        xs, params, num_heads=num_heads, num_main_modalities=num_main_modalities
    )
    outs = [jax.block_until_ready(o) for o in outs]

    refs_out = reference(
        xs, params, num_heads=num_heads, num_main_modalities=num_main_modalities
    )
    # Tolerance accounts for bf16 MXU matmuls (f32 accumulation) and the
    # EUP approximate reciprocal in the softmax normalization.
    for o, r in zip(outs, refs_out):
        assert o.shape == r.shape, (o.shape, r.shape)
        err = float(jnp.max(jnp.abs(o - r)))
        ref_scale = float(jnp.max(jnp.abs(r)))
        assert err <= 5e-2 * ref_scale + 1e-6, (err, ref_scale)

    print("KERNEL_OK")
</pallas_src>

<mosaic_0001>
module attributes {stable_mosaic.version = 11 : i64} {
  func.func @_fused_mmmdit_kernel(%arg0: i32, %arg1: memref<1x8x32xf32, #tpu.memory_space<vmem>>, %arg2: memref<1x16x32xf32, #tpu.memory_space<vmem>>, %arg3: memref<1x8x32xf32, #tpu.memory_space<vmem>>, %arg4: memref<32x32xbf16, #tpu.memory_space<vmem>>, %arg5: memref<32x32xbf16, #tpu.memory_space<vmem>>, %arg6: memref<32x32xbf16, #tpu.memory_space<vmem>>, %arg7: memref<32x32xbf16, #tpu.memory_space<vmem>>, %arg8: memref<32x32xbf16, #tpu.memory_space<vmem>>, %arg9: memref<32x32xbf16, #tpu.memory_space<vmem>>, %arg10: memref<32x32xbf16, #tpu.memory_space<vmem>>, %arg11: memref<32x32xbf16, #tpu.memory_space<vmem>>, %arg12: memref<32x32xbf16, #tpu.memory_space<vmem>>, %arg13: memref<1x32xf32, #tpu.memory_space<vmem>>, %arg14: memref<1x32xf32, #tpu.memory_space<vmem>>, %arg15: memref<1x32xf32, #tpu.memory_space<vmem>>, %arg16: memref<1x32xf32, #tpu.memory_space<vmem>>, %arg17: memref<1x32xf32, #tpu.memory_space<vmem>>, %arg18: memref<1x32xf32, #tpu.memory_space<vmem>>, %arg19: memref<1x32xf32, #tpu.memory_space<vmem>>, %arg20: memref<1x32xf32, #tpu.memory_space<vmem>>, %arg21: memref<1x32xf32, #tpu.memory_space<vmem>>, %arg22: memref<4x8x32xbf16, #tpu.memory_space<vmem>>, %arg23: memref<4x8x32xbf16, #tpu.memory_space<vmem>>, %arg24: memref<4x8x32xbf16, #tpu.memory_space<vmem>>, %arg25: memref<1x32xf32, #tpu.memory_space<vmem>>, %arg26: memref<1x32xf32, #tpu.memory_space<vmem>>, %arg27: memref<1x32xf32, #tpu.memory_space<vmem>>, %arg28: memref<1x8x32xf32, #tpu.memory_space<vmem>>, %arg29: memref<1x16x32xf32, #tpu.memory_space<vmem>>, %arg30: memref<1x8x32xf32, #tpu.memory_space<vmem>>, %arg31: memref<4x24x8xbf16, #tpu.memory_space<vmem>>, %arg32: memref<4x24x8xbf16, #tpu.memory_space<vmem>>, %arg33: memref<4x24x8xbf16, #tpu.memory_space<vmem>>) attributes {dimension_semantics = [#tpu.dimension_semantics<parallel>], iteration_bounds = array<i64: 2>, scalar_prefetch = 0 : i64, scratch_operands = 3 : i64, tpu.core_type = #tpu.core_type<tc>, window_params = [{transform_indices = @transform_0, window_bounds = array<i64: 1, 8, 32>}, {transform_indices = @transform_1, window_bounds = array<i64: 1, 16, 32>}, {transform_indices = @transform_2, window_bounds = array<i64: 1, 8, 32>}, {pipeline_mode = #tpu.pipeline_mode<synchronous>, transform_indices = @transform_3, window_bounds = array<i64: 32, 32>}, {pipeline_mode = #tpu.pipeline_mode<synchronous>, transform_indices = @transform_4, window_bounds = array<i64: 32, 32>}, {pipeline_mode = #tpu.pipeline_mode<synchronous>, transform_indices = @transform_5, window_bounds = array<i64: 32, 32>}, {pipeline_mode = #tpu.pipeline_mode<synchronous>, transform_indices = @transform_6, window_bounds = array<i64: 32, 32>}, {pipeline_mode = #tpu.pipeline_mode<synchronous>, transform_indices = @transform_7, window_bounds = array<i64: 32, 32>}, {pipeline_mode = #tpu.pipeline_mode<synchronous>, transform_indices = @transform_8, window_bounds = array<i64: 32, 32>}, {pipeline_mode = #tpu.pipeline_mode<synchronous>, transform_indices = @transform_9, window_bounds = array<i64: 32, 32>}, {pipeline_mode = #tpu.pipeline_mode<synchronous>, transform_indices = @transform_10, window_bounds = array<i64: 32, 32>}, {pipeline_mode = #tpu.pipeline_mode<synchronous>, transform_indices = @transform_11, window_bounds = array<i64: 32, 32>}, {pipeline_mode = #tpu.pipeline_mode<synchronous>, transform_indices = @transform_12, window_bounds = array<i64: 1, 32>}, {pipeline_mode = #tpu.pipeline_mode<synchronous>, transform_indices = @transform_13, window_bounds = array<i64: 1, 32>}, {pipeline_mode = #tpu.pipeline_mode<synchronous>, transform_indices = @transform_14, window_bounds = array<i64: 1, 32>}, {pipeline_mode = #tpu.pipeline_mode<synchronous>, transform_indices = @transform_15, window_bounds = array<i64: 1, 32>}, {pipeline_mode = #tpu.pipeline_mode<synchronous>, transform_indices = @transform_16, window_bounds = array<i64: 1, 32>}, {pipeline_mode = #tpu.pipeline_mode<synchronous>, transform_indices = @transform_17, window_bounds = array<i64: 1, 32>}, {pipeline_mode = #tpu.pipeline_mode<synchronous>, transform_indices = @transform_18, window_bounds = array<i64: 1, 32>}, {pipeline_mode = #tpu.pipeline_mode<synchronous>, transform_indices = @transform_19, window_bounds = array<i64: 1, 32>}, {pipeline_mode = #tpu.pipeline_mode<synchronous>, transform_indices = @transform_20, window_bounds = array<i64: 1, 32>}, {pipeline_mode = #tpu.pipeline_mode<synchronous>, transform_indices = @transform_21, window_bounds = array<i64: 4, 8, 32>}, {pipeline_mode = #tpu.pipeline_mode<synchronous>, transform_indices = @transform_22, window_bounds = array<i64: 4, 8, 32>}, {pipeline_mode = #tpu.pipeline_mode<synchronous>, transform_indices = @transform_23, window_bounds = array<i64: 4, 8, 32>}, {pipeline_mode = #tpu.pipeline_mode<synchronous>, transform_indices = @transform_24, window_bounds = array<i64: 1, 32>}, {pipeline_mode = #tpu.pipeline_mode<synchronous>, transform_indices = @transform_25, window_bounds = array<i64: 1, 32>}, {pipeline_mode = #tpu.pipeline_mode<synchronous>, transform_indices = @transform_26, window_bounds = array<i64: 1, 32>}, {transform_indices = @transform_27, window_bounds = array<i64: 1, 8, 32>}, {transform_indices = @transform_28, window_bounds = array<i64: 1, 16, 32>}, {transform_indices = @transform_29, window_bounds = array<i64: 1, 8, 32>}]} {
    %c0 = arith.constant 0 : index
    %c0_0 = arith.constant 0 : index
    %c0_1 = arith.constant 0 : index
    %0 = vector.load %arg1[%c0, %c0_0, %c0_1] : memref<1x8x32xf32, #tpu.memory_space<vmem>>, vector<1x8x32xf32>
    %1 = vector.shape_cast %0 : vector<1x8x32xf32> to vector<8x32xf32>
    %2 = arith.truncf %1 : vector<8x32xf32> to vector<8x32xbf16>
    %c0_2 = arith.constant 0 : index
    %c0_3 = arith.constant 0 : index
    %3 = vector.load %arg4[%c0_2, %c0_3] : memref<32x32xbf16, #tpu.memory_space<vmem>>, vector<32x32xbf16>
    %cst = arith.constant dense<0.000000e+00> : vector<8x32xf32>
    %4 = tpu.matmul %2, %3, %cst {dimension_numbers = #tpu.dot_dimension_numbers<[1], [0], [0], [1], [0, 0, 1, 1], [], []>} : vector<8x32xbf16>, vector<32x32xbf16>, vector<8x32xf32> -> vector<8x32xf32>
    %c0_4 = arith.constant 0 : index
    %c0_5 = arith.constant 0 : index
    %5 = vector.load %arg13[%c0_4, %c0_5] : memref<1x32xf32, #tpu.memory_space<vmem>>, vector<1x32xf32>
    %6 = vector.broadcast %5 : vector<1x32xf32> to vector<8x32xf32>
    %7 = arith.addf %4, %6 : vector<8x32xf32>
    %cst_6 = arith.constant 0.353553385 : f32
    %8 = vector.broadcast %cst_6 : f32 to vector<8x32xf32>
    %9 = arith.mulf %7, %8 : vector<8x32xf32>
    %c0_7 = arith.constant 0 : index
    %c0_8 = arith.constant 0 : index
    %10 = vector.load %arg7[%c0_7, %c0_8] : memref<32x32xbf16, #tpu.memory_space<vmem>>, vector<32x32xbf16>
    %cst_9 = arith.constant dense<0.000000e+00> : vector<8x32xf32>
    %11 = tpu.matmul %2, %10, %cst_9 {dimension_numbers = #tpu.dot_dimension_numbers<[1], [0], [0], [1], [0, 0, 1, 1], [], []>} : vector<8x32xbf16>, vector<32x32xbf16>, vector<8x32xf32> -> vector<8x32xf32>
    %c0_10 = arith.constant 0 : index
    %c0_11 = arith.constant 0 : index
    %12 = vector.load %arg16[%c0_10, %c0_11] : memref<1x32xf32, #tpu.memory_space<vmem>>, vector<1x32xf32>
    %13 = vector.broadcast %12 : vector<1x32xf32> to vector<8x32xf32>
    %14 = arith.addf %11, %13 : vector<8x32xf32>
    %c0_12 = arith.constant 0 : index
    %c0_13 = arith.constant 0 : index
    %15 = vector.load %arg10[%c0_12, %c0_13] : memref<32x32xbf16, #tpu.memory_space<vmem>>, vector<32x32xbf16>
    %cst_14 = arith.constant dense<0.000000e+00> : vector<8x32xf32>
    %16 = tpu.matmul %2, %15, %cst_14 {dimension_numbers = #tpu.dot_dimension_numbers<[1], [0], [0], [1], [0, 0, 1, 1], [], []>} : vector<8x32xbf16>, vector<32x32xbf16>, vector<8x32xf32> -> vector<8x32xf32>
    %c0_15 = arith.constant 0 : index
    %c0_16 = arith.constant 0 : index
    %17 = vector.load %arg19[%c0_15, %c0_16] : memref<1x32xf32, #tpu.memory_space<vmem>>, vector<1x32xf32>
    %18 = vector.broadcast %17 : vector<1x32xf32> to vector<8x32xf32>
    %19 = arith.addf %16, %18 : vector<8x32xf32>
    %20 = vector.shape_cast %9 : vector<8x32xf32> to vector<8x4x8xf32>
    %21 = tpu.transpose %20, [1, 0, 2] : vector<8x4x8xf32> -> vector<4x8x8xf32>
    %22 = arith.truncf %21 : vector<4x8x8xf32> to vector<4x8x8xbf16>
    %23 = vector.shape_cast %14 : vector<8x32xf32> to vector<8x4x8xf32>
    %24 = tpu.transpose %23, [1, 0, 2] : vector<8x4x8xf32> -> vector<4x8x8xf32>
    %25 = arith.truncf %24 : vector<4x8x8xf32> to vector<4x8x8xbf16>
    %26 = vector.shape_cast %19 : vector<8x32xf32> to vector<8x4x8xf32>
    %27 = tpu.transpose %26, [1, 0, 2] : vector<8x4x8xf32> -> vector<4x8x8xf32>
    %28 = arith.truncf %27 : vector<4x8x8xf32> to vector<4x8x8xbf16>
    %c0_17 = arith.constant 0 : index
    %c0_18 = arith.constant 0 : index
    %c0_19 = arith.constant 0 : index
    %29 = vector.load %arg31[%c0_17, %c0_18, %c0_19] : memref<4x24x8xbf16, #tpu.memory_space<vmem>>, vector<4x8x8xbf16>
    tpu.vector_store %arg31[%c0_17, %c0_18, %c0_19], %22 {strides = array<i32>} : memref<4x24x8xbf16, #tpu.memory_space<vmem>>, vector<4x8x8xbf16>,
    %c0_20 = arith.constant 0 : index
    %c0_21 = arith.constant 0 : index
    %c0_22 = arith.constant 0 : index
    %30 = vector.load %arg32[%c0_20, %c0_21, %c0_22] : memref<4x24x8xbf16, #tpu.memory_space<vmem>>, vector<4x8x8xbf16>
    tpu.vector_store %arg32[%c0_20, %c0_21, %c0_22], %25 {strides = array<i32>} : memref<4x24x8xbf16, #tpu.memory_space<vmem>>, vector<4x8x8xbf16>,
    %c0_23 = arith.constant 0 : index
    %c0_24 = arith.constant 0 : index
    %c0_25 = arith.constant 0 : index
    %31 = vector.load %arg33[%c0_23, %c0_24, %c0_25] : memref<4x24x8xbf16, #tpu.memory_space<vmem>>, vector<4x8x8xbf16>
    tpu.vector_store %arg33[%c0_23, %c0_24, %c0_25], %28 {strides = array<i32>} : memref<4x24x8xbf16, #tpu.memory_space<vmem>>, vector<4x8x8xbf16>,
    %c0_26 = arith.constant 0 : index
    %c0_27 = arith.constant 0 : index
    %c0_28 = arith.constant 0 : index
    %32 = vector.load %arg2[%c0_26, %c0_27, %c0_28] : memref<1x16x32xf32, #tpu.memory_space<vmem>>, vector<1x16x32xf32>
    %33 = vector.shape_cast %32 : vector<1x16x32xf32> to vector<16x32xf32>
    %34 = arith.truncf %33 : vector<16x32xf32> to vector<16x32xbf16>
    %c0_29 = arith.constant 0 : index
    %c0_30 = arith.constant 0 : index
    %35 = vector.load %arg5[%c0_29, %c0_30] : memref<32x32xbf16, #tpu.memory_space<vmem>>, vector<32x32xbf16>
    %cst_31 = arith.constant dense<0.000000e+00> : vector<16x32xf32>
    %36 = tpu.matmul %34, %35, %cst_31 {dimension_numbers = #tpu.dot_dimension_numbers<[1], [0], [0], [1], [0, 0, 1, 1], [], []>} : vector<16x32xbf16>, vector<32x32xbf16>, vector<16x32xf32> -> vector<16x32xf32>
    %c0_32 = arith.constant 0 : index
    %c0_33 = arith.constant 0 : index
    %37 = vector.load %arg14[%c0_32, %c0_33] : memref<1x32xf32, #tpu.memory_space<vmem>>, vector<1x32xf32>
    %38 = vector.broadcast %37 : vector<1x32xf32> to vector<16x32xf32>
    %39 = arith.addf %36, %38 : vector<16x32xf32>
    %cst_34 = arith.constant 0.353553385 : f32
    %40 = vector.broadcast %cst_34 : f32 to vector<16x32xf32>
    %41 = arith.mulf %39, %40 : vector<16x32xf32>
    %c0_35 = arith.constant 0 : index
    %c0_36 = arith.constant 0 : index
    %42 = vector.load %arg8[%c0_35, %c0_36] : memref<32x32xbf16, #tpu.memory_space<vmem>>, vector<32x32xbf16>
    %cst_37 = arith.constant dense<0.000000e+00> : vector<16x32xf32>
    %43 = tpu.matmul %34, %42, %cst_37 {dimension_numbers = #tpu.dot_dimension_numbers<[1], [0], [0], [1], [0, 0, 1, 1], [], []>} : vector<16x32xbf16>, vector<32x32xbf16>, vector<16x32xf32> -> vector<16x32xf32>
    %c0_38 = arith.constant 0 : index
    %c0_39 = arith.constant 0 : index
    %44 = vector.load %arg17[%c0_38, %c0_39] : memref<1x32xf32, #tpu.memory_space<vmem>>, vector<1x32xf32>
    %45 = vector.broadcast %44 : vector<1x32xf32> to vector<16x32xf32>
    %46 = arith.addf %43, %45 : vector<16x32xf32>
    %c0_40 = arith.constant 0 : index
    %c0_41 = arith.constant 0 : index
    %47 = vector.load %arg11[%c0_40, %c0_41] : memref<32x32xbf16, #tpu.memory_space<vmem>>, vector<32x32xbf16>
    %cst_42 = arith.constant dense<0.000000e+00> : vector<16x32xf32>
    %48 = tpu.matmul %34, %47, %cst_42 {dimension_numbers = #tpu.dot_dimension_numbers<[1], [0], [0], [1], [0, 0, 1, 1], [], []>} : vector<16x32xbf16>, vector<32x32xbf16>, vector<16x32xf32> -> vector<16x32xf32>
    %c0_43 = arith.constant 0 : index
    %c0_44 = arith.constant 0 : index
    %49 = vector.load %arg20[%c0_43, %c0_44] : memref<1x32xf32, #tpu.memory_space<vmem>>, vector<1x32xf32>
    %50 = vector.broadcast %49 : vector<1x32xf32> to vector<16x32xf32>
    %51 = arith.addf %48, %50 : vector<16x32xf32>
    %52 = vector.shape_cast %41 : vector<16x32xf32> to vector<16x4x8xf32>
    %53 = tpu.transpose %52, [1, 0, 2] : vector<16x4x8xf32> -> vector<4x16x8xf32>
    %54 = arith.truncf %53 : vector<4x16x8xf32> to vector<4x16x8xbf16>
    %55 = vector.shape_cast %46 : vector<16x32xf32> to vector<16x4x8xf32>
    %56 = tpu.transpose %55, [1, 0, 2] : vector<16x4x8xf32> -> vector<4x16x8xf32>
    %57 = arith.truncf %56 : vector<4x16x8xf32> to vector<4x16x8xbf16>
    %58 = vector.shape_cast %51 : vector<16x32xf32> to vector<16x4x8xf32>
    %59 = tpu.transpose %58, [1, 0, 2] : vector<16x4x8xf32> -> vector<4x16x8xf32>
    %60 = arith.truncf %59 : vector<4x16x8xf32> to vector<4x16x8xbf16>
    %c0_45 = arith.constant 0 : index
    %c8 = arith.constant 8 : index
    %c0_46 = arith.constant 0 : index
    %61 = vector.load %arg31[%c0_45, %c8, %c0_46] : memref<4x24x8xbf16, #tpu.memory_space<vmem>>, vector<4x16x8xbf16>
    tpu.vector_store %arg31[%c0_45, %c8, %c0_46], %54 {strides = array<i32>} : memref<4x24x8xbf16, #tpu.memory_space<vmem>>, vector<4x16x8xbf16>,
    %c0_47 = arith.constant 0 : index
    %c8_48 = arith.constant 8 : index
    %c0_49 = arith.constant 0 : index
    %62 = vector.load %arg32[%c0_47, %c8_48, %c0_49] : memref<4x24x8xbf16, #tpu.memory_space<vmem>>, vector<4x16x8xbf16>
    tpu.vector_store %arg32[%c0_47, %c8_48, %c0_49], %57 {strides = array<i32>} : memref<4x24x8xbf16, #tpu.memory_space<vmem>>, vector<4x16x8xbf16>,
    %c0_50 = arith.constant 0 : index
    %c8_51 = arith.constant 8 : index
    %c0_52 = arith.constant 0 : index
    %63 = vector.load %arg33[%c0_50, %c8_51, %c0_52] : memref<4x24x8xbf16, #tpu.memory_space<vmem>>, vector<4x16x8xbf16>
    tpu.vector_store %arg33[%c0_50, %c8_51, %c0_52], %60 {strides = array<i32>} : memref<4x24x8xbf16, #tpu.memory_space<vmem>>, vector<4x16x8xbf16>,
    %c0_53 = arith.constant 0 : index
    %c0_54 = arith.constant 0 : index
    %c0_55 = arith.constant 0 : index
    %64 = vector.load %arg31[%c0_53, %c0_54, %c0_55] : memref<4x24x8xbf16, #tpu.memory_space<vmem>>, vector<4x24x8xbf16>
    %c0_56 = arith.constant 0 : index
    %c0_57 = arith.constant 0 : index
    %c0_58 = arith.constant 0 : index
    %65 = vector.load %arg32[%c0_56, %c0_57, %c0_58] : memref<4x24x8xbf16, #tpu.memory_space<vmem>>, vector<4x24x8xbf16>
    %c0_59 = arith.constant 0 : index
    %c0_60 = arith.constant 0 : index
    %c0_61 = arith.constant 0 : index
    %66 = vector.load %arg33[%c0_59, %c0_60, %c0_61] : memref<4x24x8xbf16, #tpu.memory_space<vmem>>, vector<4x24x8xbf16>
    "tpu.trace_start"() <{level = 10 : i32, message = "hqd,hkd->hqk"}> : () -> ()
    %cst_62 = arith.constant dense<0.000000e+00> : vector<4x24x24xf32>
    %67 = tpu.matmul %64, %65, %cst_62 {dimension_numbers = #tpu.dot_dimension_numbers<[2], [2], [1], [1], [0, 0, 0, 1, 1, 1], [0], [0]>} : vector<4x24x8xbf16>, vector<4x24x8xbf16>, vector<4x24x24xf32> -> vector<4x24x24xf32>
    "tpu.trace_stop"() : () -> ()
    %cst_63 = arith.constant dense<0xFF800000> : vector<4x24xf32>
    %68 = vector.multi_reduction <maximumf>, %67, %cst_63 [2] : vector<4x24x24xf32> to vector<4x24xf32>
    %69 = vector.shape_cast %68 : vector<4x24xf32> to vector<4x24x1xf32>
    %70 = vector.broadcast %69 : vector<4x24x1xf32> to vector<4x24x24xf32>
    %71 = arith.subf %67, %70 : vector<4x24x24xf32>
    %72 = math.exp %71 : vector<4x24x24xf32>
    %cst_64 = arith.constant dense<0.000000e+00> : vector<4x24xf32>
    %73 = vector.multi_reduction <add>, %72, %cst_64 [2] : vector<4x24x24xf32> to vector<4x24xf32>
    %74 = vector.shape_cast %73 : vector<4x24xf32> to vector<4x24x1xf32>
    %75 = arith.truncf %72 : vector<4x24x24xf32> to vector<4x24x24xbf16>
    "tpu.trace_start"() <{level = 10 : i32, message = "hqk,hkd->hqd"}> : () -> ()
    %cst_65 = arith.constant dense<0.000000e+00> : vector<4x24x8xf32>
    %76 = tpu.matmul %75, %66, %cst_65 {dimension_numbers = #tpu.dot_dimension_numbers<[2], [1], [1], [2], [0, 0, 0, 1, 1, 2], [0], [0]>} : vector<4x24x24xbf16>, vector<4x24x8xbf16>, vector<4x24x8xf32> -> vector<4x24x8xf32>
    "tpu.trace_stop"() : () -> ()
    %77 = tpu.reciprocal %74 {approx = true} : vector<4x24x1xf32> -> vector<4x24x1xf32>
    %78 = vector.broadcast %77 : vector<4x24x1xf32> to vector<4x24x8xf32>
    %79 = arith.mulf %76, %78 : vector<4x24x8xf32>
    %80 = vector.extract_strided_slice %79 {offsets = [0, 0, 0], sizes = [4, 8, 8], strides = [1, 1, 1]} : vector<4x24x8xf32> to vector<4x8x8xf32>
    %81 = arith.truncf %80 : vector<4x8x8xf32> to vector<4x8x8xbf16>
    %c0_66 = arith.constant 0 : index
    %c0_67 = arith.constant 0 : index
    %c0_68 = arith.constant 0 : index
    %82 = vector.load %arg22[%c0_66, %c0_67, %c0_68] : memref<4x8x32xbf16, #tpu.memory_space<vmem>>, vector<4x8x32xbf16>
    "tpu.trace_start"() <{level = 10 : i32, message = "hqd,hdo->hqo"}> : () -> ()
    %cst_69 = arith.constant dense<0.000000e+00> : vector<4x8x32xf32>
    %83 = tpu.matmul %81, %82, %cst_69 {dimension_numbers = #tpu.dot_dimension_numbers<[2], [1], [1], [2], [0, 0, 0, 1, 1, 2], [0], [0]>} : vector<4x8x8xbf16>, vector<4x8x32xbf16>, vector<4x8x32xf32> -> vector<4x8x32xf32>
    "tpu.trace_stop"() : () -> ()
    %cst_70 = arith.constant dense<0.000000e+00> : vector<8x32xf32>
    %84 = vector.multi_reduction <add>, %83, %cst_70 [0] : vector<4x8x32xf32> to vector<8x32xf32>
    %c0_71 = arith.constant 0 : index
    %c0_72 = arith.constant 0 : index
    %85 = vector.load %arg25[%c0_71, %c0_72] : memref<1x32xf32, #tpu.memory_space<vmem>>, vector<1x32xf32>
    %86 = vector.broadcast %85 : vector<1x32xf32> to vector<8x32xf32>
    %87 = arith.addf %84, %86 : vector<8x32xf32>
    %c0_73 = arith.constant 0 : index
    %c0_74 = arith.constant 0 : index
    %c0_75 = arith.constant 0 : index
    %88 = vector.load %arg28[%c0_73, %c0_74, %c0_75] : memref<1x8x32xf32, #tpu.memory_space<vmem>>, vector<1x8x32xf32>
    %89 = vector.shape_cast %88 : vector<1x8x32xf32> to vector<8x32xf32>
    %90 = vector.shape_cast %87 : vector<8x32xf32> to vector<1x8x32xf32>
    tpu.vector_store %arg28[%c0_73, %c0_74, %c0_75], %90 {strides = array<i32>} : memref<1x8x32xf32, #tpu.memory_space<vmem>>, vector<1x8x32xf32>,
    %91 = vector.extract_strided_slice %79 {offsets = [0, 8, 0], sizes = [4, 16, 8], strides = [1, 1, 1]} : vector<4x24x8xf32> to vector<4x16x8xf32>
    %92 = arith.truncf %91 : vector<4x16x8xf32> to vector<4x16x8xbf16>
    %c0_76 = arith.constant 0 : index
    %c0_77 = arith.constant 0 : index
    %c0_78 = arith.constant 0 : index
    %93 = vector.load %arg23[%c0_76, %c0_77, %c0_78] : memref<4x8x32xbf16, #tpu.memory_space<vmem>>, vector<4x8x32xbf16>
    "tpu.trace_start"() <{level = 10 : i32, message = "hqd,hdo->hqo"}> : () -> ()
    %cst_79 = arith.constant dense<0.000000e+00> : vector<4x16x32xf32>
    %94 = tpu.matmul %92, %93, %cst_79 {dimension_numbers = #tpu.dot_dimension_numbers<[2], [1], [1], [2], [0, 0, 0, 1, 1, 2], [0], [0]>} : vector<4x16x8xbf16>, vector<4x8x32xbf16>, vector<4x16x32xf32> -> vector<4x16x32xf32>
    "tpu.trace_stop"() : () -> ()
    %cst_80 = arith.constant dense<0.000000e+00> : vector<16x32xf32>
    %95 = vector.multi_reduction <add>, %94, %cst_80 [0] : vector<4x16x32xf32> to vector<16x32xf32>
    %c0_81 = arith.constant 0 : index
    %c0_82 = arith.constant 0 : index
    %96 = vector.load %arg26[%c0_81, %c0_82] : memref<1x32xf32, #tpu.memory_space<vmem>>, vector<1x32xf32>
    %97 = vector.broadcast %96 : vector<1x32xf32> to vector<16x32xf32>
    %98 = arith.addf %95, %97 : vector<16x32xf32>
    %c0_83 = arith.constant 0 : index
    %c0_84 = arith.constant 0 : index
    %c0_85 = arith.constant 0 : index
    %99 = vector.load %arg29[%c0_83, %c0_84, %c0_85] : memref<1x16x32xf32, #tpu.memory_space<vmem>>, vector<1x16x32xf32>
    %100 = vector.shape_cast %99 : vector<1x16x32xf32> to vector<16x32xf32>
    %101 = vector.shape_cast %98 : vector<16x32xf32> to vector<1x16x32xf32>
    tpu.vector_store %arg29[%c0_83, %c0_84, %c0_85], %101 {strides = array<i32>} : memref<1x16x32xf32, #tpu.memory_space<vmem>>, vector<1x16x32xf32>,
    %c0_86 = arith.constant 0 : index
    %c0_87 = arith.constant 0 : index
    %c0_88 = arith.constant 0 : index
    %102 = vector.load %arg3[%c0_86, %c0_87, %c0_88] : memref<1x8x32xf32, #tpu.memory_space<vmem>>, vector<1x8x32xf32>
    %103 = vector.shape_cast %102 : vector<1x8x32xf32> to vector<8x32xf32>
    %104 = arith.truncf %103 : vector<8x32xf32> to vector<8x32xbf16>
    %c0_89 = arith.constant 0 : index
    %c0_90 = arith.constant 0 : index
    %105 = vector.load %arg6[%c0_89, %c0_90] : memref<32x32xbf16, #tpu.memory_space<vmem>>, vector<32x32xbf16>
    %cst_91 = arith.constant dense<0.000000e+00> : vector<8x32xf32>
    %106 = tpu.matmul %104, %105, %cst_91 {dimension_numbers = #tpu.dot_dimension_numbers<[1], [0], [0], [1], [0, 0, 1, 1], [], []>} : vector<8x32xbf16>, vector<32x32xbf16>, vector<8x32xf32> -> vector<8x32xf32>
    %c0_92 = arith.constant 0 : index
    %c0_93 = arith.constant 0 : index
    %107 = vector.load %arg15[%c0_92, %c0_93] : memref<1x32xf32, #tpu.memory_space<vmem>>, vector<1x32xf32>
    %108 = vector.broadcast %107 : vector<1x32xf32> to vector<8x32xf32>
    %109 = arith.addf %106, %108 : vector<8x32xf32>
    %cst_94 = arith.constant 0.353553385 : f32
    %110 = vector.broadcast %cst_94 : f32 to vector<8x32xf32>
    %111 = arith.mulf %109, %110 : vector<8x32xf32>
    %c0_95 = arith.constant 0 : index
    %c0_96 = arith.constant 0 : index
    %112 = vector.load %arg9[%c0_95, %c0_96] : memref<32x32xbf16, #tpu.memory_space<vmem>>, vector<32x32xbf16>
    %cst_97 = arith.constant dense<0.000000e+00> : vector<8x32xf32>
    %113 = tpu.matmul %104, %112, %cst_97 {dimension_numbers = #tpu.dot_dimension_numbers<[1], [0], [0], [1], [0, 0, 1, 1], [], []>} : vector<8x32xbf16>, vector<32x32xbf16>, vector<8x32xf32> -> vector<8x32xf32>
    %c0_98 = arith.constant 0 : index
    %c0_99 = arith.constant 0 : index
    %114 = vector.load %arg18[%c0_98, %c0_99] : memref<1x32xf32, #tpu.memory_space<vmem>>, vector<1x32xf32>
    %115 = vector.broadcast %114 : vector<1x32xf32> to vector<8x32xf32>
    %116 = arith.addf %113, %115 : vector<8x32xf32>
    %c0_100 = arith.constant 0 : index
    %c0_101 = arith.constant 0 : index
    %117 = vector.load %arg12[%c0_100, %c0_101] : memref<32x32xbf16, #tpu.memory_space<vmem>>, vector<32x32xbf16>
    %cst_102 = arith.constant dense<0.000000e+00> : vector<8x32xf32>
    %118 = tpu.matmul %104, %117, %cst_102 {dimension_numbers = #tpu.dot_dimension_numbers<[1], [0], [0], [1], [0, 0, 1, 1], [], []>} : vector<8x32xbf16>, vector<32x32xbf16>, vector<8x32xf32> -> vector<8x32xf32>
    %c0_103 = arith.constant 0 : index
    %c0_104 = arith.constant 0 : index
    %119 = vector.load %arg21[%c0_103, %c0_104] : memref<1x32xf32, #tpu.memory_space<vmem>>, vector<1x32xf32>
    %120 = vector.broadcast %119 : vector<1x32xf32> to vector<8x32xf32>
    %121 = arith.addf %118, %120 : vector<8x32xf32>
    %122 = vector.shape_cast %111 : vector<8x32xf32> to vector<8x4x8xf32>
    %123 = tpu.transpose %122, [1, 0, 2] : vector<8x4x8xf32> -> vector<4x8x8xf32>
    %124 = arith.truncf %123 : vector<4x8x8xf32> to vector<4x8x8xbf16>
    %125 = vector.shape_cast %116 : vector<8x32xf32> to vector<8x4x8xf32>
    %126 = tpu.transpose %125, [1, 0, 2] : vector<8x4x8xf32> -> vector<4x8x8xf32>
    %127 = arith.truncf %126 : vector<4x8x8xf32> to vector<4x8x8xbf16>
    %128 = vector.shape_cast %121 : vector<8x32xf32> to vector<8x4x8xf32>
    %129 = tpu.transpose %128, [1, 0, 2] : vector<8x4x8xf32> -> vector<4x8x8xf32>
    %130 = arith.truncf %129 : vector<4x8x8xf32> to vector<4x8x8xbf16>
    %c0_105 = arith.constant 0 : index
    %c0_106 = arith.constant 0 : index
    %c0_107 = arith.constant 0 : index
    %131 = vector.load %arg32[%c0_105, %c0_106, %c0_107] : memref<4x24x8xbf16, #tpu.memory_space<vmem>>, vector<4x24x8xbf16>
    %c0_108 = arith.constant 0 : index
    %c0_109 = arith.constant 0 : index
    %c0_110 = arith.constant 0 : index
    %132 = vector.load %arg33[%c0_108, %c0_109, %c0_110] : memref<4x24x8xbf16, #tpu.memory_space<vmem>>, vector<4x24x8xbf16>
    "tpu.trace_start"() <{level = 10 : i32, message = "hqd,hkd->hqk"}> : () -> ()
    %cst_111 = arith.constant dense<0.000000e+00> : vector<4x8x24xf32>
    %133 = tpu.matmul %124, %131, %cst_111 {dimension_numbers = #tpu.dot_dimension_numbers<[2], [2], [1], [1], [0, 0, 0, 1, 1, 1], [0], [0]>} : vector<4x8x8xbf16>, vector<4x24x8xbf16>, vector<4x8x24xf32> -> vector<4x8x24xf32>
    %cst_112 = arith.constant dense<0.000000e+00> : vector<4x8x8xf32>
    %134 = tpu.matmul %124, %127, %cst_112 {dimension_numbers = #tpu.dot_dimension_numbers<[2], [2], [1], [1], [0, 0, 0, 1, 1, 1], [0], [0]>} : vector<4x8x8xbf16>, vector<4x8x8xbf16>, vector<4x8x8xf32> -> vector<4x8x8xf32>
    "tpu.trace_stop"() : () -> ()
    %cst_113 = arith.constant dense<0xFF800000> : vector<4x8xf32>
    %135 = vector.multi_reduction <maximumf>, %133, %cst_113 [2] : vector<4x8x24xf32> to vector<4x8xf32>
    %136 = vector.shape_cast %135 : vector<4x8xf32> to vector<4x8x1xf32>
    %cst_114 = arith.constant dense<0xFF800000> : vector<4x8xf32>
    %137 = vector.multi_reduction <maximumf>, %134, %cst_114 [2] : vector<4x8x8xf32> to vector<4x8xf32>
    %138 = vector.shape_cast %137 : vector<4x8xf32> to vector<4x8x1xf32>
    %139 = arith.maximumf %136, %138 : vector<4x8x1xf32>
    %140 = vector.broadcast %139 : vector<4x8x1xf32> to vector<4x8x24xf32>
    %141 = arith.subf %133, %140 : vector<4x8x24xf32>
    %142 = math.exp %141 : vector<4x8x24xf32>
    %143 = vector.broadcast %139 : vector<4x8x1xf32> to vector<4x8x8xf32>
    %144 = arith.subf %134, %143 : vector<4x8x8xf32>
    %145 = math.exp %144 : vector<4x8x8xf32>
    %cst_115 = arith.constant dense<0.000000e+00> : vector<4x8xf32>
    %146 = vector.multi_reduction <add>, %142, %cst_115 [2] : vector<4x8x24xf32> to vector<4x8xf32>
    %147 = vector.shape_cast %146 : vector<4x8xf32> to vector<4x8x1xf32>
    %cst_116 = arith.constant dense<0.000000e+00> : vector<4x8xf32>
    %148 = vector.multi_reduction <add>, %145, %cst_116 [2] : vector<4x8x8xf32> to vector<4x8xf32>
    %149 = vector.shape_cast %148 : vector<4x8xf32> to vector<4x8x1xf32>
    %150 = arith.addf %147, %149 : vector<4x8x1xf32>
    %151 = arith.truncf %142 : vector<4x8x24xf32> to vector<4x8x24xbf16>
    "tpu.trace_start"() <{level = 10 : i32, message = "hqk,hkd->hqd"}> : () -> ()
    %cst_117 = arith.constant dense<0.000000e+00> : vector<4x8x8xf32>
    %152 = tpu.matmul %151, %132, %cst_117 {dimension_numbers = #tpu.dot_dimension_numbers<[2], [1], [1], [2], [0, 0, 0, 1, 1, 2], [0], [0]>} : vector<4x8x24xbf16>, vector<4x24x8xbf16>, vector<4x8x8xf32> -> vector<4x8x8xf32>
    "tpu.trace_stop"() : () -> ()
    %153 = arith.truncf %145 : vector<4x8x8xf32> to vector<4x8x8xbf16>
    "tpu.trace_start"() <{level = 10 : i32, message = "hqk,hkd->hqd"}> : () -> ()
    %cst_118 = arith.constant dense<0.000000e+00> : vector<4x8x8xf32>
    %154 = tpu.matmul %153, %130, %cst_118 {dimension_numbers = #tpu.dot_dimension_numbers<[2], [1], [1], [2], [0, 0, 0, 1, 1, 2], [0], [0]>} : vector<4x8x8xbf16>, vector<4x8x8xbf16>, vector<4x8x8xf32> -> vector<4x8x8xf32>
    "tpu.trace_stop"() : () -> ()
    %155 = arith.addf %152, %154 : vector<4x8x8xf32>
    %156 = tpu.reciprocal %150 {approx = true} : vector<4x8x1xf32> -> vector<4x8x1xf32>
    %157 = vector.broadcast %156 : vector<4x8x1xf32> to vector<4x8x8xf32>
    %158 = arith.mulf %155, %157 : vector<4x8x8xf32>
    %159 = arith.truncf %158 : vector<4x8x8xf32> to vector<4x8x8xbf16>
    %c0_119 = arith.constant 0 : index
    %c0_120 = arith.constant 0 : index
    %c0_121 = arith.constant 0 : index
    %160 = vector.load %arg24[%c0_119, %c0_120, %c0_121] : memref<4x8x32xbf16, #tpu.memory_space<vmem>>, vector<4x8x32xbf16>
    "tpu.trace_start"() <{level = 10 : i32, message = "hqd,hdo->hqo"}> : () -> ()
    %cst_122 = arith.constant dense<0.000000e+00> : vector<4x8x32xf32>
    %161 = tpu.matmul %159, %160, %cst_122 {dimension_numbers = #tpu.dot_dimension_numbers<[2], [1], [1], [2], [0, 0, 0, 1, 1, 2], [0], [0]>} : vector<4x8x8xbf16>, vector<4x8x32xbf16>, vector<4x8x32xf32> -> vector<4x8x32xf32>
    "tpu.trace_stop"() : () -> ()
    %cst_123 = arith.constant dense<0.000000e+00> : vector<8x32xf32>
    %162 = vector.multi_reduction <add>, %161, %cst_123 [0] : vector<4x8x32xf32> to vector<8x32xf32>
    %c0_124 = arith.constant 0 : index
    %c0_125 = arith.constant 0 : index
    %163 = vector.load %arg27[%c0_124, %c0_125] : memref<1x32xf32, #tpu.memory_space<vmem>>, vector<1x32xf32>
    %164 = vector.broadcast %163 : vector<1x32xf32> to vector<8x32xf32>
    %165 = arith.addf %162, %164 : vector<8x32xf32>
    %c0_126 = arith.constant 0 : index
    %c0_127 = arith.constant 0 : index
    %c0_128 = arith.constant 0 : index
    %166 = vector.load %arg30[%c0_126, %c0_127, %c0_128] : memref<1x8x32xf32, #tpu.memory_space<vmem>>, vector<1x8x32xf32>
    %167 = vector.shape_cast %166 : vector<1x8x32xf32> to vector<8x32xf32>
    %168 = vector.shape_cast %165 : vector<8x32xf32> to vector<1x8x32xf32>
    tpu.vector_store %arg30[%c0_126, %c0_127, %c0_128], %168 {strides = array<i32>} : memref<1x8x32xf32, #tpu.memory_space<vmem>>, vector<1x8x32xf32>,
    return
  }
  func.func @transform_0(%arg0: i32) -> (i32, i32, i32) {
    %c0_i32 = arith.constant 0 : i32
    %c0_i32_0 = arith.constant 0 : i32
    %c0_i32_1 = arith.constant 0 : i32
    return %arg0, %c0_i32, %c0_i32_0 : i32, i32, i32
  }
  func.func @transform_1(%arg0: i32) -> (i32, i32, i32) {
    %c0_i32 = arith.constant 0 : i32
    %c0_i32_0 = arith.constant 0 : i32
    %c0_i32_1 = arith.constant 0 : i32
    return %arg0, %c0_i32, %c0_i32_0 : i32, i32, i32
  }
  func.func @transform_2(%arg0: i32) -> (i32, i32, i32) {
    %c0_i32 = arith.constant 0 : i32
    %c0_i32_0 = arith.constant 0 : i32
    %c0_i32_1 = arith.constant 0 : i32
    return %arg0, %c0_i32, %c0_i32_0 : i32, i32, i32
  }
  func.func @transform_3(%arg0: i32) -> (i32, i32) {
    %c0_i32 = arith.constant 0 : i32
    %c0_i32_0 = arith.constant 0 : i32
    %c0_i32_1 = arith.constant 0 : i32
    return %c0_i32, %c0_i32_0 : i32, i32
  }
  func.func @transform_4(%arg0: i32) -> (i32, i32) {
    %c0_i32 = arith.constant 0 : i32
    %c0_i32_0 = arith.constant 0 : i32
    %c0_i32_1 = arith.constant 0 : i32
    return %c0_i32, %c0_i32_0 : i32, i32
  }
  func.func @transform_5(%arg0: i32) -> (i32, i32) {
    %c0_i32 = arith.constant 0 : i32
    %c0_i32_0 = arith.constant 0 : i32
    %c0_i32_1 = arith.constant 0 : i32
    return %c0_i32, %c0_i32_0 : i32, i32
  }
  func.func @transform_6(%arg0: i32) -> (i32, i32) {
    %c0_i32 = arith.constant 0 : i32
    %c0_i32_0 = arith.constant 0 : i32
    %c0_i32_1 = arith.constant 0 : i32
    return %c0_i32, %c0_i32_0 : i32, i32
  }
  func.func @transform_7(%arg0: i32) -> (i32, i32) {
    %c0_i32 = arith.constant 0 : i32
    %c0_i32_0 = arith.constant 0 : i32
    %c0_i32_1 = arith.constant 0 : i32
    return %c0_i32, %c0_i32_0 : i32, i32
  }
  func.func @transform_8(%arg0: i32) -> (i32, i32) {
    %c0_i32 = arith.constant 0 : i32
    %c0_i32_0 = arith.constant 0 : i32
    %c0_i32_1 = arith.constant 0 : i32
    return %c0_i32, %c0_i32_0 : i32, i32
  }
  func.func @transform_9(%arg0: i32) -> (i32, i32) {
    %c0_i32 = arith.constant 0 : i32
    %c0_i32_0 = arith.constant 0 : i32
    %c0_i32_1 = arith.constant 0 : i32
    return %c0_i32, %c0_i32_0 : i32, i32
  }
  func.func @transform_10(%arg0: i32) -> (i32, i32) {
    %c0_i32 = arith.constant 0 : i32
    %c0_i32_0 = arith.constant 0 : i32
    %c0_i32_1 = arith.constant 0 : i32
    return %c0_i32, %c0_i32_0 : i32, i32
  }
  func.func @transform_11(%arg0: i32) -> (i32, i32) {
    %c0_i32 = arith.constant 0 : i32
    %c0_i32_0 = arith.constant 0 : i32
    %c0_i32_1 = arith.constant 0 : i32
    return %c0_i32, %c0_i32_0 : i32, i32
  }
  func.func @transform_12(%arg0: i32) -> (i32, i32) {
    %c0_i32 = arith.constant 0 : i32
    %c0_i32_0 = arith.constant 0 : i32
    %c0_i32_1 = arith.constant 0 : i32
    return %c0_i32, %c0_i32_0 : i32, i32
  }
  func.func @transform_13(%arg0: i32) -> (i32, i32) {
    %c0_i32 = arith.constant 0 : i32
    %c0_i32_0 = arith.constant 0 : i32
    %c0_i32_1 = arith.constant 0 : i32
    return %c0_i32, %c0_i32_0 : i32, i32
  }
  func.func @transform_14(%arg0: i32) -> (i32, i32) {
    %c0_i32 = arith.constant 0 : i32
    %c0_i32_0 = arith.constant 0 : i32
    %c0_i32_1 = arith.constant 0 : i32
    return %c0_i32, %c0_i32_0 : i32, i32
  }
  func.func @transform_15(%arg0: i32) -> (i32, i32) {
    %c0_i32 = arith.constant 0 : i32
    %c0_i32_0 = arith.constant 0 : i32
    %c0_i32_1 = arith.constant 0 : i32
    return %c0_i32, %c0_i32_0 : i32, i32
  }
  func.func @transform_16(%arg0: i32) -> (i32, i32) {
    %c0_i32 = arith.constant 0 : i32
    %c0_i32_0 = arith.constant 0 : i32
    %c0_i32_1 = arith.constant 0 : i32
    return %c0_i32, %c0_i32_0 : i32, i32
  }
  func.func @transform_17(%arg0: i32) -> (i32, i32) {
    %c0_i32 = arith.constant 0 : i32
    %c0_i32_0 = arith.constant 0 : i32
    %c0_i32_1 = arith.constant 0 : i32
    return %c0_i32, %c0_i32_0 : i32, i32
  }
  func.func @transform_18(%arg0: i32) -> (i32, i32) {
    %c0_i32 = arith.constant 0 : i32
    %c0_i32_0 = arith.constant 0 : i32
    %c0_i32_1 = arith.constant 0 : i32
    return %c0_i32, %c0_i32_0 : i32, i32
  }
  func.func @transform_19(%arg0: i32) -> (i32, i32) {
    %c0_i32 = arith.constant 0 : i32
    %c0_i32_0 = arith.constant 0 : i32
    %c0_i32_1 = arith.constant 0 : i32
    return %c0_i32, %c0_i32_0 : i32, i32
  }
  func.func @transform_20(%arg0: i32) -> (i32, i32) {
    %c0_i32 = arith.constant 0 : i32
    %c0_i32_0 = arith.constant 0 : i32
    %c0_i32_1 = arith.constant 0 : i32
    return %c0_i32, %c0_i32_0 : i32, i32
  }
  func.func @transform_21(%arg0: i32) -> (i32, i32, i32) {
    %c0_i32 = arith.constant 0 : i32
    %c0_i32_0 = arith.constant 0 : i32
    %c0_i32_1 = arith.constant 0 : i32
    %c0_i32_2 = arith.constant 0 : i32
    return %c0_i32, %c0_i32_0, %c0_i32_1 : i32, i32, i32
  }
  func.func @transform_22(%arg0: i32) -> (i32, i32, i32) {
    %c0_i32 = arith.constant 0 : i32
    %c0_i32_0 = arith.constant 0 : i32
    %c0_i32_1 = arith.constant 0 : i32
    %c0_i32_2 = arith.constant 0 : i32
    return %c0_i32, %c0_i32_0, %c0_i32_1 : i32, i32, i32
  }
  func.func @transform_23(%arg0: i32) -> (i32, i32, i32) {
    %c0_i32 = arith.constant 0 : i32
    %c0_i32_0 = arith.constant 0 : i32
    %c0_i32_1 = arith.constant 0 : i32
    %c0_i32_2 = arith.constant 0 : i32
    return %c0_i32, %c0_i32_0, %c0_i32_1 : i32, i32, i32
  }
  func.func @transform_24(%arg0: i32) -> (i32, i32) {
    %c0_i32 = arith.constant 0 : i32
    %c0_i32_0 = arith.constant 0 : i32
    %c0_i32_1 = arith.constant 0 : i32
    return %c0_i32, %c0_i32_0 : i32, i32
  }
  func.func @transform_25(%arg0: i32) -> (i32, i32) {
    %c0_i32 = arith.constant 0 : i32
    %c0_i32_0 = arith.constant 0 : i32
    %c0_i32_1 = arith.constant 0 : i32
    return %c0_i32, %c0_i32_0 : i32, i32
  }
  func.func @transform_26(%arg0: i32) -> (i32, i32) {
    %c0_i32 = arith.constant 0 : i32
    %c0_i32_0 = arith.constant 0 : i32
    %c0_i32_1 = arith.constant 0 : i32
    return %c0_i32, %c0_i32_0 : i32, i32
  }
  func.func @transform_27(%arg0: i32) -> (i32, i32, i32) {
    %c0_i32 = arith.constant 0 : i32
    %c0_i32_0 = arith.constant 0 : i32
    %c0_i32_1 = arith.constant 0 : i32
    return %arg0, %c0_i32, %c0_i32_0 : i32, i32, i32
  }
  func.func @transform_28(%arg0: i32) -> (i32, i32, i32) {
    %c0_i32 = arith.constant 0 : i32
    %c0_i32_0 = arith.constant 0 : i32
    %c0_i32_1 = arith.constant 0 : i32
    return %arg0, %c0_i32, %c0_i32_0 : i32, i32, i32
  }
  func.func @transform_29(%arg0: i32) -> (i32, i32, i32) {
    %c0_i32 = arith.constant 0 : i32
    %c0_i32_0 = arith.constant 0 : i32
    %c0_i32_1 = arith.constant 0 : i32
    return %arg0, %c0_i32, %c0_i32_0 : i32, i32, i32
  }
}

</mosaic_0001>

<bundles_post_ra>
// kernel: tpu_custom_call.1
= control target key start
LH: loop header
LB: loop body
LE: loop exit
PB: predicated region body
PF: predicated region fallthrough
CT: control target
= control target key end

     0   :  { %s8279_s6 = smov 1   ;;  %s8280_s10 = smov 2   ;;  %s9699_s0 = inlined_call_operand.smem [shape: u32[30], index: -1, kind: input, shape index: {}] }
   0x1   :  { %s8352_s5 = sld [smem:[%s9699_s0]]   ;;  %s8281_s14 = smov 3  }
   0x2   :  { %s8357_s9 = sld [smem:[%s9699_s0 + %s8279_s6]]   ;;  %s8282_s18 = smov 4  }
   0x3   :  { %s8362_s13 = sld [smem:[%s9699_s0 + %s8280_s10]]   ;;  %s8283_s22 = smov 5  }
   0x4   :  { %s8367_s17 = sld [smem:[%s9699_s0 + %s8281_s14]]   ;;  %s8284_s26 = smov 6  }
   0x5   :  { %s8372_s21 = sld [smem:[%s9699_s0 + %s8282_s18]]   ;;  %s8285_s30 = smov 7  }
   0x6   :  { %s8377_s25 = sld [smem:[%s9699_s0 + %s8283_s22]]   ;;  %s8286_s4 = smov 8  }
   0x7   :  { %9728 = sst [smem:[#allocation54_spill]] %s8352_s5  ;;  %s8287_s10 = smov 9  }
   0x8   :  { %9729 = sst [smem:[#allocation55_spill]] %s8357_s9  ;;  %s8288_s15 = smov 10  }
   0x9   :  { %9730 = sst [smem:[#allocation56_spill]] %s8362_s13  ;;  %s8289_s20 = smov 11  }
   0xa   :  { %9731 = sst [smem:[#allocation57_spill]] %s8367_s17  ;;  %s8291_s1 = smov 13  }
   0xb   :  { %s8382_s29 = sld [smem:[%s9699_s0 + %s8284_s26]]   ;;  %s8290_s26 = smov 12  }
   0xc   :  { %9732 = sst [smem:[#allocation58_spill]] %s8377_s25  ;;  %s8292_s7 = smov 14  }
   0xd   :  { %s8387_s3 = sld [smem:[%s9699_s0 + %s8285_s30]]   ;;  %s8294_s22 = smov 16  }
   0xe   :  { %s8392_s8 = sld [smem:[%s9699_s0 + %s8286_s4]]   ;;  %s8295_s28 = smov 17  }
   0xf   :  { %s8397_s14 = sld [smem:[%s9699_s0 + %s8287_s10]]  }
  0x10   :  { %s8402_s19 = sld [smem:[%s9699_s0 + %s8288_s15]]   ;;  %s8293_s15 = smov 15  }
  0x11   :  { %s8407_s24 = sld [smem:[%s9699_s0 + %s8289_s20]]  }
  0x12   :  { %s8412_s30 = sld [smem:[%s9699_s0 + %s8290_s26]]  }
  0x13   :  { %9733 = sst [smem:[#allocation59_spill]] %s8387_s3 }
  0x14   :  { %s8417_s6 = sld [smem:[%s9699_s0 + %s8291_s1]]  }
  0x15   :  { %9734 = sst [smem:[#allocation60_spill]] %s8397_s14 }
  0x16   :  { %9735 = sst [smem:[#allocation61_spill]] %s8402_s19 }
  0x17   :  { %s8422_s12 = sld [smem:[%s9699_s0 + %s8292_s7]]   ;;  %s8296_s7 = smov 18  }
  0x18   :  { %9736 = sst [smem:[#allocation62_spill]] %s8412_s30 }
  0x19   :  { %s8427_s20 = sld [smem:[%s9699_s0 + %s8293_s15]]   ;;  %s8297_s15 = smov 19  }
  0x1a   :  { %s8432_s27 = sld [smem:[%s9699_s0 + %s8294_s22]]   ;;  %s8298_s22 = smov 20  }
  0x1b   :  { %s8437_s4 = sld [smem:[%s9699_s0 + %s8295_s28]]   ;;  %s8299_s28 = smov 21  }
  0x1c   :  { %s8442_s14 = sld [smem:[%s9699_s0 + %s8296_s7]]   ;;  %s8300_s7 = smov 22  }
  0x1d   :  { %9737 = sst [smem:[#allocation63_spill]] %s8422_s12 }
  0x1e   :  { %s8447_s13 = sld [smem:[%s9699_s0 + %s8297_s15]]   ;;  %s8301_s15 = smov 23  }
  0x1f   :  { %9738 = sst [smem:[#allocation64_spill]] %s8427_s20 }
  0x20   :  { %9739 = sst [smem:[#allocation65_spill]] %s8432_s27 }
  0x21   :  { %9740 = sst [smem:[#allocation66_spill]] %s8437_s4 }
  0x22   :  { %9741 = sst [smem:[#allocation67_spill]] %s8442_s14 }
  0x23   :  { %s8452_s5 = sld [smem:[%s9699_s0 + %s8298_s22]]   ;;  %s8302_s22 = smov 24  }
  0x24   :  { %9742 = sst [smem:[#allocation68_spill]] %s8447_s13 }
  0x25   :  { %s8457_s4 = sld [smem:[%s9699_s0 + %s8299_s28]]   ;;  %s8303_s28 = smov 25  }
  0x26   :  { %s8462_s20 = sld [smem:[%s9699_s0 + %s8300_s7]]   ;;  %s8304_s7 = smov 26  }
  0x27   :  { %s8467_s13 = sld [smem:[%s9699_s0 + %s8301_s15]]   ;;  %s8305_s15 = smov 27  }
  0x29   :  { %9743 = sst [smem:[#allocation69_spill]] %s8452_s5 }
  0x2a   :  { %s8472_s5 = sld [smem:[%s9699_s0 + %s8302_s22]]   ;;  %s8306_s22 = smov 28  }
  0x2b   :  { %9744 = sst [smem:[#allocation70_spill]] %s8457_s4 }
  0x2c   :  { %9745 = sst [smem:[#allocation71_spill]] %s8462_s20 }
  0x2d   :  { %9746 = sst [smem:[#allocation72_spill]] %s8467_s13 }
  0x2e   :  { %s8477_s4 = sld [smem:[%s9699_s0 + %s8303_s28]]   ;;  %s8307_s28 = smov 29  }
  0x2f   :  { %s8482_s20 = sld [smem:[%s9699_s0 + %s8304_s7]]  }
  0x30   :  { %9747 = sst [smem:[#allocation73_spill]] %s8472_s5 }
  0x31   :  { %s8487_s13 = sld [smem:[%s9699_s0 + %s8305_s15]]  }
  0x32   :  { %s8492_s5 = sld [smem:[%s9699_s0 + %s8306_s22]]  }
  0x34   :  { %9748 = sst [smem:[#allocation74_spill]] %s8477_s4 }
  0x35   :  { %9749 = sst [smem:[#allocation75_spill]] %s8482_s20 }
  0x36   :  { %s8497_s4 = sld [smem:[%s9699_s0 + %s8307_s28]]  }
  0x3c   :  { %9750 = sst [smem:[#allocation76_spill]] %s8497_s4 }
  0x3d   :  { %65 = vsyncpa [#allocation6], 0 }
  0x3e   :  { %67 = vsyncpa [#allocation6 + $0x1], 0 }
  0x3f   :  { %68 = vsyncpa [#allocation9], 0 }
  0x40   :  { %70 = vsyncpa [#allocation9 + $0x1], 0 }
  0x41   :  { %71 = vsyncpa [#allocation12], 0 }
  0x42   :  { %72 = vsyncpa [#allocation15], 0 }
  0x43   :  { %73 = vsyncpa [#allocation18], 0 }
  0x44   :  { %74 = vsyncpa [#allocation21], 0 }
  0x45   :  { %75 = vsyncpa [#allocation24], 0 }
  0x46   :  { %76 = vsyncpa [#allocation27], 0 }
  0x47   :  { %77 = vsyncpa [#allocation30], 0 }
  0x48   :  { %78 = vsyncpa [#allocation33], 0 }
  0x49   :  { %79 = vsyncpa [#allocation36], 0 }
  0x4a   :  { %80 = vsyncpa [#allocation7], 0 }
  0x4b   :  { %82 = vsyncpa [#allocation7 + $0x1], 0 }
  0x4c   :  { %83 = vsyncpa [#allocation39], 0 }
  0x4d   :  { %85 = vsyncpa [#allocation39 + $0x1], 0  ;;  %s8499_s7 = smov 0   ;;  %s8501_s0 = smov 0  }
  0x4e   :  { %s8503_s10 = smov 0   ;;  %s8505_s11 = smov 0  }
  0x4f LB: > { %s9751_s9 = sld [smem:[#allocation55_spill]]  ;;  %s8308_s15 = smov [#allocation11]   ;;  %s8265_s7 = sphi %s8499_s7, %s9821_s7   ;;  %s8277_s11 = sphi %s8505_s11, %s9818_s11   ;;  %s8273_s10 = sphi %s8503_s10, %s9820_s10   ;;  %s8269_s0 = sphi %s8501_s0, %s9822_s0  }
  0x50   : > { %9752 = sst [smem:[#allocation77_spill]] %s8273_s10  ;;  %s768_s16 = sshll.u32 %s8308_s15, 4  ;;  %s769_s16 = int_to_ptr.vmem [resolvable:$true] %s768_s16 }
  0x51   : > { %s8520_s18 = sadd.s32 4294967295, %s8277_s11   ;;  %p6471_p0 = scmp.ge.s32.totalorder %s8277_s11, 1 }
  0x52   : > { %p9709_p1 = scmp.eq.s32.totalorder %s8520_s18, 0  ;;  %p756_p2 = scmp.lt.s32.totalorder %s8277_s11, 3 }
  0x53   : > { %s8309_s23 = smov [#allocation14]   ;;  %s8310_s1 = smov [#allocation17]  }
  0x54   : > { %p8525_p3 = pnand %p6471_p0, %p756_p2  ;;  %s794_s26 = sshll.u32 %s8309_s23, 4  ;;  %s8538_s26 = int_to_ptr.vmem [resolvable:$true] %s794_s26 }
  0x55   : > { %s820_s2 = sshll.u32 %s8310_s1, 4  ;;  %s7602_s4 = scalar_lea.vmem %s769_s16, 256  ;;  %s8540_s2 = int_to_ptr.vmem [resolvable:$true] %s820_s2 }
  0x56   : > { %s9753_s22 = scalar_select %p8525_p3, 1, 0 }
  0x57   : > { %p7262_p5 = pneg %p8525_p3  ;;  %p7603_p8 = scmp.ne.s32.totalorder %s769_s16, %s7602_s4 }
  0x58   : > { %p7610_p11 = scmp.lt.s32.totalorder %s769_s16, %s769_s16  ;;  %p7611_p12 = scmp.lt.s32.totalorder %s7602_s4, %s7602_s4 }
  0x59   : > { %p8534_p6 = pnand %p7262_p5, %p9709_p1 }
  0x5a   : > { %p7612_p13 = por %p7611_p12, %p7610_p11 }
  0x5b   : > { %s9754_s28 = scalar_select %p8534_p6, 1, 0 }
  0x5c   : > { %p8544_p7 = pneg %p8534_p6 }
  0x5e   : > { %s9755_s15 = scalar_select %p8544_p7, 1, 0 }
  0x5f   : > { %p7605_p9 = pnand %p7603_p8, %p8544_p7 }
  0x61   : > { %p7606_p10 = pneg %p7605_p9 }
  0x63   : > { %p7613_p0 = pnand %p7612_p13, %p7606_p10 }
  0x65   : > { %7616 = shalt.err (!%p7613_p0)
}
  0x66   : > { %s9705_s23 = smov 64   ;;  %s9756_s17 = sld [smem:[#allocation57_spill]] }
  0x67   : > { %s9707_s1 = smov 4   ;;  %s7628_s20 = scalar_lea.vmem %s8538_s26, 256 }
  0x68   : > { %p7629_p2 = scmp.ne.s32.totalorder %s8538_s26, %s7628_s20  ;;  %p7636_p9 = scmp.lt.s32.totalorder %s8538_s26, %s8538_s26 }
  0x69   : > { %p7637_p10 = scmp.lt.s32.totalorder %s7628_s20, %s7628_s20 }
  0x6a   : > { %p7631_p5 = pnand %p7629_p2, %p8544_p7 }
  0x6b   : > { %p7638_p11 = por %p7637_p10, %p7636_p9 }
  0x6c   : > { %7265 = dma.hbm_to_vmem [thread:$0]  (!%p8534_p6), %s9756_s17, 256, %s769_s16, [#allocation12], %s9705_s23, %s9705_s23, %s9707_s1  }
  0x6d   : > { %p7632_p8 = pneg %p7631_p5 }
  0x6f   : > { %p7639_p12 = pnand %p7638_p11, %p7632_p8 }
  0x71   : > { %7642 = shalt.err (!%p7639_p12)
}
  0x72   : > { %s9757_s25 = sld [smem:[#allocation58_spill]]  ;;  %s7654_s4 = scalar_lea.vmem %s8540_s2, 256 }
  0x73   : > { %p7655_p13 = scmp.ne.s32.totalorder %s8540_s2, %s7654_s4  ;;  %p7662_p5 = scmp.lt.s32.totalorder %s8540_s2, %s8540_s2 }
  0x74   : > { %p7663_p8 = scmp.lt.s32.totalorder %s7654_s4, %s7654_s4 }
  0x75   : > { %p7657_p0 = pnand %p7655_p13, %p8544_p7 }
  0x76   : > { %p7664_p9 = por %p7663_p8, %p7662_p5 }
  0x77   : > { %p7658_p2 = pneg %p7657_p0 }
  0x78   : > { %7271 = dma.hbm_to_vmem [thread:$0]  (!%p8534_p6), %s9757_s25, 256, %s8538_s26, [#allocation15], %s9705_s23, %s9705_s23, %s9707_s1  }
  0x79   : > { %p7665_p10 = pnand %p7664_p9, %p7658_p2 }
  0x7b   : > { %7668 = shalt.err (!%p7665_p10)
}
  0x7c   : > { %s9758_s3 = sld [smem:[#allocation59_spill]]  ;;  %s8313_s20 = smov [#allocation20]  }
  0x7d   : > { %s849_s16 = sshll.u32 %s8313_s20, 4  ;;  %s8314_s26 = smov [#allocation23]   ;;  %s850_s16 = int_to_ptr.vmem [resolvable:$true] %s849_s16 }
  0x7e   : > { %s876_s17 = sshll.u32 %s8314_s26, 4  ;;  %s7680_s25 = scalar_lea.vmem %s850_s16, 256  ;;  %s877_s17 = int_to_ptr.vmem [resolvable:$true] %s876_s17 }
  0x7f   : > { %p7681_p11 = scmp.ne.s32.totalorder %s850_s16, %s7680_s25  ;;  %p7688_p0 = scmp.lt.s32.totalorder %s850_s16, %s850_s16 }
  0x80   : > { %p7689_p2 = scmp.lt.s32.totalorder %s7680_s25, %s7680_s25 }
  0x81   : > { %p7683_p12 = pnand %p7681_p11, %p8544_p7 }
  0x82   : > { %7277 = dma.hbm_to_vmem [thread:$0]  (!%p8534_p6), %s9758_s3, 256, %s8540_s2, [#allocation18], %s9705_s23, %s9705_s23, %s9707_s1  }
  0x83   : > { %p7684_p13 = pneg %p7683_p12  ;;  %p7690_p5 = por %p7689_p2, %p7688_p0 }
  0x85   : > { %p7691_p8 = pnand %p7690_p5, %p7684_p13 }
  0x87   : > { %7694 = shalt.err (!%p7691_p8)
}
  0x88   : > { %s9759_s19 = sld [smem:[#allocation61_spill]]  ;;  %s7706_s2 = scalar_lea.vmem %s877_s17, 16 }
  0x89   : > { %p7707_p9 = scmp.ne.s32.totalorder %s877_s17, %s7706_s2  ;;  %s7713_s4 = scalar_lea.vmem %s877_s17, 32 }
  0x8a   : > { %p7714_p12 = scmp.lt.s32.totalorder %s877_s17, %s877_s17  ;;  %p7715_p4 = scmp.lt.s32.totalorder %s7713_s4, %s7706_s2 }
  0x8b   : > { %p7709_p10 = pnand %p7707_p9, %p8544_p7 }
  0x8c   : > { %p7716_p0 = por %p7715_p4, %p7714_p12 }
  0x8d   : > { %p7710_p11 = pneg %p7709_p10 }
  0x8e   : > { %7283 = dma.hbm_to_vmem [thread:$0]  (!%p8534_p6), %s9759_s19, 256, %s850_s16, [#allocation21], %s9705_s23, %s9705_s23, %s9707_s1  }
  0x8f   : > { %p7717_p13 = pnand %p7716_p0, %p7710_p11 }
  0x91   : > { %7720 = shalt.err (!%p7717_p13)
}
  0x92   : > { %s9760_s30 = sld [smem:[#allocation62_spill]]  ;;  %s8315_s25 = smov [#allocation26]  }
  0x93   : > { %s898_s20 = sshll.u32 %s8315_s25, 4  ;;  %s8316_s16 = smov [#allocation29]   ;;  %s899_s20 = int_to_ptr.vmem [resolvable:$true] %s898_s20 }
  0x94   : > { %s920_s26 = sshll.u32 %s8316_s16, 4  ;;  %s7732_s23 = scalar_lea.vmem %s899_s20, 16  ;;  %s921_s26 = int_to_ptr.vmem [resolvable:$true] %s920_s26 }
  0x95   : > { %p7733_p2 = scmp.ne.s32.totalorder %s899_s20, %s7732_s23  ;;  %s7739_s1 = scalar_lea.vmem %s899_s20, 32 }
  0x96   : > { %p7740_p9 = scmp.lt.s32.totalorder %s899_s20, %s899_s20  ;;  %p7741_p4 = scmp.lt.s32.totalorder %s7739_s1, %s7732_s23 }
  0x97   : > { %p7735_p5 = pnand %p7733_p2, %p8544_p7 }
  0x98   : > { %7289 = dma.hbm_to_vmem [thread:$0]  (!%p8534_p6), %s9760_s30, 16, %s877_s17, [#allocation24]  }
  0x99   : > { %p7736_p8 = pneg %p7735_p5  ;;  %p7742_p10 = por %p7741_p4, %p7740_p9 }
  0x9b   : > { %p7743_p11 = pnand %p7742_p10, %p7736_p8 }
  0x9d   : > { %7746 = shalt.err (!%p7743_p11)
}
  0x9e   : > { %s9761_s12 = sld [smem:[#allocation63_spill]]  ;;  %s7758_s17 = scalar_lea.vmem %s921_s26, 16 }
  0x9f   : > { %p7759_p12 = scmp.ne.s32.totalorder %s921_s26, %s7758_s17  ;;  %s7765_s2 = scalar_lea.vmem %s921_s26, 32 }
  0xa0   : > { %p7766_p2 = scmp.lt.s32.totalorder %s921_s26, %s921_s26  ;;  %p7767_p5 = scmp.lt.s32.totalorder %s7765_s2, %s7758_s17 }
  0xa1   : > { %p7761_p0 = pnand %p7759_p12, %p8544_p7 }
  0xa2   : > { %p7768_p1 = por %p7767_p5, %p7766_p2 }
  0xa3   : > { %p7762_p13 = pneg %p7761_p0 }
  0xa4   : > { %7295 = dma.hbm_to_vmem [thread:$0]  (!%p8534_p6), %s9761_s12, 16, %s899_s20, [#allocation27]  }
  0xa5   : > { %p7769_p3 = pnand %p7768_p1, %p7762_p13 }
  0xa7   : > { %7772 = shalt.err (!%p7769_p3)
}
  0xa8   : > { %s9762_s27 = sld [smem:[#allocation65_spill]]  ;;  %s8317_s23 = smov [#allocation32]  }
  0xa9   : > { %s942_s1 = sshll.u32 %s8317_s23, 4  ;;  %s943_s1 = int_to_ptr.vmem [resolvable:$true] %s942_s1 }
  0xaa   : > { %s7784_s4 = scalar_lea.vmem %s943_s1, 16  ;;  %s7791_s25 = scalar_lea.vmem %s943_s1, 32 }
  0xab   : > { %p7785_p8 = scmp.ne.s32.totalorder %s943_s1, %s7784_s4  ;;  %p7792_p10 = scmp.lt.s32.totalorder %s943_s1, %s943_s1 }
  0xac   : > { %p7793_p11 = scmp.lt.s32.totalorder %s7791_s25, %s7784_s4 }
  0xad   : > { %p7787_p9 = pnand %p7785_p8, %p8544_p7 }
  0xae   : > { %7301 = dma.hbm_to_vmem [thread:$0]  (!%p8534_p6), %s9762_s27, 16, %s921_s26, [#allocation30]  }
  0xaf   : > { %p7788_p4 = pneg %p7787_p9  ;;  %p7794_p12 = por %p7793_p11, %p7792_p10 }
  0xb1   : > { %p7795_p0 = pnand %p7794_p12, %p7788_p4 }
  0xb3   : > { %7798 = shalt.err (!%p7795_p0)
}
  0xb4   : > { %s9763_s14 = sld [smem:[#allocation67_spill]]  ;;  %s9711_s20 = sadd.s32 4294967294, %s8277_s11  }
  0xb5   : > { %s8612_s16 = sadd.s32 1, %s8277_s11   ;;  %s98_s17 = sadd.s32 1, %s8273_s10 }
  0xb6   : > { %9764 = sst [smem:[#allocation78_spill]] %s8612_s16  ;;  %s95_s26 = ssub.s32 %s8277_s11, %s8612_s16 }
  0xb7   : > { %p96_p1 = scmp.eq.s32.totalorder %s95_s26, 0  ;;  %p105_p3 = scmp.ne.s32.totalorder %s8273_s10, %s8269_s0 }
  0xb8   : > { %p106_p13 = scmp.eq.s32.totalorder %s8277_s11, 0  ;;  %p111_p2 = scmp.ne.s32.totalorder %s8269_s0, %s8265_s7 }
  0xb9   : > { %s8623_s2 = scalar_select %p96_p1, %s8273_s10, %s98_s17  }
  0xba   : > { %7307 = dma.hbm_to_vmem [thread:$0]  (!%p8534_p6), %s9763_s14, 16, %s943_s1, [#allocation33]  }
  0xbb   : > { %9765 = sst [smem:[#allocation79_spill]] %s8623_s2  ;;  %p107_p5 = por %p106_p13, %p105_p3 }
  0xbc   : > { %p9766_p8 = scmp.eq.s32.totalorder %s8520_s18, 0  ;;  %p691_p4 = scmp.eq.s32.totalorder %s8520_s18, 1 }
  0xbd   : > { %p697_p10 = scmp.eq.s32.totalorder %s9711_s20, 1  ;;  %p7351_p11 = scmp.lt.s32.totalorder %s8277_s11, 2 }
  0xbe   : > { %p8627_p9 = por %p9766_p8, %p111_p2  ;;  %s8636_s1 = sand.u32 1, %s8273_s10  }
  0xbf   : > { %p8638_p12 = por %p691_p4, %p105_p3  ;;  %p8642_p0 = por %p697_p10, %p111_p2 }
  0xc0   : > { %s9767_s23 = scalar_select %p8627_p9, 1, 0 }
  0xc1   : > { %s9768_s4 = scalar_select %p8638_p12, 1, 0 }
  0xc2   : > { %s9769_s25 = scalar_select %p8642_p0, 1, 0 }
  0xc3   : > { %p8646_p1 = pnand %p7351_p11, %p107_p5  ;;  %s1015_s17 = sand.u32 1, %s8277_s11  }
  0xc4   : > { %9770 = sst [smem:[#allocation80_spill]] %s9769_s25  ;;  %s6492_s20 = sshll.u32 %s8636_s1, 4 }
  0xc5   : > { %s9771_s26 = scalar_select %p8646_p1, 1, 0 }
  0xc6   : > { %s6701_s3 = sshll.u32 %s8277_s11, 8  ;;  %s1019_s12 = scalar_lea.vmem [#allocation8], %s6492_s20 }
  0xc7   : > { %s1026_s14 = sshll.u32 %s1019_s12, 4  ;;  %s8654_s19 = scalar_lea.hbm %s9751_s9, %s6701_s3  ;;  %s8656_s14 = int_to_ptr.vmem [resolvable:$true] %s1026_s14 }
  0xc8   : > { %s8658_s27 = scalar_lea.sflag [#allocation9], %s1015_s17  ;;  %s7799_s30 = scalar_lea.hbm %s8654_s19, 256 }
  0xc9   : > { %p7800_p3 = scmp.ne.s32.totalorder %s8654_s19, %s7799_s30  ;;  %p8664_p13 = pneg %p8646_p1 }
  0xca   : > { %s7804_s3 = scalar_lea.hbm %s9751_s9, 512  ;;  %p7805_p8 = scmp.lt.s32.totalorder %s8654_s19, %s9751_s9 }
  0xcb   : > { %s9772_s2 = scalar_select %p8664_p13, 1, 0 }
  0xcc   : > { %p7802_p2 = pnand %p8664_p13, %p7800_p3  ;;  %p7806_p4 = scmp.lt.s32.totalorder %s7804_s3, %s7799_s30 }
  0xce   : > { %p7803_p5 = pneg %p7802_p2  ;;  %p7807_p10 = por %p7806_p4, %p7805_p8 }
  0xd0   : > { %p7808_p11 = pnand %p7807_p10, %p7803_p5 }
  0xd2   : > { %7811 = shalt.err (!%p7808_p11)
}
  0xd3   : > { %s7812_s12 = scalar_lea.vmem %s8656_s14, 256  ;;  %s8318_s20 = smov [#allocation8]  }
  0xd4   : > { %p7813_p0 = scmp.ne.s32.totalorder %s8656_s14, %s7812_s12  ;;  %s7817_s17 = sshll.u32 %s8318_s20, 4  ;;  %s7818_s17 = int_to_ptr.vmem [resolvable:$false] %s7817_s17 }
  0xd5   : > { %s7819_s10 = scalar_lea.vmem %s7818_s17, 512  ;;  %p7820_p3 = scmp.lt.s32.totalorder %s8656_s14, %s7818_s17 }
  0xd6   : > { %p7815_p12 = pnand %p7813_p0, %p8664_p13  ;;  %p7821_p2 = scmp.lt.s32.totalorder %s7819_s10, %s7812_s12 }
  0xd8   : > { %p7816_p9 = pneg %p7815_p12  ;;  %p7822_p6 = por %p7821_p2, %p7820_p3 }
  0xda   : > { %p7823_p7 = pnand %p7822_p6, %p7816_p9 }
  0xdc   : > { %7826 = shalt.err (!%p7823_p7)
}
  0xdd   : > { %s8319_s30 = smov 128   ;;  %s8320_s3 = smov 8  }
  0xde   : > { %7320 = dma.hbm_to_vmem [thread:$0]  (!%p8646_p1), %s8654_s19, 256, %s8656_s14, %s8658_s27, %s8319_s30, %s8319_s30, %s8320_s3  }
  0xdf   : > { %s8321_s9 = smov [#allocation13]   ;;  %s8322_s25 = smov [#allocation16]  }
  0xe0   : > { %s781_s16 = sshll.u32 %s8321_s9, 4  ;;  %s807_s20 = sshll.u32 %s8322_s25, 4  ;;  %s782_s16 = int_to_ptr.vmem [resolvable:$true] %s781_s16  ;;  %s808_s20 = int_to_ptr.vmem [resolvable:$true] %s807_s20 }
  0xe1   : > { %s7838_s17 = scalar_lea.vmem %s782_s16, 256  ;;  %p9773_p0 = scmp.ne.s32.totalorder %s9755_s15, 0 }
  0xe2   : > { %p7839_p12 = scmp.ne.s32.totalorder %s782_s16, %s7838_s17  ;;  %p7846_p9 = scmp.lt.s32.totalorder %s782_s16, %s782_s16 }
  0xe3   : > { %p7847_p5 = scmp.lt.s32.totalorder %s7838_s17, %s7838_s17 }
  0xe4   : > { %p7841_p6 = pnand %p7839_p12, %p9773_p0 }
  0xe5   : > { %p7848_p8 = por %p7847_p5, %p7846_p9 }
  0xe6   : > { %p7842_p7 = pneg %p7841_p6 }
  0xe8   : > { %p7849_p4 = pnand %p7848_p8, %p7842_p7 }
  0xea   : > { %7852 = shalt.err (!%p7849_p4)
}
  0xeb   : > { %p9774_p10 = scmp.ne.s32.totalorder %s9754_s28, 0  ;;  %s9775_s10 = smov 4  }
  0xec   : > { %s9776_s14 = smov 64   ;;  %s7864_s9 = scalar_lea.vmem %s808_s20, 256 }
  0xed   : > { %7268 = dma.hbm_to_vmem [thread:$0]  (!%p9774_p10), %s8372_s21, 256, %s782_s16, [#allocation12], %s9776_s14, %s9776_s14, %s9775_s10  }
  0xee   : > { %p7865_p11 = scmp.ne.s32.totalorder %s808_s20, %s7864_s9  ;;  %p7872_p12 = scmp.lt.s32.totalorder %s808_s20, %s808_s20 }
  0xef   : > { %p7873_p6 = scmp.lt.s32.totalorder %s7864_s9, %s7864_s9 }
  0xf0   : > { %p7867_p3 = pnand %p7865_p11, %p9773_p0 }
  0xf1   : > { %p7874_p1 = por %p7873_p6, %p7872_p12 }
  0xf2   : > { %p7868_p2 = pneg %p7867_p3 }
  0xf4   : > { %p7875_p13 = pnand %p7874_p1, %p7868_p2 }
  0xf6   : > { %7878 = shalt.err (!%p7875_p13)
}
  0xf7   : > { %7274 = dma.hbm_to_vmem [thread:$0]  (!%p9774_p10), %s8382_s29, 256, %s808_s20, [#allocation15], %s9776_s14, %s9776_s14, %s9775_s10  }
  0xf8   : > { %s8323_s19 = smov [#allocation19]   ;;  %s8324_s25 = smov [#allocation22]  }
  0xf9   : > { %s833_s16 = sshll.u32 %s8323_s19, 4  ;;  %s862_s12 = sshll.u32 %s8324_s25, 4  ;;  %s834_s16 = int_to_ptr.vmem [resolvable:$true] %s833_s16  ;;  %s863_s12 = int_to_ptr.vmem [resolvable:$true] %s862_s12 }
  0xfa   : > { %s7890_s30 = scalar_lea.vmem %s834_s16, 256  ;;  %p7898_p13 = scmp.lt.s32.totalorder %s834_s16, %s834_s16 }
  0xfb   : > { %p7891_p7 = scmp.ne.s32.totalorder %s834_s16, %s7890_s30  ;;  %p7899_p5 = scmp.lt.s32.totalorder %s7890_s30, %s7890_s30 }
  0xfd   : > { %p7893_p9 = pnand %p7891_p7, %p9773_p0  ;;  %p7900_p8 = por %p7899_p5, %p7898_p13 }
  0xff   : > { %p7894_p1 = pneg %p7893_p9 }
 0x101   : > { %p7901_p4 = pnand %p7900_p8, %p7894_p1 }
 0x103   : > { %7904 = shalt.err (!%p7901_p4)
}
 0x104   : > { %7280 = dma.hbm_to_vmem [thread:$0]  (!%p9774_p10), %s8392_s8, 256, %s834_s16, [#allocation18], %s9776_s14, %s9776_s14, %s9775_s10  }
 0x105   : > { %s7916_s3 = scalar_lea.vmem %s863_s12, 256  ;;  %p7924_p12 = scmp.lt.s32.totalorder %s863_s12, %s863_s12 }
 0x106   : > { %p7917_p11 = scmp.ne.s32.totalorder %s863_s12, %s7916_s3  ;;  %p7925_p6 = scmp.lt.s32.totalorder %s7916_s3, %s7916_s3 }
 0x108   : > { %p7919_p3 = pnand %p7917_p11, %p9773_p0  ;;  %p7926_p7 = por %p7925_p6, %p7924_p12 }
 0x10a   : > { %p7920_p2 = pneg %p7919_p3 }
 0x10c   : > { %p7927_p9 = pnand %p7926_p7, %p7920_p2 }
 0x10e   : > { %7930 = shalt.err (!%p7927_p9)
}
 0x10f   : > { %7286 = dma.hbm_to_vmem [thread:$0]  (!%p9774_p10), %s8407_s24, 256, %s863_s12, [#allocation21], %s9776_s14, %s9776_s14, %s9775_s10  }
 0x110   : > { %s8325_s20 = smov [#allocation25]   ;;  %s8326_s9 = smov [#allocation28]  }
 0x111   : > { %s887_s17 = sshll.u32 %s8325_s20, 4  ;;  %s909_s19 = sshll.u32 %s8326_s9, 4  ;;  %s888_s17 = int_to_ptr.vmem [resolvable:$true] %s887_s17  ;;  %s910_s19 = int_to_ptr.vmem [resolvable:$true] %s909_s19 }
 0x112   : > { %s7942_s16 = scalar_lea.vmem %s888_s17, 16  ;;  %s7949_s25 = scalar_lea.vmem %s888_s17, 32 }
 0x113   : > { %p7943_p1 = scmp.ne.s32.totalorder %s888_s17, %s7942_s16  ;;  %p7950_p8 = scmp.lt.s32.totalorder %s888_s17, %s888_s17 }
 0x114   : > { %p7951_p4 = scmp.lt.s32.totalorder %s7949_s25, %s7942_s16 }
 0x115   : > { %p7945_p13 = pnand %p7943_p1, %p9773_p0 }
 0x116   : > { %p7952_p11 = por %p7951_p4, %p7950_p8 }
 0x117   : > { %p7946_p5 = pneg %p7945_p13 }
 0x119   : > { %p7953_p3 = pnand %p7952_p11, %p7946_p5 }
 0x11b   : > { %7956 = shalt.err (!%p7953_p3)
}
 0x11c   : > { %7292 = dma.hbm_to_vmem [thread:$0]  (!%p9774_p10), %s8417_s6, 16, %s888_s17, [#allocation24]  }
 0x11d   : > { %s7968_s12 = scalar_lea.vmem %s910_s19, 16  ;;  %s7975_s30 = scalar_lea.vmem %s910_s19, 32 }
 0x11e   : > { %p7969_p2 = scmp.ne.s32.totalorder %s910_s19, %s7968_s12  ;;  %p7976_p7 = scmp.lt.s32.totalorder %s910_s19, %s910_s19 }
 0x11f   : > { %p7977_p9 = scmp.lt.s32.totalorder %s7975_s30, %s7968_s12 }
 0x120   : > { %p7971_p12 = pnand %p7969_p2, %p9773_p0 }
 0x121   : > { %p7978_p1 = por %p7977_p9, %p7976_p7 }
 0x122   : > { %p7972_p6 = pneg %p7971_p12 }
 0x124   : > { %p7979_p13 = pnand %p7978_p1, %p7972_p6 }
 0x126   : > { %7982 = shalt.err (!%p7979_p13)
}
 0x127   : > { %s9777_s3 = sld [smem:[#allocation64_spill]]  ;;  %s8327_s20 = smov [#allocation31]  }
 0x128   : > { %s931_s9 = sshll.u32 %s8327_s20, 4  ;;  %s8328_s16 = smov [#allocation34]   ;;  %s932_s9 = int_to_ptr.vmem [resolvable:$true] %s931_s9 }
 0x129   : > { %s961_s17 = sshll.u32 %s8328_s16, 4  ;;  %s7994_s25 = scalar_lea.vmem %s932_s9, 16  ;;  %s962_s17 = int_to_ptr.vmem [resolvable:$true] %s961_s17 }
 0x12a   : > { %p7995_p5 = scmp.ne.s32.totalorder %s932_s9, %s7994_s25  ;;  %s8001_s12 = scalar_lea.vmem %s932_s9, 32 }
 0x12b   : > { %p8002_p11 = scmp.lt.s32.totalorder %s932_s9, %s932_s9  ;;  %p8003_p3 = scmp.lt.s32.totalorder %s8001_s12, %s7994_s25 }
 0x12c   : > { %p7997_p8 = pnand %p7995_p5, %p9773_p0 }
 0x12d   : > { %7298 = dma.hbm_to_vmem [thread:$0]  (!%p9774_p10), %s9777_s3, 16, %s910_s19, [#allocation27]  }
 0x12e   : > { %p7998_p4 = pneg %p7997_p8  ;;  %p8004_p2 = por %p8003_p3, %p8002_p11 }
 0x130   : > { %p8005_p12 = pnand %p8004_p2, %p7998_p4 }
 0x132   : > { %8008 = shalt.err (!%p8005_p12)
}
 0x133   : > { %s9778_s19 = sld [smem:[#allocation66_spill]]  ;;  %s8020_s30 = scalar_lea.vmem %s962_s17, 256 }
 0x134   : > { %p8021_p6 = scmp.ne.s32.totalorder %s962_s17, %s8020_s30  ;;  %p8028_p1 = scmp.lt.s32.totalorder %s962_s17, %s962_s17 }
 0x135   : > { %p8029_p13 = scmp.lt.s32.totalorder %s8020_s30, %s8020_s30 }
 0x136   : > { %p8023_p7 = pnand %p8021_p6, %p9773_p0 }
 0x137   : > { %p8030_p5 = por %p8029_p13, %p8028_p1 }
 0x138   : > { %p8024_p9 = pneg %p8023_p7 }
 0x139   : > { %7304 = dma.hbm_to_vmem [thread:$0]  (!%p9774_p10), %s9778_s19, 16, %s932_s9, [#allocation30]  }
 0x13a   : > { %p8031_p8 = pnand %p8030_p5, %p8024_p9 }
 0x13c   : > { %8034 = shalt.err (!%p8031_p8)
}
 0x13d   : > { %s9779_s3 = sld [smem:[#allocation71_spill]]  ;;  %s8329_s20 = smov [#allocation35]  }
 0x13e   : > { %s974_s9 = sshll.u32 %s8329_s20, 4  ;;  %s6490_s16 = sshll.u32 %s8636_s1, 3  ;;  %s975_s9 = int_to_ptr.vmem [resolvable:$true] %s974_s9 }
 0x13f   : > { %s8046_s25 = scalar_lea.vmem %s975_s9, 256  ;;  %p8054_p2 = scmp.lt.s32.totalorder %s975_s9, %s975_s9 }
 0x140   : > { %p8047_p4 = scmp.ne.s32.totalorder %s975_s9, %s8046_s25  ;;  %p8055_p12 = scmp.lt.s32.totalorder %s8046_s25, %s8046_s25 }
 0x142   : > { %p8049_p11 = pnand %p8047_p4, %p9773_p0  ;;  %p8056_p6 = por %p8055_p12, %p8054_p2 }
 0x143   : > { %7310 = dma.hbm_to_vmem [thread:$0]  (!%p9774_p10), %s9779_s3, 256, %s962_s17, [#allocation33], %s9776_s14, %s9776_s14, %s9775_s10  }
 0x144   : > { %p8050_p3 = pneg %p8049_p11 }
 0x146   : > { %p8057_p7 = pnand %p8056_p6, %p8050_p3 }
 0x148   : > { %8060 = shalt.err (!%p8057_p7)
}
 0x149   : > { %s9780_s17 = sld [smem:[#allocation72_spill]]  ;;  %s6491_s15 = sshll.u32 %s8277_s11, 7 }
 0x14a   : > { %s9781_s12 = sld [smem:[#allocation54_spill]]  ;;  %s1001_s19 = scalar_lea.vmem [#allocation5], %s6490_s16 }
 0x14b   : > { %s1008_s30 = sshll.u32 %s1001_s19, 4  ;;  %s998_s28 = scalar_lea.sflag [#allocation6], %s8636_s1  ;;  %s1009_s30 = int_to_ptr.vmem [resolvable:$true] %s1008_s30 }
 0x14c   : > { %p9782_p9 = scmp.ne.s32.totalorder %s9772_s2, 0 }
 0x14f   : > { %7313 = dma.hbm_to_vmem [thread:$0]  (!%p9774_p10), %s9780_s17, 256, %s975_s9, [#allocation36], %s9776_s14, %s9776_s14, %s9775_s10  }
 0x150   : > { %s1006_s3 = scalar_lea.hbm %s9781_s12, %s6491_s15  ;;  %s8066_s25 = scalar_lea.hbm %s9781_s12, 256 }
 0x151   : > { %s8061_s20 = scalar_lea.hbm %s1006_s3, 128  ;;  %p8067_p5 = scmp.lt.s32.totalorder %s1006_s3, %s9781_s12 }
 0x152   : > { %p8062_p0 = scmp.ne.s32.totalorder %s1006_s3, %s8061_s20  ;;  %p8068_p8 = scmp.lt.s32.totalorder %s8066_s25, %s8061_s20 }
 0x154   : > { %p8064_p1 = pnand %p8062_p0, %p9782_p9  ;;  %p8069_p4 = por %p8068_p8, %p8067_p5 }
 0x156   : > { %p8065_p13 = pneg %p8064_p1 }
 0x158   : > { %p8070_p11 = pnand %p8069_p4, %p8065_p13 }
 0x15a   : > { %8073 = shalt.err (!%p8070_p11)
}
 0x15b   : > { %s8074_s10 = scalar_lea.vmem %s1009_s30, 128  ;;  %s8330_s14 = smov [#allocation5]  }
 0x15c   : > { %p8075_p10 = scmp.ne.s32.totalorder %s1009_s30, %s8074_s10  ;;  %s8079_s9 = sshll.u32 %s8330_s14, 4  ;;  %s8080_s9 = int_to_ptr.vmem [resolvable:$false] %s8079_s9 }
 0x15d   : > { %s8081_s17 = scalar_lea.vmem %s8080_s9, 256  ;;  %p8082_p12 = scmp.lt.s32.totalorder %s1009_s30, %s8080_s9 }
 0x15e   : > { %p8077_p3 = pnand %p8075_p10, %p9782_p9  ;;  %p8083_p6 = scmp.lt.s32.totalorder %s8081_s17, %s8074_s10 }
 0x160   : > { %p8078_p2 = pneg %p8077_p3  ;;  %p8084_p7 = por %p8083_p6, %p8082_p12 }
 0x162   : > { %p8085_p0 = pnand %p8084_p7, %p8078_p2 }
 0x164   : > { %8088 = shalt.err (!%p8085_p0)
}
 0x165   : > { %p9783_p1 = scmp.ne.s32.totalorder %s9771_s26, 0  ;;  %s9784_s19 = sld [smem:[#allocation56_spill]] }
 0x166   : > { %s1040_s25 = scalar_lea.vmem [#allocation10], %s6490_s16 }
 0x167   : > { %7317 = dma.hbm_to_vmem [thread:$0]  (!%p9783_p1), %s1006_s3, 128, %s1009_s30, %s998_s28  }
 0x168   : > { %s1047_s14 = sshll.u32 %s1040_s25, 4  ;;  %s1048_s14 = int_to_ptr.vmem [resolvable:$true] %s1047_s14 }
 0x16b   : > { %s1045_s20 = scalar_lea.hbm %s9784_s19, %s6491_s15  ;;  %s8094_s10 = scalar_lea.hbm %s9784_s19, 256 }
 0x16c   : > { %s8089_s9 = scalar_lea.hbm %s1045_s20, 128  ;;  %p8095_p4 = scmp.lt.s32.totalorder %s1045_s20, %s9784_s19 }
 0x16d   : > { %p8090_p13 = scmp.ne.s32.totalorder %s1045_s20, %s8089_s9  ;;  %p8096_p11 = scmp.lt.s32.totalorder %s8094_s10, %s8089_s9 }
 0x16f   : > { %p8092_p5 = pnand %p8090_p13, %p9782_p9  ;;  %p8097_p10 = por %p8096_p11, %p8095_p4 }
 0x171   : > { %p8093_p8 = pneg %p8092_p5 }
 0x173   : > { %p8098_p3 = pnand %p8097_p10, %p8093_p8 }
 0x175   : > { %8101 = shalt.err (!%p8098_p3)
}
 0x176   : > { %s8102_s17 = scalar_lea.vmem %s1048_s14, 128  ;;  %s8331_s1 = smov [#allocation10]  }
 0x177   : > { %p8103_p2 = scmp.ne.s32.totalorder %s1048_s14, %s8102_s17  ;;  %s8107_s16 = sshll.u32 %s8331_s1, 4  ;;  %s8108_s16 = int_to_ptr.vmem [resolvable:$false] %s8107_s16 }
 0x178   : > { %s8109_s15 = scalar_lea.vmem %s8108_s16, 256  ;;  %p8110_p7 = scmp.lt.s32.totalorder %s1048_s14, %s8108_s16 }
 0x179   : > { %p8105_p12 = pnand %p8103_p2, %p9782_p9  ;;  %p8111_p0 = scmp.lt.s32.totalorder %s8109_s15, %s8102_s17 }
 0x17b   : > { %p8106_p6 = pneg %p8105_p12  ;;  %p8112_p13 = por %p8111_p0, %p8110_p7 }
 0x17d   : > { %p8113_p5 = pnand %p8112_p13, %p8106_p6 }
 0x17f   : > { %8116 = shalt.err (!%p8113_p5)
}
 0x180   : > { %7323 = dma.hbm_to_vmem [thread:$0]  (!%p9783_p1), %s1045_s20, 128, %s1048_s14, %s8658_s27  }
 0x181   : > { %p9785_p8 = scmp.ne.s32.totalorder %s9753_s22, 0 }
 0x182   : > { %s8779_s2 = sand.u32 (!%p9785_p8), 1, %s8269_s0   ;;  %p9786_p9 = scmp.ne.s32.totalorder (!%p9785_p8), %s9767_s23, 0 }
 0x183   : > { %1056 = sbr.rel (%p9785_p8) target bundleno = 2640 (0xa50), region = 128  ;;  %s8782_s30 = sshll.u32 (!%p9785_p8), %s8779_s2, 3 }
 0x184   : > { %s1059_s3 = scalar_lea.sflag (!%p9785_p8), [#allocation6], %s8779_s2  ;;  %s1062_s28 = scalar_lea.vmem (!%p9785_p8), [#allocation5], %s8782_s30 }
 0x188   : > { %8212 = dma.done.wait (%p9786_p9), %s1059_s3, 128  }
 0x189   : > { %8214 = vsyncadd (%p9786_p9), %s1059_s3, 4294967168  ;;  %s1067_s27 = sand.u32 1, %s8520_s18   ;;  %s6499_s22 = sshll.u32 %s8779_s2, 4 }
 0x18a   : > { %s1068_s26 = scalar_lea.sflag [#allocation9], %s1067_s27  ;;  %s8796_s20 = scalar_lea.vmem [#allocation8], %s6499_s22 }
 0x18b   : > { %8216 = dma.done.wait (%p9786_p9), %s1068_s26, 384  }
 0x18c   : > { %8218 = vsyncadd (%p9786_p9), %s1068_s26, 4294966912  ;;  %s1080_s25 = scalar_lea.vmem [#allocation10], %s8782_s30  ;;  %p9787_p1 = scmp.eq.s32.totalorder %s8520_s18, 0 }
 0x18e   : > { %8220 = dma.done.wait (%p9787_p1), [#allocation12], 512   ;;  %p9788_p4 = pmov %p9787_p1 }
 0x18f   : > { %p9789_p11 = pmov %p9787_p1 }
 0x190   : > { %8222 = vsyncadd (%p9788_p4), [#allocation12], 4294966784 }
 0x191   : > { %8224 = dma.done.wait (%p9789_p11), [#allocation15], 512   ;;  %p9790_p10 = pmov %p9787_p1 }
 0x192   : > { %p9791_p3 = pmov %p9787_p1 }
 0x193   : > { %8226 = vsyncadd (%p9790_p10), [#allocation15], 4294966784 }
 0x194   : > { %8228 = dma.done.wait (%p9791_p3), [#allocation18], 512   ;;  %p9792_p2 = pmov %p9787_p1 }
 0x195   : > { %p9793_p12 = pmov %p9787_p1 }
 0x196   : > { %8230 = vsyncadd (%p9792_p2), [#allocation18], 4294966784 }
 0x197   : > { %8232 = dma.done.wait (%p9793_p12), [#allocation21], 512   ;;  %p9794_p6 = pmov %p9787_p1 }
 0x198   : > { %p9795_p7 = pmov %p9787_p1 }
 0x199   : > { %8234 = vsyncadd (%p9794_p6), [#allocation21], 4294966784 }
 0x19a   : > { %8236 = dma.done.wait (%p9795_p7), [#allocation24], 32   ;;  %p9796_p0 = pmov %p9787_p1 }
 0x19c   : > { %8238 = vsyncadd (%p9796_p0), [#allocation24], 4294967264  ;;  %p9797_p13 = pmov %p9796_p0 }
 0x19d   : > { %p9798_p5 = pmov %p9796_p0 }
 0x19e   : > { %8240 = dma.done.wait (%p9797_p13), [#allocation27], 32  }
 0x19f   : > { %8242 = vsyncadd (%p9798_p5), [#allocation27], 4294967264  ;;  %p9799_p8 = pmov %p9796_p0 }
 0x1a0   : > { %p9800_p9 = pmov %p9796_p0 }
 0x1a1   : > { %8244 = dma.done.wait (%p9799_p8), [#allocation30], 32  }
 0x1a2   : > { %8246 = vsyncadd (%p9800_p9), [#allocation30], 4294967264  ;;  %p9801_p1 = pmov %p9796_p0 }
 0x1a3   : > { %p9802_p4 = pmov %p9796_p0 }
 0x1a4   : > { %8248 = dma.done.wait (%p9801_p1), [#allocation33], 272  }
 0x1a5   : > { %8250 = vsyncadd (%p9802_p4), [#allocation33], 4294967024  ;;  %p9803_p11 = pmov %p9796_p0 }
 0x1a6   : > { %p9804_p10 = pmov %p9796_p0 }
 0x1a7   : > { %8252 = dma.done.wait (%p9803_p11), [#allocation36], 256  }
 0x1a8   : > { %8254 = vsyncadd (%p9804_p10), [#allocation36], 4294967040  ;;  %v8332_v0 = vmov 0.0   ;;  %s9805_s23 = sld [smem:[#allocation60_spill]]  ;;  %vm8333_vm0 = vmmov 0   ;;  %v7461_v1 = vld [vmem:[#allocation11 + $0x8] sm:$0xff]   ;;  %v1455_v62 = vlaneseq }
 0x1a9   : > { %6850 = vmatprep.subr.bf16.mxu0 %v8332_v0  ;;  %6858 = vmatprep.subr.bf16.mxu1 %v8332_v0  ;;  %v7462_v2 = vld [vmem:[#allocation16 + $0x8] sm:$0xff]   ;;  %v7463_v3 = vld [vmem:[#allocation11] sm:$0xff]   ;;  %v7464_v4 = vld [vmem:[#allocation16] sm:$0xff]   ;;  %vm1269_vm1 = vcmask 261120   ;;  %s8334_s14 = smov 112   ;;  %s8335_s9 = smov 120  }
 0x1aa   : > { %6854 = vmatprep.mubr.msk.bf16.mxu0 %vm8333_vm0, %v8332_v0  ;;  %6862 = vmatprep.mubr.msk.bf16.mxu1 %vm8333_vm0, %v8332_v0  ;;  %v1244_v5 = vld [vmem:[%s1062_s28] sm:$0xff]  ;;  %v7469_v8 = vld [vmem:[#allocation13 + $0x8] sm:$0xff]   ;;  %v1903_v11 = vld [vmem:[%s8796_s20] sm:$0xff]  ;;  %s8336_s10 = smov 104   ;;  %s9806_s17 = sld [smem:[#allocation68_spill]]  ;;  %vm1890_vm2 = vcmask 60416  }
 0x1ab   : > { %6851 = vmatpush3.bf16.msra.mxu0 %v7461_v1  ;;  %6859 = vmatpush3.bf16.msra.mxu1 %v7462_v2  ;;  %v1245_v6 = vpack.c.bf16 %v1244_v5, %v1244_v5  ;;  %v7467_v10 = vld [vmem:[#allocation17 + $0x8] sm:$0xff]   ;;  %v7470_v12 = vld [vmem:[#allocation13] sm:$0xff]   ;;  %v7468_v16 = vld [vmem:[#allocation17] sm:$0xff]   ;;  %v8337_v60 = vmov 1983009808   ;;  %vm3151_vm3 = vcmask 64512  }
 0x1ac   : > { %6852 = vmatprep.subr.bf16.mxu0 %v8332_v0  ;;  %6860 = vmatprep.subr.bf16.mxu1 %v8332_v0  ;;  %v1904_v13 = vld [vmem:[%s8796_s20 + $0x8] sm:$0xff]  ;;  %v7472_v17 = vld [vmem:[#allocation20] sm:$0xff]   ;;  %v1453_v61 = vunpack.c.l.s4 %v8337_v60  ;;  %v8338_v63 = vmov 1934713408   ;;  %vm3572_vm4 = vcmask 1043456   ;;  %vm3440_vm5 = vcmask 195584  }
 0x1ad   : > { %v7471_v14 = vld [vmem:[#allocation20 + $0x8] sm:$0xff]   ;;  %v1905_v15 = vpack.c.bf16 %v1904_v13, %v1903_v11  ;;  %v6525_v18 = vld [vmem:[#allocation28] ss:$0 sm:$0xff]  ;;  %v6521_v39 = vld [vmem:[#allocation23] ss:$0 sm:$0xff]  ;;  %v1485_v1 = vunpack.c.l.s4 %v8338_v63  ;;  %s9807_s1 = sld [smem:[#allocation70_spill]] }
 0x1ae   : > { %v7465_v7 = vld [vmem:[%s9805_s23 + $0x8] sm:$0xff]   ;;  %v7466_v9 = vld [vmem:[%s9805_s23] sm:$0xff]   ;;  %v6543_v34 = vld [vmem:[#allocation29] ss:$0 sm:$0xff]  ;;  %v1454_v2 = vunpack.c.0.s8 %v1453_v61  ;;  %s9808_s16 = sld [smem:[#allocation73_spill]]  ;;  %s1228_s15 = scalar_lea.vmem [#allocation37], %s8782_s30 }
 0x1af   : > { %6853 = vmatpush3.bf16.msra.mxu0 %v7463_v3  ;;  %6861 = vmatpush3.bf16.msra.mxu1 %v7464_v4  ;;  %v6539_v48 = vld [vmem:[#allocation25] ss:$0 sm:$0xff]  ;;  %v6529_v55 = vld [vmem:[#allocation32] ss:$0 sm:$0xff]  ;;  %v1456_v3 = vshrl.u32 %v1455_v62, 7  ;;  %s9809_s3 = sld [smem:[#allocation74_spill]] }
 0x1b0   : > { %6866 = vmatprep.subr.bf16.mxu0 %v8332_v0  ;;  %6874 = vmatprep.subr.bf16.mxu1 %v8332_v0  ;;  %v6547_v57 = vld [vmem:[%s9806_s17] ss:$0 sm:$0xff]  ;;  %s9387_s28 = scalar_lea.vmem [#allocation38], %s6499_s22  ;;  %s9810_s22 = sld [smem:[#allocation69_spill]] }
 0x1b1   : > { %s6726_s26 = sshll.u32 %s8520_s18, 8  ;;  %p9811_p2 = scmp.ne.s32.totalorder %s9768_s4, 0 }
 0x1b2   : > { %6855 = vmatmul.mubr.msk.bf16.vlgmr.msra.gmra.mxu0 %vm1269_vm1, %v1245_v6  ;;  %6863 = vmatmul.mubr.msk.bf16.vlgmr.msra.gmra.mxu1 %vm1269_vm1, %v1245_v6  ;;  %s9619_s20 = scalar_lea.hbm %s8492_s5, %s6726_s26 }
 0x1b3   : > { %6867 = vmatpush3.bf16.msra.mxu0 %v7465_v7  ;;  %6870 = vmatprep.mubr.msk.bf16.mxu0 %vm8333_vm0, %v8332_v0  ;;  %v8948_v7 = vsub.s32 %v1454_v2, %v1456_v3 }
 0x1b4   : > { %6868 = vmatprep.subr.bf16.mxu0 %v8332_v0  ;;  %6875 = vmatpush3.bf16.msra.mxu1 %v7469_v8 }
 0x1b5   : > { %6878 = vmatprep.mubr.msk.bf16.mxu1 %vm8333_vm0, %v8332_v0  ;;  %6876 = vmatprep.subr.bf16.mxu1 %v8332_v0 }
 0x1b7   : > { %6869 = vmatpush3.bf16.msra.mxu0 %v7466_v9 }
 0x1b8   : > { %6882 = vmatprep.subr.bf16.mxu0 %v8332_v0  ;;  %6877 = vmatpush3.bf16.msra.mxu1 %v7470_v12 }
 0x1b9   : > { %6890 = vmatprep.subr.bf16.mxu1 %v8332_v0 }
 0x1ba   : > { %6871 = vmatmul.mubr.msk.bf16.vlgmr.msra.gmra.mxu0 %vm1269_vm1, %v1245_v6  ;;  %v1486_v6 = vunpack.c.0.s8 %v1485_v1 }
 0x1bb   : > { %6883 = vmatpush3.bf16.msra.mxu0 %v7467_v10  ;;  %6886 = vmatprep.mubr.msk.bf16.mxu0 %vm8333_vm0, %v8332_v0 }
 0x1bc   : > { %6884 = vmatprep.subr.bf16.mxu0 %v8332_v0  ;;  %6879 = vmatmul.mubr.msk.bf16.vlgmr.msra.gmra.mxu1 %vm1269_vm1, %v1905_v15  ;;  %v8952_v13 = vsub.s32 %v1486_v6, %v1456_v3 }
 0x1bd   : > { %6891 = vmatpush3.bf16.msra.mxu1 %v7471_v14  ;;  %6894 = vmatprep.mubr.msk.bf16.mxu1 %vm8333_vm0, %v8332_v0 }
 0x1be   : > { %6892 = vmatprep.subr.bf16.mxu1 %v8332_v0 }
 0x1bf   : > { %6885 = vmatpush3.bf16.msra.mxu0 %v7468_v16 }
 0x1c1   : > { %6893 = vmatpush3.bf16.msra.mxu1 %v7472_v17 }
 0x1c2   : > { %6887 = vmatmul.mubr.msk.bf16.vlgmr.msra.gmra.mxu0 %vm1269_vm1, %v1905_v15 }
 0x1c4   : > { %6895 = vmatmul.mubr.msk.bf16.vlgmr.msra.gmra.mxu1 %vm1269_vm1, %v1905_v15 }
 0x272   : > { %v1307_v19 = vpop.f32.mrf.mxu0  ;;  %v1371_v20 = vpop.f32.mrf.mxu1 }
 0x273   : > { %v8875_v21 = vadd.f32 %v6525_v18, %v1371_v20  ;;  %v1308_v44 = vadd.f32 %v6521_v39, %v1307_v19 }
 0x274   : > { %v6856_v22 = vpop.f32.mrf.mxu0  ;;  %v6864_v23 = vpop.f32.mrf.mxu1 }
 0x275   : > { %1594 = vrot.lane.b32.xlu0 %v8875_v21, %s8334_s14  ;;  %1591 = vrot.lane.b32.xlu1 %v8875_v21, %s8335_s9  ;;  %v8895_v50 = vmul.f32 0.35355338, %v1308_v44 }
 0x276   : > { %v1310_v24 = vpop.f32.mrf.mxu0  ;;  %v1374_v25 = vpop.f32.mrf.mxu1 }
 0x278   : > { %v6857_v26 = vpop.f32.mrf.mxu0  ;;  %v6865_v27 = vpop.f32.mrf.mxu1 }
 0x279   : > { %1597 = vrot.lane.b32.xlu1 %v8875_v21, %s8336_s10 }
 0x27a   : > { %v1434_v28 = vpop.f32.mrf.mxu0 }
 0x27b   : > { %v8921_v56 = vadd.f32 %v6529_v55, %v1434_v28 }
 0x27c   : > { %v6872_v29 = vpop.f32.mrf.mxu0  ;;  %v1966_v30 = vpop.f32.mrf.mxu1 }
 0x27d   : > { %v1967_v51 = vadd.f32 %v6539_v48, %v1966_v30 }
 0x27e   : > { %v1437_v31 = vpop.f32.mrf.mxu0  ;;  %v6880_v32 = vpop.f32.mrf.mxu1 }
 0x27f   : > { %v8901_v52 = vmul.f32 0.35355338, %v1967_v51 }
 0x280   : > { %v6873_v33 = vpop.f32.mrf.mxu0  ;;  %v1969_v35 = vpop.f32.mrf.mxu1 }
 0x281   : > { %v1970_v53 = vadd.f32 %v6539_v48, %v1969_v35 }
 0x282   : > { %v2032_v36 = vpop.f32.mrf.mxu0  ;;  %v6881_v37 = vpop.f32.mrf.mxu1 }
 0x283   : > { %v8883_v38 = vadd.f32 %v6543_v34, %v2032_v36  ;;  %v8907_v54 = vmul.f32 0.35355338, %v1970_v53 }
 0x284   : > { %v6888_v40 = vpop.f32.mrf.mxu0  ;;  %v2096_v41 = vpop.f32.mrf.mxu1 }
 0x285   : > { %2407 = vrot.lane.b32.xlu1 %v8883_v38, %s8334_s14  ;;  %2401 = vrot.lane.b32.xlu0 %v8883_v38, %s8335_s9  ;;  %v8932_v58 = vadd.f32 %v6547_v57, %v2096_v41 }
 0x286   : > { %v2035_v42 = vpop.f32.mrf.mxu0  ;;  %v6896_v43 = vpop.f32.mrf.mxu1 }
 0x287   : > { %v8889_v45 = vadd.f32 %v6543_v34, %v2035_v42 }
 0x288   : > { %v6889_v46 = vpop.f32.mrf.mxu0  ;;  %v2099_v47 = vpop.f32.mrf.mxu1 }
 0x289   : > { %2415 = vrot.lane.b32.xlu1 %v8889_v45, %s8336_s10  ;;  %2403 = vrot.lane.b32.xlu0 %v8889_v45, %s8335_s9  ;;  %v8938_v59 = vadd.f32 %v6547_v57, %v2099_v47 }
 0x28a   : > { %v6897_v49 = vpop.f32.mrf.mxu1 }
 0x28d   : > { %1441 = vrot.lane.b32.xlu1 %v8895_v50, %s8335_s9  ;;  %2409 = vrot.lane.b32.xlu0 %v8889_v45, %s8334_s14 }
 0x291   : > { %1447 = vrot.lane.b32.xlu1 %v8895_v50, %s8336_s10  ;;  %2413 = vrot.lane.b32.xlu0 %v8883_v38, %s8336_s10 }
 0x295   : > { %2111 = vrot.lane.b32.xlu1 %v8901_v52, %s8334_s14  ;;  %1444 = vrot.lane.b32.xlu0 %v8895_v50, %s8334_s14 }
 0x299   : > { %2107 = vrot.lane.b32.xlu1 %v8907_v54, %s8335_s9  ;;  %2105 = vrot.lane.b32.xlu0 %v8901_v52, %s8335_s9 }
 0x29d   : > { %2119 = vrot.lane.b32.xlu1 %v8907_v54, %s8336_s10  ;;  %2117 = vrot.lane.b32.xlu0 %v8901_v52, %s8336_s10 }
 0x2a1   : > { %1741 = vrot.lane.b32.xlu1 %v8921_v56, %s8335_s9  ;;  %2113 = vrot.lane.b32.xlu0 %v8907_v54, %s8334_s14 }
 0x2a5   : > { %1747 = vrot.lane.b32.xlu1 %v8921_v56, %s8336_s10  ;;  %1744 = vrot.lane.b32.xlu0 %v8921_v56, %s8334_s14 }
 0x2a9   : > { %2697 = vrot.lane.b32.xlu0 %v8932_v58, %s8335_s9  ;;  %2703 = vrot.lane.b32.xlu1 %v8932_v58, %s8334_s14 }
 0x2ad   : > { %2709 = vrot.lane.b32.xlu0 %v8932_v58, %s8336_s10  ;;  %2705 = vrot.lane.b32.xlu1 %v8938_v59, %s8334_s14 }
 0x2b1   : > { %2699 = vrot.lane.b32.xlu0 %v8938_v59, %s8335_s9 }
 0x2b5   : > { %2711 = vrot.lane.b32.xlu0 %v8938_v59, %s8336_s10 }
 0x2e7   : > { %v1595_v4 = vpop.permute.xlu0 %1594  ;;  %v1592_v5 = vpop.permute.xlu1 %1591 }
 0x2e8   : > { %v1600_v8 = vcombine.low %v8875_v21, %v1595_v4  ;;  %v1601_v9 = vcombine.high %v8875_v21, %v1595_v4 }
 0x2ea   : > { %v1608_v14 = vrot.slane %v1600_v8, %v8948_v7  ;;  %v1615_v15 = vrot.slane %v1601_v9, %v8948_v7 }
 0x2eb   : > { %v1598_v10 = vpop.permute.xlu1 %1597 }
 0x2ec   : > { %v1616_v11 = vcombine.low %v1592_v5, %v1598_v10  ;;  %v1617_v12 = vcombine.high %v1592_v5, %v1598_v10 }
 0x2ee   : > { %v1624_v16 = vrot.slane %v1616_v11, %v8948_v7  ;;  %v1631_v17 = vrot.slane %v1617_v12, %v8948_v7 }
 0x2f0   : > { %v1632_v18 = vcombine.low %v1608_v14, %v1624_v16  ;;  %v1633_v19 = vcombine.high %v1608_v14, %v1624_v16  ;;  %v1648_v20 = vcombine.low %v1615_v15, %v1631_v17  ;;  %v1649_v22 = vcombine.high %v1615_v15, %v1631_v17 }
 0x2f2   : > { %v1640_v23 = vrot.slane %v1632_v18, %v8952_v13  ;;  %v1647_v21 = vrot.slane %v1633_v19, %v8952_v13  ;;  %v1656_v24 = vrot.slane %v1648_v20, %v8952_v13  ;;  %v1663_v25 = vrot.slane %v1649_v22, %v8952_v13 }
 0x2f4   : > { %v1668_v26 = vcombine.low %v1640_v23, %v1647_v21  ;;  %v6535_v27 = vcombine.high %v1640_v23, %v1647_v21  ;;  %v1684_v28 = vcombine.low %v1656_v24, %v1663_v25  ;;  %v6536_v29 = vcombine.high %v1656_v24, %v1663_v25 }
 0x2f6   : > { %v1675_v30 = vrot.slane %v1668_v26, %v8948_v7  ;;  %v1683_v31 = vrot.slane %v6535_v27, %v8948_v7  ;;  %v1691_v32 = vrot.slane %v1684_v28, %v8948_v7  ;;  %v1699_v33 = vrot.slane %v6536_v29, %v8948_v7 }
 0x2f7   : > { %v2408_v34 = vpop.permute.xlu1 %2407  ;;  %v2402_v35 = vpop.permute.xlu0 %2401 }
 0x2f8   : > { %v1700_v36 = vcombine.low %v1675_v30, %v1683_v31  ;;  %v1701_v37 = vcombine.high %v1675_v30, %v1683_v31  ;;  %v1716_v39 = vcombine.low %v1691_v32, %v1699_v33  ;;  %v1717_v40 = vcombine.high %v1691_v32, %v1699_v33 }
 0x2f9   : > { %v2419_v55 = vcombine.low %v8883_v38, %v2408_v34  ;;  %v2420_v57 = vcombine.high %v8883_v38, %v2408_v34 }
 0x2fa   : > { %v1708_v41 = vrot.slane %v1700_v36, %v8952_v13  ;;  %v1715_v42 = vrot.slane %v1701_v37, %v8952_v13  ;;  %v1724_v43 = vrot.slane %v1716_v39, %v8952_v13  ;;  %v1731_v44 = vrot.slane %v1717_v40, %v8952_v13 }
 0x2fb   : > { %v2416_v46 = vpop.permute.xlu1 %2415  ;;  %v2404_v47 = vpop.permute.xlu0 %2403  ;;  %v2427_v11 = vrot.slane %v2419_v55, %v8948_v7 }
 0x2fc   : > { %v1732_v48 = vcombine.low %v1708_v41, %v1724_v43  ;;  %v1733_v49 = vcombine.high %v1708_v41, %v1724_v43  ;;  %v1734_v51 = vcombine.low %v1715_v42, %v1731_v44  ;;  %v1735_v53 = vcombine.high %v1715_v42, %v1731_v44 }
 0x2fd   : > { %v2503_v60 = vcombine.low %v2404_v47, %v2416_v46  ;;  %v2504_v61 = vcombine.high %v2404_v47, %v2416_v46 }
 0x2fe   : > { %v1736_v62 = vpack.c.bf16 %v1732_v48, %v1732_v48  ;;  %v1737_v63 = vpack.c.bf16 %v1733_v49, %v1733_v49  ;;  %v1738_v1 = vpack.c.bf16 %v1734_v51, %v1734_v51  ;;  %v1739_v2 = vpack.c.bf16 %v1735_v53, %v1735_v53 }
 0x2ff   : > { %v1442_v3 = vpop.permute.xlu1 %1441  ;;  %v2410_v4 = vpop.permute.xlu0 %2409  ;;  %v2511_v38 = vrot.slane %v2503_v60, %v8948_v7  ;;  %v2518_v8 = vrot.slane %v2504_v61, %v8948_v7 }
 0x300   : > { %v2487_v5 = vcombine.low %v8889_v45, %v2410_v4  ;;  %v2488_v6 = vcombine.high %v8889_v45, %v2410_v4  ;;  %1895 = vst.msk [vmem:[#allocation3] sm:$0xf] %vm1890_vm2, %v1736_v62  ;;  %1896 = vst.msk [vmem:[#allocation3 + $0xc] sm:$0xf] %vm1890_vm2, %v1737_v63  ;;  %v2434_v45 = vrot.slane %v2420_v57, %v8948_v7 }
 0x301   : > { %1897 = vst.msk [vmem:[#allocation3 + $0x18] sm:$0xf] %vm1890_vm2, %v1738_v1  ;;  %1898 = vst.msk [vmem:[#allocation3 + $0x24] sm:$0xf] %vm1890_vm2, %v1739_v2 }
 0x302   : > { %v2495_v9 = vrot.slane %v2487_v5, %v8948_v7  ;;  %v2502_v10 = vrot.slane %v2488_v6, %v8948_v7 }
 0x303   : > { %v1448_v12 = vpop.permute.xlu1 %1447  ;;  %v2414_v14 = vpop.permute.xlu0 %2413 }
 0x304   : > { %v2519_v15 = vcombine.low %v2495_v9, %v2511_v38  ;;  %v2520_v16 = vcombine.high %v2495_v9, %v2511_v38  ;;  %v2535_v17 = vcombine.low %v2502_v10, %v2518_v8  ;;  %v2536_v18 = vcombine.high %v2502_v10, %v2518_v8 }
 0x305   : > { %v1466_v19 = vcombine.low %v1442_v3, %v1448_v12  ;;  %v1467_v20 = vcombine.high %v1442_v3, %v1448_v12  ;;  %v2435_v22 = vcombine.low %v2402_v35, %v2414_v14  ;;  %v2436_v23 = vcombine.high %v2402_v35, %v2414_v14 }
 0x306   : > { %v2527_v21 = vrot.slane %v2519_v15, %v8952_v13  ;;  %v2534_v24 = vrot.slane %v2520_v16, %v8952_v13  ;;  %v2543_v25 = vrot.slane %v2535_v17, %v8952_v13  ;;  %v2550_v26 = vrot.slane %v2536_v18, %v8952_v13 }
 0x307   : > { %v8989_v27 = vrot.slane %v1466_v19, %v8948_v7  ;;  %v8992_v28 = vrot.slane %v1467_v20, %v8948_v7  ;;  %v2443_v29 = vrot.slane %v2435_v22, %v8948_v7  ;;  %v2450_v30 = vrot.slane %v2436_v23, %v8948_v7  ;;  %v2112_v44 = vpop.permute.xlu1 %2111  ;;  %v1445_v46 = vpop.permute.xlu0 %1444 }
 0x308   : > { %v2623_v31 = vcombine.low %v2527_v21, %v2534_v24  ;;  %v6557_v32 = vcombine.high %v2527_v21, %v2534_v24  ;;  %v2639_v33 = vcombine.low %v2543_v25, %v2550_v26  ;;  %v6558_v34 = vcombine.high %v2543_v25, %v2550_v26 }
 0x309   : > { %v2451_v35 = vcombine.low %v2427_v11, %v2443_v29  ;;  %v2452_v36 = vcombine.high %v2427_v11, %v2443_v29  ;;  %v2467_v37 = vcombine.low %v2434_v45, %v2450_v30  ;;  %v2468_v39 = vcombine.high %v2434_v45, %v2450_v30 }
 0x30a   : > { %v2630_v40 = vrot.slane %v2623_v31, %v8948_v7  ;;  %v2638_v41 = vrot.slane %v6557_v32, %v8948_v7  ;;  %v2646_v42 = vrot.slane %v2639_v33, %v8948_v7  ;;  %v2654_v43 = vrot.slane %v6558_v34, %v8948_v7 }
 0x30b   : > { %v2459_v47 = vrot.slane %v2451_v35, %v8952_v13  ;;  %v2466_v48 = vrot.slane %v2452_v36, %v8952_v13  ;;  %v2475_v49 = vrot.slane %v2467_v37, %v8952_v13  ;;  %v2482_v51 = vrot.slane %v2468_v39, %v8952_v13  ;;  %v2108_v14 = vpop.permute.xlu1 %2107  ;;  %v2106_v15 = vpop.permute.xlu0 %2105 }
 0x30c   : > { %v2655_v53 = vcombine.low %v2630_v40, %v2638_v41  ;;  %v2656_v55 = vcombine.high %v2630_v40, %v2638_v41  ;;  %v2671_v57 = vcombine.low %v2646_v42, %v2654_v43  ;;  %v2672_v60 = vcombine.high %v2646_v42, %v2654_v43 }
 0x30d   : > { %v2555_v61 = vcombine.low %v2459_v47, %v2466_v48  ;;  %v6555_v62 = vcombine.high %v2459_v47, %v2466_v48  ;;  %v2571_v63 = vcombine.low %v2475_v49, %v2482_v51  ;;  %v6556_v1 = vcombine.high %v2475_v49, %v2482_v51 }
 0x30e   : > { %v2663_v2 = vrot.slane %v2655_v53, %v8952_v13  ;;  %v2670_v3 = vrot.slane %v2656_v55, %v8952_v13  ;;  %v2679_v4 = vrot.slane %v2671_v57, %v8952_v13  ;;  %v2686_v5 = vrot.slane %v2672_v60, %v8952_v13 }
 0x30f   : > { %v2562_v6 = vrot.slane %v2555_v61, %v8948_v7  ;;  %v2570_v38 = vrot.slane %v6555_v62, %v8948_v7  ;;  %v2578_v8 = vrot.slane %v2571_v63, %v8948_v7  ;;  %v2586_v9 = vrot.slane %v6556_v1, %v8948_v7  ;;  %v2120_v43 = vpop.permute.xlu1 %2119  ;;  %v2118_v47 = vpop.permute.xlu0 %2117 }
 0x310   : > { %v2687_v10 = vcombine.low %v2663_v2, %v2679_v4  ;;  %v2688_v11 = vcombine.high %v2663_v2, %v2679_v4  ;;  %v2689_v45 = vcombine.low %v2670_v3, %v2686_v5  ;;  %v2690_v12 = vcombine.high %v2670_v3, %v2686_v5 }
 0x311   : > { %v2587_v16 = vcombine.low %v2562_v6, %v2570_v38  ;;  %v2588_v17 = vcombine.high %v2562_v6, %v2570_v38  ;;  %v2603_v18 = vcombine.low %v2578_v8, %v2586_v9  ;;  %v2604_v19 = vcombine.high %v2578_v8, %v2586_v9 }
 0x312   : > { %v6711_v20 = vpack.c.bf16 %v2687_v10, %v2687_v10  ;;  %v6713_v22 = vpack.c.bf16 %v2688_v11, %v2688_v11  ;;  %v6715_v23 = vpack.c.bf16 %v2689_v45, %v2689_v45  ;;  %v6717_v21 = vpack.c.bf16 %v2690_v12, %v2690_v12 }
 0x313   : > { %v2595_v24 = vrot.slane %v2587_v16, %v8952_v13  ;;  %v2602_v25 = vrot.slane %v2588_v17, %v8952_v13  ;;  %v2611_v26 = vrot.slane %v2603_v18, %v8952_v13  ;;  %v2618_v29 = vrot.slane %v2604_v19, %v8952_v13 }
 0x314   : > { %3056 = vst.msk [vmem:[#allocation3 + $0x8] sm:$0xf] %vm1890_vm2, %v6711_v20  ;;  %3058 = vst.msk [vmem:[#allocation3 + $0x14] sm:$0xf] %vm1890_vm2, %v6713_v22  ;;  %v2123_v30 = vcombine.low %v8901_v52, %v2112_v44  ;;  %v2124_v31 = vcombine.high %v8901_v52, %v2112_v44  ;;  %v1450_v32 = vcombine.low %v8895_v50, %v1445_v46 }
 0x315   : > { %3060 = vst.msk [vmem:[#allocation3 + $0x20] sm:$0xf] %vm1890_vm2, %v6715_v23  ;;  %3062 = vst.msk [vmem:[#allocation3 + $0x2c] sm:$0xf] %vm1890_vm2, %v6717_v21  ;;  %v1451_v33 = vcombine.high %v8895_v50, %v1445_v46  ;;  %v2619_v34 = vcombine.low %v2595_v24, %v2611_v26  ;;  %v2620_v35 = vcombine.high %v2595_v24, %v2611_v26  ;;  %v1742_v21 = vpop.permute.xlu1 %1741 }
 0x316   : > { %v2621_v36 = vcombine.low %v2602_v25, %v2618_v29  ;;  %v2622_v37 = vcombine.high %v2602_v25, %v2618_v29  ;;  %v2131_v39 = vrot.slane %v2123_v30, %v8948_v7  ;;  %v2138_v40 = vrot.slane %v2124_v31, %v8948_v7  ;;  %v2114_v30 = vpop.permute.xlu0 %2113 }
 0x317   : > { %v1458_v41 = vrot.slane %v1450_v32, %v8948_v7  ;;  %v1465_v42 = vrot.slane %v1451_v33, %v8948_v7  ;;  %v6710_v48 = vpack.c.bf16 %v2619_v34, %v2619_v34  ;;  %v6712_v52 = vpack.c.bf16 %v2620_v35, %v2620_v35 }
 0x318   : > { %v6714_v44 = vpack.c.bf16 %v2621_v36, %v2621_v36  ;;  %v6716_v49 = vpack.c.bf16 %v2622_v37, %v2622_v37  ;;  %v2207_v55 = vcombine.low %v2108_v14, %v2120_v43  ;;  %v2208_v57 = vcombine.high %v2108_v14, %v2120_v43 }
 0x319   : > { %v1482_v50 = vcombine.low %v1458_v41, %v8989_v27  ;;  %v1483_v46 = vcombine.high %v1458_v41, %v8989_v27  ;;  %v1498_v51 = vcombine.low %v1465_v42, %v8992_v28  ;;  %v1499_v53 = vcombine.high %v1465_v42, %v8992_v28  ;;  %3055 = vst.msk [vmem:[#allocation3 + $0x4] sm:$0xf] %vm1890_vm2, %v6710_v48 }
 0x31a   : > { %3057 = vst.msk [vmem:[#allocation3 + $0x10] sm:$0xf] %vm1890_vm2, %v6712_v52  ;;  %3059 = vst.msk [vmem:[#allocation3 + $0x1c] sm:$0xf] %vm1890_vm2, %v6714_v44  ;;  %v2139_v60 = vcombine.low %v2106_v15, %v2118_v47  ;;  %v2140_v61 = vcombine.high %v2106_v15, %v2118_v47  ;;  %v9041_v1 = vrot.slane %v2207_v55, %v8948_v7 }
 0x31b   : > { %3061 = vst.msk [vmem:[#allocation3 + $0x28] sm:$0xf] %vm1890_vm2, %v6716_v49  ;;  %v1490_v62 = vrot.slane %v1482_v50, %v8952_v13  ;;  %v1497_v27 = vrot.slane %v1483_v46, %v8952_v13  ;;  %v1506_v63 = vrot.slane %v1498_v51, %v8952_v13  ;;  %v1513_v28 = vrot.slane %v1499_v53, %v8952_v13  ;;  %v9048_v5 = vld [vmem:[#allocation3 + $0x8] ss:$0 sps:$4 sm:$0xff]   ;;  %v9050_v10 = vld [vmem:[#allocation3 + $0x14] ss:$0 sps:$4 sm:$0xff]   ;;  %v1748_v53 = vpop.permute.xlu1 %1747 }
 0x31c   : > { %v9044_v2 = vrot.slane %v2208_v57, %v8948_v7  ;;  %v2147_v3 = vrot.slane %v2139_v60, %v8948_v7  ;;  %v2154_v4 = vrot.slane %v2140_v61, %v8948_v7  ;;  %7170 = vmatprep.subr.msk.bf16.mxu0 %vm3151_vm3, %v9048_v5  ;;  %7172 = vmatprep.subr.msk.bf16.mxu1 %vm3151_vm3, %v9050_v10 }
 0x31d   : > { %v1518_v6 = vcombine.low %v1490_v62, %v1497_v27  ;;  %v6533_v38 = vcombine.high %v1490_v62, %v1497_v27  ;;  %v1534_v8 = vcombine.low %v1506_v63, %v1513_v28  ;;  %v6534_v9 = vcombine.high %v1506_v63, %v1513_v28  ;;  %v1745_v62 = vpop.permute.xlu0 %1744 }
 0x31e   : > { %v2155_v11 = vcombine.low %v2131_v39, %v2147_v3  ;;  %v2156_v45 = vcombine.high %v2131_v39, %v2147_v3  ;;  %v2171_v12 = vcombine.low %v2138_v40, %v2154_v4  ;;  %v2172_v14 = vcombine.high %v2138_v40, %v2154_v4 }
 0x31f   : > { %v1525_v15 = vrot.slane %v1518_v6, %v8948_v7  ;;  %v1533_v16 = vrot.slane %v6533_v38, %v8948_v7  ;;  %v1541_v17 = vrot.slane %v1534_v8, %v8948_v7  ;;  %v1549_v18 = vrot.slane %v6534_v9, %v8948_v7 }
 0x320   : > { %v2163_v19 = vrot.slane %v2155_v11, %v8952_v13  ;;  %v2170_v20 = vrot.slane %v2156_v45, %v8952_v13  ;;  %v2179_v22 = vrot.slane %v2171_v12, %v8952_v13  ;;  %v2186_v23 = vrot.slane %v2172_v14, %v8952_v13 }
 0x321   : > { %v1550_v24 = vcombine.low %v1525_v15, %v1533_v16  ;;  %v1551_v25 = vcombine.high %v1525_v15, %v1533_v16  ;;  %v1566_v26 = vcombine.low %v1541_v17, %v1549_v18  ;;  %v1567_v29 = vcombine.high %v1541_v17, %v1549_v18  ;;  %v2704_v18 = vpop.permute.xlu1 %2703 }
 0x322   : > { %v2259_v31 = vcombine.low %v2163_v19, %v2170_v20  ;;  %v6551_v32 = vcombine.high %v2163_v19, %v2170_v20  ;;  %v2275_v33 = vcombine.low %v2179_v22, %v2186_v23  ;;  %v6552_v34 = vcombine.high %v2179_v22, %v2186_v23 }
 0x323   : > { %v1558_v35 = vrot.slane %v1550_v24, %v8952_v13  ;;  %v1565_v36 = vrot.slane %v1551_v25, %v8952_v13  ;;  %v1574_v37 = vrot.slane %v1566_v26, %v8952_v13  ;;  %v1581_v39 = vrot.slane %v1567_v29, %v8952_v13  ;;  %v9090_v26 = vpop.permute.xlu0 %2697 }
 0x324   : > { %v2266_v40 = vrot.slane %v2259_v31, %v8948_v7  ;;  %v2274_v41 = vrot.slane %v6551_v32, %v8948_v7  ;;  %v2282_v42 = vrot.slane %v2275_v33, %v8948_v7  ;;  %v2290_v43 = vrot.slane %v6552_v34, %v8948_v7 }
 0x325   : > { %v1582_v47 = vcombine.low %v1558_v35, %v1574_v37  ;;  %v1583_v48 = vcombine.high %v1558_v35, %v1574_v37  ;;  %v1584_v52 = vcombine.low %v1565_v36, %v1581_v39  ;;  %v1585_v44 = vcombine.high %v1565_v36, %v1581_v39 }
 0x326   : > { %v2291_v49 = vcombine.low %v2266_v40, %v2274_v41  ;;  %v2292_v50 = vcombine.high %v2266_v40, %v2274_v41  ;;  %v2307_v46 = vcombine.low %v2282_v42, %v2290_v43  ;;  %v2308_v51 = vcombine.high %v2282_v42, %v2290_v43 }
 0x327   : > { %v1586_v55 = vpack.c.bf16 %v1582_v47, %v1582_v47  ;;  %v1587_v57 = vpack.c.bf16 %v1583_v48, %v1583_v48  ;;  %v1588_v60 = vpack.c.bf16 %v1584_v52, %v1584_v52  ;;  %v1589_v61 = vpack.c.bf16 %v1585_v44, %v1585_v44 }
 0x328   : > { %v2299_v27 = vrot.slane %v2291_v49, %v8952_v13  ;;  %v2306_v63 = vrot.slane %v2292_v50, %v8952_v13  ;;  %v2315_v28 = vrot.slane %v2307_v46, %v8952_v13  ;;  %v2322_v3 = vrot.slane %v2308_v51, %v8952_v13  ;;  %v2710_v46 = vpop.permute.xlu0 %2709 }
 0x329   : > { %1891 = vst.msk [vmem:[#allocation2] sm:$0xf] %vm1890_vm2, %v1586_v55  ;;  %1892 = vst.msk [vmem:[#allocation2 + $0xc] sm:$0xf] %vm1890_vm2, %v1587_v57  ;;  %v2191_v4 = vcombine.low %v8907_v54, %v2114_v30  ;;  %v2192_v6 = vcombine.high %v8907_v54, %v2114_v30  ;;  %v1766_v38 = vcombine.low %v1742_v21, %v1748_v53 }
 0x32a   : > { %1893 = vst.msk [vmem:[#allocation2 + $0x18] sm:$0xf] %vm1890_vm2, %v1588_v60  ;;  %1894 = vst.msk [vmem:[#allocation2 + $0x24] sm:$0xf] %vm1890_vm2, %v1589_v61  ;;  %v1767_v8 = vcombine.high %v1742_v21, %v1748_v53  ;;  %v2323_v9 = vcombine.low %v2299_v27, %v2315_v28  ;;  %v2324_v11 = vcombine.high %v2299_v27, %v2315_v28 }
 0x32b   : > { %v2325_v45 = vcombine.low %v2306_v63, %v2322_v3  ;;  %v2326_v12 = vcombine.high %v2306_v63, %v2322_v3  ;;  %v2199_v14 = vrot.slane %v2191_v4, %v8948_v7  ;;  %v2206_v15 = vrot.slane %v2192_v6, %v8948_v7 }
 0x32c   : > { %v1774_v16 = vrot.slane %v1766_v38, %v8948_v7  ;;  %v1781_v17 = vrot.slane %v1767_v8, %v8948_v7  ;;  %v6702_v19 = vpack.c.bf16 %v2323_v9, %v2323_v9  ;;  %v6704_v20 = vpack.c.bf16 %v2324_v11, %v2324_v11 }
 0x32d   : > { %v6706_v22 = vpack.c.bf16 %v2325_v45, %v2325_v45  ;;  %v6708_v23 = vpack.c.bf16 %v2326_v12, %v2326_v12  ;;  %v2223_v54 = vcombine.low %v2199_v14, %v9041_v1  ;;  %v2224_v21 = vcombine.high %v2199_v14, %v9041_v1 }
 0x32e   : > { %v2239_v24 = vcombine.low %v2206_v15, %v9044_v2  ;;  %v2240_v25 = vcombine.high %v2206_v15, %v9044_v2  ;;  %3019 = vst.msk [vmem:[#allocation2 + $0x4] sm:$0xf] %vm1890_vm2, %v6702_v19  ;;  %3021 = vst.msk [vmem:[#allocation2 + $0x10] sm:$0xf] %vm1890_vm2, %v6704_v20  ;;  %v1750_v29 = vcombine.low %v8921_v56, %v1745_v62 }
 0x32f   : > { %3023 = vst.msk [vmem:[#allocation2 + $0x1c] sm:$0xf] %vm1890_vm2, %v6706_v22  ;;  %3025 = vst.msk [vmem:[#allocation2 + $0x28] sm:$0xf] %vm1890_vm2, %v6708_v23  ;;  %v1751_v30 = vcombine.high %v8921_v56, %v1745_v62  ;;  %v2715_v1 = vcombine.low %v8932_v58, %v2704_v18  ;;  %v2716_v31 = vcombine.high %v8932_v58, %v2704_v18  ;;  %v9130_v22 = vpop.permute.xlu0 %2699 }
 0x330   : > { %v2231_v2 = vrot.slane %v2223_v54, %v8952_v13  ;;  %v2238_v32 = vrot.slane %v2224_v21, %v8952_v13  ;;  %v2247_v33 = vrot.slane %v2239_v24, %v8952_v13  ;;  %v2254_v34 = vrot.slane %v2240_v25, %v8952_v13 }
 0x331   : > { %v1758_v35 = vrot.slane %v1750_v29, %v8948_v7  ;;  %v1765_v36 = vrot.slane %v1751_v30, %v8948_v7  ;;  %v9107_v37 = vrot.slane %v2715_v1, %v8948_v7  ;;  %v9110_v56 = vrot.slane %v2716_v31, %v8948_v7  ;;  %v7475_v31 = vld [vmem:[#allocation3] sm:$0xff]  }
 0x332   : > { %v2327_v39 = vcombine.low %v2231_v2, %v2238_v32  ;;  %v6553_v58 = vcombine.high %v2231_v2, %v2238_v32  ;;  %v2343_v40 = vcombine.low %v2247_v33, %v2254_v34  ;;  %v6554_v41 = vcombine.high %v2247_v33, %v2254_v34 }
 0x333   : > { %v1782_v42 = vcombine.low %v1758_v35, %v1774_v16  ;;  %v1783_v43 = vcombine.high %v1758_v35, %v1774_v16  ;;  %v1798_v47 = vcombine.low %v1765_v36, %v1781_v17  ;;  %v1799_v48 = vcombine.high %v1765_v36, %v1781_v17  ;;  %v7476_v35 = vld [vmem:[#allocation3 + $0xc] sm:$0xff]   ;;  %v2706_v36 = vpop.permute.xlu1 %2705 }
 0x334   : > { %v2334_v52 = vrot.slane %v2327_v39, %v8948_v7  ;;  %v2342_v44 = vrot.slane %v6553_v58, %v8948_v7  ;;  %v2350_v49 = vrot.slane %v2343_v40, %v8948_v7  ;;  %v2358_v50 = vrot.slane %v6554_v41, %v8948_v7 }
 0x335   : > { %v1790_v51 = vrot.slane %v1782_v42, %v8952_v13  ;;  %v1797_v53 = vrot.slane %v1783_v43, %v8952_v13  ;;  %v1806_v55 = vrot.slane %v1798_v47, %v8952_v13  ;;  %v1813_v57 = vrot.slane %v1799_v48, %v8952_v13  ;;  %v7479_v63 = vld [vmem:[#allocation2] sm:$0xff]   ;;  %v7480_v38 = vld [vmem:[#allocation2 + $0xc] sm:$0xff]  }
 0x336   : > { %v2359_v60 = vcombine.low %v2334_v52, %v2342_v44  ;;  %v2360_v61 = vcombine.high %v2334_v52, %v2342_v44  ;;  %v2375_v62 = vcombine.low %v2350_v49, %v2358_v50  ;;  %v2376_v27 = vcombine.high %v2350_v49, %v2358_v50  ;;  %6902 = vmatprep.mubr.msk.bf16.mxu0 %vm3151_vm3, %v7479_v63  ;;  %v2712_v49 = vpop.permute.xlu0 %2711 }
 0x337   : > { %v1818_v28 = vcombine.low %v1790_v51, %v1797_v53  ;;  %v6537_v3 = vcombine.high %v1790_v51, %v1797_v53  ;;  %v1834_v4 = vcombine.low %v1806_v55, %v1813_v57  ;;  %v6538_v6 = vcombine.high %v1806_v55, %v1813_v57  ;;  %6910 = vmatprep.mubr.msk.bf16.mxu1 %vm3151_vm3, %v7480_v38 }
 0x338   : > { %v2367_v8 = vrot.slane %v2359_v60, %v8952_v13  ;;  %v2374_v9 = vrot.slane %v2360_v61, %v8952_v13  ;;  %v2383_v11 = vrot.slane %v2375_v62, %v8952_v13  ;;  %v2390_v45 = vrot.slane %v2376_v27, %v8952_v13  ;;  %v7477_v27 = vld [vmem:[#allocation3 + $0x20] ss:$0 sps:$4 sm:$0xff]  }
 0x339   : > { %v1825_v12 = vrot.slane %v1818_v28, %v8948_v7  ;;  %v1833_v14 = vrot.slane %v6537_v3, %v8948_v7  ;;  %v1841_v15 = vrot.slane %v1834_v4, %v8948_v7  ;;  %v1849_v16 = vrot.slane %v6538_v6, %v8948_v7 }
 0x33a   : > { %v2391_v17 = vcombine.low %v2367_v8, %v2383_v11  ;;  %v2392_v18 = vcombine.high %v2367_v8, %v2383_v11  ;;  %v2393_v19 = vcombine.low %v2374_v9, %v2390_v45  ;;  %v2394_v20 = vcombine.high %v2374_v9, %v2390_v45 }
 0x33b   : > { %v1850_v23 = vcombine.low %v1825_v12, %v1833_v14  ;;  %v1851_v54 = vcombine.high %v1825_v12, %v1833_v14  ;;  %v1866_v21 = vcombine.low %v1841_v15, %v1849_v16  ;;  %v1867_v24 = vcombine.high %v1841_v15, %v1849_v16 }
 0x33c   : > { %v6703_v25 = vpack.c.bf16 %v2391_v17, %v2391_v17  ;;  %v6705_v29 = vpack.c.bf16 %v2392_v18, %v2392_v18  ;;  %v6707_v30 = vpack.c.bf16 %v2393_v19, %v2393_v19  ;;  %v6709_v1 = vpack.c.bf16 %v2394_v20, %v2394_v20 }
 0x33d   : > { %v1858_v2 = vrot.slane %v1850_v23, %v8952_v13  ;;  %v1865_v32 = vrot.slane %v1851_v54, %v8952_v13  ;;  %v1874_v33 = vrot.slane %v1866_v21, %v8952_v13  ;;  %v1881_v34 = vrot.slane %v1867_v24, %v8952_v13 }
 0x33e   : > { %3020 = vst.msk [vmem:[#allocation2 + $0x8] sm:$0xf] %vm1890_vm2, %v6703_v25  ;;  %3022 = vst.msk [vmem:[#allocation2 + $0x14] sm:$0xf] %vm1890_vm2, %v6705_v29  ;;  %v3162_v39 = vsel %vm3151_vm3, %v9048_v5, 0  ;;  %v3238_v58 = vsel %vm3151_vm3, %v9050_v10, 0  ;;  %v2731_v40 = vcombine.low %v9090_v26, %v2710_v46  ;;  %v2732_v41 = vcombine.high %v9090_v26, %v2710_v46 }
 0x33f   : > { %3024 = vst.msk [vmem:[#allocation2 + $0x20] sm:$0xf] %vm1890_vm2, %v6707_v30  ;;  %3026 = vst.msk [vmem:[#allocation2 + $0x2c] sm:$0xf] %vm1890_vm2, %v6709_v1  ;;  %v1882_v42 = vcombine.low %v1858_v2, %v1874_v33  ;;  %v1883_v43 = vcombine.high %v1858_v2, %v1874_v33  ;;  %v1884_v47 = vcombine.low %v1865_v32, %v1881_v34  ;;  %6899 = vmatpush3.bf16.xpose.msra.mxu0 %v3162_v39 }
 0x340   : > { %v1885_v48 = vcombine.high %v1865_v32, %v1881_v34  ;;  %6907 = vmatpush3.bf16.xpose.msra.mxu1 %v3238_v58  ;;  %v2739_v52 = vrot.slane %v2731_v40, %v8948_v7  ;;  %v2746_v44 = vrot.slane %v2732_v41, %v8948_v7  ;;  %7171 = vmatprep.subr.msk.bf16.mxu0 %vm3151_vm3, %v7475_v31  ;;  %v3159_v62 = vsel %vm3151_vm3, %v7475_v31, 0 }
 0x341   : > { %v2783_v5 = vcombine.low %v8938_v59, %v2706_v36  ;;  %v1886_v10 = vpack.c.bf16 %v1882_v42, %v1882_v42  ;;  %v1887_v50 = vpack.c.bf16 %v1883_v43, %v1883_v43  ;;  %v1888_v51 = vpack.c.bf16 %v1884_v47, %v1884_v47  ;;  %7173 = vmatprep.subr.msk.bf16.mxu1 %vm3151_vm3, %v7476_v35 }
 0x342   : > { %v1889_v53 = vpack.c.bf16 %v1885_v48, %v1885_v48  ;;  %v2747_v26 = vcombine.low %v9107_v37, %v2739_v52  ;;  %v2748_v46 = vcombine.high %v9107_v37, %v2739_v52  ;;  %v2763_v55 = vcombine.low %v9110_v56, %v2746_v44 }
 0x343   : > { %v2764_v57 = vcombine.high %v9110_v56, %v2746_v44  ;;  %1899 = vst.msk [vmem:[#allocation4] sm:$0xf] %vm1890_vm2, %v1886_v10  ;;  %1900 = vst.msk [vmem:[#allocation4 + $0xc] sm:$0xf] %vm1890_vm2, %v1887_v50  ;;  %v2784_v60 = vcombine.high %v8938_v59, %v2706_v36  ;;  %v2791_v61 = vrot.slane %v2783_v5, %v8948_v7  ;;  %v3235_v6 = vsel %vm3151_vm3, %v7476_v35, 0 }
 0x344   : > { %1901 = vst.msk [vmem:[#allocation4 + $0x18] sm:$0xf] %vm1890_vm2, %v1888_v51  ;;  %1902 = vst.msk [vmem:[#allocation4 + $0x24] sm:$0xf] %vm1890_vm2, %v1889_v53  ;;  %v2799_v37 = vcombine.low %v9130_v22, %v2712_v49  ;;  %v2755_v63 = vrot.slane %v2747_v26, %v8952_v13  ;;  %v2762_v56 = vrot.slane %v2748_v46, %v8952_v13  ;;  %v3314_v16 = vsel %vm3151_vm3, %v7477_v27, 0  ;;  %v7483_v53 = vld [vmem:[#allocation3 + $0x18] sm:$0xff]  }
 0x345   : > { %v2771_v28 = vrot.slane %v2763_v55, %v8952_v13  ;;  %v2778_v3 = vrot.slane %v2764_v57, %v8952_v13  ;;  %v2798_v4 = vrot.slane %v2784_v60, %v8948_v7  ;;  %v2800_v59 = vcombine.high %v9130_v22, %v2712_v49  ;;  %v7478_v22 = vld [vmem:[#allocation3 + $0x2c] ss:$0 sps:$4 sm:$0xff]   ;;  %v7481_v25 = vld [vmem:[#allocation2 + $0x8] ss:$0 sps:$4 sm:$0xff]   ;;  %v7482_v29 = vld [vmem:[#allocation2 + $0x14] ss:$0 sps:$4 sm:$0xff]  }
 0x346   : > { %v2807_v38 = vrot.slane %v2799_v37, %v8948_v7  ;;  %v2851_v8 = vcombine.low %v2755_v63, %v2762_v56  ;;  %v6559_v9 = vcombine.high %v2755_v63, %v2762_v56  ;;  %v7484_v60 = vld [vmem:[#allocation2 + $0x18] sm:$0xff]   ;;  %v3390_v56 = vsel %vm3151_vm3, %v7478_v22, 0 }
 0x347   : > { %v2867_v11 = vcombine.low %v2771_v28, %v2778_v3  ;;  %v6560_v45 = vcombine.high %v2771_v28, %v2778_v3  ;;  %6901 = vmatpush3.bf16.xpose.msra.mxu0 %v3159_v62  ;;  %v2814_v12 = vrot.slane %v2800_v59, %v8948_v7  ;;  %v7485_v28 = vld [vmem:[#allocation3 + $0x24] sm:$0xff]  }
 0x348   : > { %v2815_v14 = vcombine.low %v2791_v61, %v2807_v38  ;;  %v2816_v15 = vcombine.high %v2791_v61, %v2807_v38  ;;  %v2858_v17 = vrot.slane %v2851_v8, %v8948_v7  ;;  %v2866_v18 = vrot.slane %v6559_v9, %v8948_v7  ;;  %6909 = vmatpush3.bf16.xpose.msra.mxu1 %v3235_v6  ;;  %v7486_v61 = vld [vmem:[#allocation2 + $0x24] sm:$0xff]  }
 0x349   : > { %v2874_v19 = vrot.slane %v2867_v11, %v8948_v7  ;;  %v2882_v20 = vrot.slane %v6560_v45, %v8948_v7  ;;  %v2831_v21 = vcombine.low %v2798_v4, %v2814_v12  ;;  %v2832_v24 = vcombine.high %v2798_v4, %v2814_v12  ;;  %7174 = vmatprep.subr.msk.bf16.mxu0 %vm3151_vm3, %v7477_v27 }
 0x34a   : > { %v2823_v23 = vrot.slane %v2815_v14, %v8952_v13  ;;  %v2830_v54 = vrot.slane %v2816_v15, %v8952_v13  ;;  %v2883_v30 = vcombine.low %v2858_v17, %v2866_v18  ;;  %v2884_v1 = vcombine.high %v2858_v17, %v2866_v18  ;;  %7176 = vmatprep.subr.msk.bf16.mxu1 %vm3151_vm3, %v7478_v22  ;;  %v7488_v17 = vld [vmem:[#allocation2 + $0x2c] ss:$0 sps:$4 sm:$0xff]  }
 0x34b   : > { %v2899_v31 = vcombine.low %v2874_v19, %v2882_v20  ;;  %v2900_v2 = vcombine.high %v2874_v19, %v2882_v20  ;;  %v2839_v32 = vrot.slane %v2831_v21, %v8952_v13  ;;  %v2846_v33 = vrot.slane %v2832_v24, %v8952_v13 }
 0x34c   : > { %v2919_v34 = vcombine.low %v2823_v23, %v2830_v54  ;;  %v6561_v35 = vcombine.high %v2823_v23, %v2830_v54  ;;  %v2891_v36 = vrot.slane %v2883_v30, %v8952_v13  ;;  %v2898_v39 = vrot.slane %v2884_v1, %v8952_v13 }
 0x34d   : > { %v2907_v58 = vrot.slane %v2899_v31, %v8952_v13  ;;  %v2914_v40 = vrot.slane %v2900_v2, %v8952_v13  ;;  %v2935_v43 = vcombine.low %v2839_v32, %v2846_v33  ;;  %v6562_v47 = vcombine.high %v2839_v32, %v2846_v33 }
 0x34e   : > { %v2926_v41 = vrot.slane %v2919_v34, %v8948_v7  ;;  %v2934_v42 = vrot.slane %v6561_v35, %v8948_v7  ;;  %6903 = vmatmul.mubr.msk.bf16.vlgmr.msra.gmra.mxu0 %vm3151_vm3, %v7481_v25  ;;  %v3311_v9 = vsel %vm3151_vm3, %v7483_v53, 0  ;;  %v3387_v15 = vsel %vm3151_vm3, %v7485_v28, 0 }
 0x34f   : > { %v2915_v48 = vcombine.low %v2891_v36, %v2907_v58  ;;  %v2916_v52 = vcombine.high %v2891_v36, %v2907_v58  ;;  %v2917_v44 = vcombine.low %v2898_v39, %v2914_v40  ;;  %v2918_v5 = vcombine.high %v2898_v39, %v2914_v40  ;;  %6911 = vmatmul.mubr.msk.bf16.vlgmr.msra.gmra.mxu1 %vm3151_vm3, %v7482_v29 }
 0x350   : > { %v2942_v49 = vrot.slane %v2935_v43, %v8948_v7  ;;  %v2950_v10 = vrot.slane %v6562_v47, %v8948_v7  ;;  %v2951_v50 = vcombine.low %v2926_v41, %v2934_v42  ;;  %v2952_v51 = vcombine.high %v2926_v41, %v2934_v42  ;;  %6915 = vmatpush3.bf16.xpose.msra.mxu0 %v3314_v16  ;;  %v7487_v16 = vld [vmem:[#allocation2 + $0x20] ss:$0 sps:$4 sm:$0xff]  }
 0x351   : > { %v6718_v26 = vpack.c.bf16 %v2915_v48, %v2915_v48  ;;  %v6720_v46 = vpack.c.bf16 %v2916_v52, %v2916_v52  ;;  %v6722_v55 = vpack.c.bf16 %v2917_v44, %v2917_v44  ;;  %v6724_v57 = vpack.c.bf16 %v2918_v5, %v2918_v5  ;;  %7175 = vmatprep.subr.msk.bf16.mxu0 %vm3151_vm3, %v7483_v53 }
 0x352   : > { %v2959_v62 = vrot.slane %v2951_v50, %v8952_v13  ;;  %v2966_v37 = vrot.slane %v2952_v51, %v8952_v13  ;;  %v2967_v27 = vcombine.low %v2942_v49, %v2950_v10  ;;  %v2968_v63 = vcombine.high %v2942_v49, %v2950_v10  ;;  %6918 = vmatprep.mubr.msk.bf16.mxu0 %vm3151_vm3, %v7484_v60 }
 0x353   : > { %3091 = vst.msk [vmem:[#allocation4 + $0x4] sm:$0xf] %vm1890_vm2, %v6718_v26  ;;  %3093 = vst.msk [vmem:[#allocation4 + $0x10] sm:$0xf] %vm1890_vm2, %v6720_v46  ;;  %6926 = vmatprep.mubr.msk.bf16.mxu1 %vm3151_vm3, %v7486_v61  ;;  %6923 = vmatpush3.bf16.xpose.msra.mxu1 %v3390_v56 }
 0x354   : > { %3095 = vst.msk [vmem:[#allocation4 + $0x1c] sm:$0xf] %vm1890_vm2, %v6722_v55  ;;  %3097 = vst.msk [vmem:[#allocation4 + $0x28] sm:$0xf] %vm1890_vm2, %v6724_v57  ;;  %v2975_v3 = vrot.slane %v2967_v27, %v8952_v13  ;;  %v2982_v4 = vrot.slane %v2968_v63, %v8952_v13  ;;  %7177 = vmatprep.subr.msk.bf16.mxu1 %vm3151_vm3, %v7485_v28 }
 0x356   : > { %v2983_v6 = vcombine.low %v2959_v62, %v2975_v3  ;;  %v2984_v59 = vcombine.high %v2959_v62, %v2975_v3  ;;  %v2985_v38 = vcombine.low %v2966_v37, %v2982_v4  ;;  %v2986_v8 = vcombine.high %v2966_v37, %v2982_v4 }
 0x358   : > { %v6719_v11 = vpack.c.bf16 %v2983_v6, %v2983_v6  ;;  %v6721_v45 = vpack.c.bf16 %v2984_v59, %v2984_v59  ;;  %v6723_v12 = vpack.c.bf16 %v2985_v38, %v2985_v38  ;;  %v6725_v14 = vpack.c.bf16 %v2986_v8, %v2986_v8  ;;  %6917 = vmatpush3.bf16.xpose.msra.mxu0 %v3311_v9 }
 0x35a   : > { %3092 = vst.msk [vmem:[#allocation4 + $0x8] sm:$0xf] %vm1890_vm2, %v6719_v11  ;;  %3094 = vst.msk [vmem:[#allocation4 + $0x14] sm:$0xf] %vm1890_vm2, %v6721_v45  ;;  %v7491_v22 = vld [vmem:[#allocation4] sm:$0xff]   ;;  %v7492_v54 = vld [vmem:[#allocation4 + $0xc] sm:$0xff]  }
 0x35b   : > { %3096 = vst.msk [vmem:[#allocation4 + $0x20] sm:$0xf] %vm1890_vm2, %v6723_v12  ;;  %3098 = vst.msk [vmem:[#allocation4 + $0x2c] sm:$0xf] %vm1890_vm2, %v6725_v14  ;;  %6925 = vmatpush3.bf16.xpose.msra.mxu1 %v3387_v15 }
 0x35f   : > { %6919 = vmatmul.mubr.msk.bf16.vlgmr.msra.gmra.mxu0 %vm3151_vm3, %v7487_v16 }
 0x361   : > { %v7489_v18 = vld [vmem:[#allocation4 + $0x8] ss:$0 sps:$4 sm:$0xff]   ;;  %v7490_v19 = vld [vmem:[#allocation4 + $0x14] ss:$0 sps:$4 sm:$0xff]  }
 0x362   : > { %6927 = vmatmul.mubr.msk.bf16.vlgmr.msra.gmra.mxu1 %vm3151_vm3, %v7488_v17  ;;  %7178 = vmatprep.subr.msk.bf16.mxu0 %vm3572_vm4, %v7489_v18  ;;  %v3574_v20 = vsel %vm3572_vm4, %v7489_v18, 0  ;;  %v3640_v23 = vsel %vm3572_vm4, %v7490_v19, 0  ;;  %v9218_v21 = vld [vmem:[#allocation4 + $0x20] ss:$0 sps:$4 sm:$0xff]   ;;  %v9220_v24 = vld [vmem:[#allocation4 + $0x2c] ss:$0 sps:$4 sm:$0xff]  }
 0x363   : > { %7179 = vmatprep.subr.msk.bf16.mxu1 %vm3572_vm4, %v7490_v19  ;;  %6931 = vmatpush3.bf16.msra.mxu0 %v3574_v20 }
 0x364   : > { %6939 = vmatpush3.bf16.msra.mxu1 %v3640_v23  ;;  %6932 = vmatprep.subr.bf16.mxu0 %v7491_v22 }
 0x365   : > { %6940 = vmatprep.subr.bf16.mxu1 %v7492_v54 }
 0x367   : > { %6933 = vmatpush3.bf16.msra.mxu0 %v7491_v22 }
 0x368   : > { %6941 = vmatpush3.bf16.msra.mxu1 %v7492_v54  ;;  %7180 = vmatprep.subr.msk.bf16.mxu0 %vm3572_vm4, %v9218_v21 }
 0x369   : > { %7181 = vmatprep.subr.msk.bf16.mxu1 %vm3572_vm4, %v9220_v24 }
 0x40e   : > { %v6904_v25 = vpop.f32.mrf.mxu0 }
 0x40f   : > { %v9226_v29 = vpop.f32.mrf.mxu1  ;;  %v3447_v35 = vsel %vm3440_vm5, %v6904_v25, -inf }
 0x410   : > { %v3198_v30 = vpop.f32.mrf.mxu0  ;;  %v3456_v50 = vsel %vm3440_vm5, %v9226_v29, -inf }
 0x411   : > { %v9228_v1 = vpop.f32.mrf.mxu1  ;;  %v3441_v31 = vsel %vm3440_vm5, %v3198_v30, -inf }
 0x412   : > { %3442 = vmax.xlane.f32.xlu1 %v3441_v31  ;;  %v6905_v2 = vpop.f32.mrf.mxu0  ;;  %v3450_v49 = vsel %vm3440_vm5, %v9228_v1, -inf  ;;  %v3706_v31 = vsel %vm3572_vm4, %v9218_v21, 0 }
 0x413   : > { %v6913_v32 = vpop.f32.mrf.mxu1  ;;  %v7495_v2 = vld [vmem:[#allocation4 + $0x18] sm:$0xff]  }
 0x414   : > { %v3201_v33 = vpop.f32.mrf.mxu0 }
 0x415   : > { %v3444_v34 = vsel %vm3440_vm5, %v3201_v33, -inf  ;;  %v9233_v39 = vpop.f32.mrf.mxu1 }
 0x416   : > { %3445 = vmax.xlane.f32.xlu0 %v3444_v34  ;;  %v3453_v5 = vsel %vm3440_vm5, %v9233_v39, -inf }
 0x41a   : > { %3448 = vmax.xlane.f32.xlu0 %v3447_v35 }
 0x41f   : > { %v6920_v36 = vpop.f32.mrf.mxu0 }
 0x420   : > { %v3465_v52 = vsel %vm3440_vm5, %v6920_v36, -inf }
 0x421   : > { %v3350_v58 = vpop.f32.mrf.mxu0 }
 0x422   : > { %v9235_v40 = vpop.f32.mrf.mxu1  ;;  %v3459_v41 = vsel %vm3440_vm5, %v3350_v58, -inf }
 0x423   : > { %3460 = vmax.xlane.f32.xlu1 %v3459_v41  ;;  %v6921_v42 = vpop.f32.mrf.mxu0  ;;  %v3474_v53 = vsel %vm3440_vm5, %v9235_v40, -inf }
 0x424   : > { %v9238_v43 = vpop.f32.mrf.mxu1 }
 0x425   : > { %v3353_v47 = vpop.f32.mrf.mxu0  ;;  %v3468_v10 = vsel %vm3440_vm5, %v9238_v43, -inf }
 0x426   : > { %v6929_v48 = vpop.f32.mrf.mxu1  ;;  %v3462_v44 = vsel %vm3440_vm5, %v3353_v47, -inf }
 0x427   : > { %3466 = vmax.xlane.f32.xlu1 %v3465_v52  ;;  %3463 = vmax.xlane.f32.xlu0 %v3462_v44 }
 0x428   : > { %v9250_v51 = vpop.f32.mrf.mxu1 }
 0x429   : > { %v3471_v26 = vsel %vm3440_vm5, %v9250_v51, -inf }
 0x42b   : > { %3454 = vmax.xlane.f32.xlu1 %v3453_v5  ;;  %3451 = vmax.xlane.f32.xlu0 %v3450_v49 }
 0x42f   : > { %3469 = vmax.xlane.f32.xlu1 %v3468_v10  ;;  %3457 = vmax.xlane.f32.xlu0 %v3456_v50 }
 0x433   : > { %3475 = vmax.xlane.f32.xlu1 %v3474_v53  ;;  %3472 = vmax.xlane.f32.xlu0 %v3471_v26 }
 0x49b   : > { %v3443_v46 = vpop.xlane.xlu1 %3442 }
 0x49c   : > { %v3477_v55 = vsub.f32 %v3198_v30, %v3443_v46 }
 0x49e   : > { %v3489_v57 = vmul.f32 1.442695, %v3477_v55 }
 0x49f   : > { %v3446_v60 = vpop.xlane.xlu0 %3445 }
 0x4a0   : > { %7519 = vpow2.f32 %v3489_v57  ;;  %v3478_v61 = vsub.f32 %v3201_v33, %v3446_v60  ;;  %v3772_v57 = vsel %vm3572_vm4, %v9220_v24, 0  ;;  %v7496_v60 = vld [vmem:[#allocation4 + $0x24] sm:$0xff]  }
 0x4a2   : > { %v3491_v62 = vmul.f32 1.442695, %v3478_v61 }
 0x4a3   : > { %v3449_v37 = vpop.xlane.xlu0 %3448 }
 0x4a4   : > { %7521 = vpow2.f32 %v3491_v62  ;;  %v3479_v27 = vsub.f32 %v6904_v25, %v3449_v37 }
 0x4a6   : > { %v3493_v63 = vmul.f32 1.442695, %v3479_v27 }
 0x4a8   : > { %7523 = vpow2.f32 %v3493_v63 }
 0x4ac   : > { %v3461_v56 = vpop.xlane.xlu1 %3460 }
 0x4ad   : > { %v7520_v28 = vpop.eup %7519  ;;  %v3483_v3 = vsub.f32 %v3350_v58, %v3461_v56 }
 0x4ae   : > { %v3513_v4 = vsel %vm3440_vm5, %v7520_v28, 0.0 }
 0x4af   : > { %v3501_v6 = vmul.f32 1.442695, %v3483_v3  ;;  %3514 = vadd.xlane.f32.xlu0 %v3513_v4  ;;  %v3850_v3 = vld [vmem:[%s9807_s1] sm:$0xf] }
 0x4b0   : > { %v3467_v59 = vpop.xlane.xlu1 %3466  ;;  %v3464_v38 = vpop.xlane.xlu0 %3463  ;;  %v3858_v4 = vsel %vm3572_vm4, %v3850_v3, 0  ;;  %v7497_v3 = vld [vmem:[#allocation14 + $0x8] sm:$0xff]  }
 0x4b1   : > { %v7522_v8 = vpop.eup %7521  ;;  %7525 = vpow2.f32 %v3501_v6  ;;  %v3485_v9 = vsub.f32 %v6920_v36, %v3467_v59  ;;  %v3484_v11 = vsub.f32 %v3353_v47, %v3464_v38  ;;  %v3851_v6 = vld [vmem:[%s9807_s1 + $0x4] sm:$0xf] }
 0x4b2   : > { %v3516_v45 = vsel %vm3440_vm5, %v7522_v8, 0.0  ;;  %v3549_v12 = vpack.c.bf16 %v7522_v8, %v7520_v28  ;;  %v3904_v59 = vsel %vm3572_vm4, %v3851_v6, 0 }
 0x4b3   : > { %v3505_v14 = vmul.f32 1.442695, %v3485_v9  ;;  %v3503_v15 = vmul.f32 1.442695, %v3484_v11  ;;  %3517 = vadd.xlane.f32.xlu0 %v3516_v45 }
 0x4b4   : > { %v3455_v16 = vpop.xlane.xlu1 %3454  ;;  %v3452_v17 = vpop.xlane.xlu0 %3451  ;;  %6934 = vmatprep.mubr.msk.bf16.mxu0 %vm3440_vm5, %v3549_v12  ;;  %v3852_v12 = vld [vmem:[%s9807_s1 + $0x8] sm:$0xf] }
 0x4b5   : > { %v7524_v18 = vpop.eup %7523  ;;  %7527 = vpow2.f32 %v3505_v14  ;;  %v3481_v19 = vsub.f32 %v9233_v39, %v3455_v16  ;;  %v3480_v20 = vsub.f32 %v9228_v1, %v3452_v17 }
 0x4b6   : > { %7529 = vpow2.f32 %v3503_v15  ;;  %v3550_v22 = vpack.c.bf16 %v7524_v18, %v7524_v18  ;;  %v3519_v48 = vsel %vm3440_vm5, %v7524_v18, 0.0 }
 0x4b7   : > { %v3497_v23 = vmul.f32 1.442695, %v3481_v19  ;;  %v3495_v54 = vmul.f32 1.442695, %v3480_v20  ;;  %v3950_v19 = vsel %vm3572_vm4, %v3852_v12, 0 }
 0x4b8   : > { %v3470_v25 = vpop.xlane.xlu1 %3469  ;;  %v3458_v30 = vpop.xlane.xlu0 %3457  ;;  %6935 = vmatmul.mubr.msk.bf16.vlgmr.msra.gmra.mxu0 %vm3440_vm5, %v3550_v22 }
 0x4b9   : > { %7531 = vpow2.f32 %v3497_v23  ;;  %v3486_v32 = vsub.f32 %v9238_v43, %v3470_v25  ;;  %v3482_v33 = vsub.f32 %v9226_v29, %v3458_v30  ;;  %6947 = vmatpush3.bf16.msra.mxu0 %v3706_v31 }
 0x4ba   : > { %7533 = vpow2.f32 %v3495_v54  ;;  %6948 = vmatprep.subr.bf16.mxu0 %v7495_v2 }
 0x4bb   : > { %v3507_v1 = vmul.f32 1.442695, %v3486_v32  ;;  %v3499_v34 = vmul.f32 1.442695, %v3482_v33  ;;  %v4058_v32 = vld [vmem:[#allocation34] sm:$0xf] }
 0x4bc   : > { %v3476_v35 = vpop.xlane.xlu1 %3475  ;;  %v3473_v36 = vpop.xlane.xlu0 %3472 }
 0x4bd   : > { %7535 = vpow2.f32 %v3507_v1  ;;  %v3488_v39 = vsub.f32 %v9235_v40, %v3476_v35  ;;  %v3487_v58 = vsub.f32 %v9250_v51, %v3473_v36  ;;  %6949 = vmatpush3.bf16.msra.mxu0 %v7495_v2  ;;  %v4066_v35 = vsel %vm3572_vm4, %v4058_v32, 0  ;;  %v7503_v32 = vld [vmem:[#allocation19] sm:$0xff]  }
 0x4be   : > { %v7526_v21 = vpop.eup %7525  ;;  %7537 = vpow2.f32 %v3499_v34  ;;  %6962 = vmatprep.subr.bf16.mxu0 %v8332_v0 }
 0x4bf   : > { %v3511_v41 = vmul.f32 1.442695, %v3488_v39  ;;  %v3509_v42 = vmul.f32 1.442695, %v3487_v58  ;;  %v3531_v29 = vsel %vm3440_vm5, %v7526_v21, 0.0 }
 0x4c0   : > { %3532 = vadd.xlane.f32.xlu1 %v3531_v29 }
 0x4c1   : > { %7539 = vpow2.f32 %v3509_v42 }
 0x4c2   : > { %v7528_v43 = vpop.eup %7527  ;;  %7541 = vpow2.f32 %v3511_v41 }
 0x4c3   : > { %v7530_v47 = vpop.eup %7529  ;;  %v3554_v52 = vpack.c.bf16 %v7528_v43, %v7528_v43  ;;  %v3537_v46 = vsel %vm3440_vm5, %v7528_v43, 0.0  ;;  %v3853_v43 = vld [vmem:[%s9807_s1 + $0xc] sm:$0xf] }
 0x4c4   : > { %3520 = vadd.xlane.f32.xlu1 %v3519_v48  ;;  %v3553_v40 = vpack.c.bf16 %v7530_v47, %v7526_v21  ;;  %v3534_v49 = vsel %vm3440_vm5, %v7530_v47, 0.0 }
 0x4c6   : > { %v7532_v44 = vpop.eup %7531  ;;  %6950 = vmatprep.mubr.msk.bf16.mxu0 %vm3440_vm5, %v3553_v40 }
 0x4c7   : > { %v7534_v5 = vpop.eup %7533  ;;  %6951 = vmatmul.mubr.msk.bf16.vlgmr.msra.gmra.mxu0 %vm3440_vm5, %v3554_v52  ;;  %v3525_v27 = vsel %vm3440_vm5, %v7532_v44, 0.0  ;;  %v4060_v52 = vld [vmem:[#allocation34 + $0x8] sm:$0xf] }
 0x4c8   : > { %3535 = vadd.xlane.f32.xlu1 %v3534_v49  ;;  %v3522_v10 = vsel %vm3440_vm5, %v7534_v5, 0.0  ;;  %v3551_v50 = vpack.c.bf16 %v7532_v44, %v7534_v5  ;;  %6964 = vmatprep.mubr.msk.bf16.mxu0 %vm8333_vm0, %v8332_v0  ;;  %v3996_v49 = vsel %vm3572_vm4, %v3853_v43, 0 }
 0x4c9   : > { %3523 = vadd.xlane.f32.xlu0 %v3522_v10  ;;  %6963 = vmatpush3.bf16.msra.mxu0 %v3858_v4 }
 0x4ca   : > { %v7536_v51 = vpop.eup %7535  ;;  %6942 = vmatprep.mubr.msk.bf16.mxu1 %vm3440_vm5, %v3551_v50  ;;  %6974 = vmatprep.subr.bf16.mxu0 %v8332_v0 }
 0x4cb   : > { %v7538_v53 = vpop.eup %7537  ;;  %v3540_v26 = vsel %vm3440_vm5, %v7536_v51, 0.0 }
 0x4cc   : > { %3541 = vadd.xlane.f32.xlu1 %v3540_v26  ;;  %v3552_v55 = vpack.c.bf16 %v7538_v53, %v7538_v53  ;;  %v3528_v62 = vsel %vm3440_vm5, %v7538_v53, 0.0 }
 0x4cd   : > { %3538 = vadd.xlane.f32.xlu0 %v3537_v46 }
 0x4ce   : > { %6943 = vmatmul.mubr.msk.bf16.vlgmr.msra.gmra.mxu1 %vm3440_vm5, %v3552_v55  ;;  %v7540_v61 = vpop.eup %7539 }
 0x4cf   : > { %6955 = vmatpush3.bf16.msra.mxu1 %v3772_v57  ;;  %v7542_v37 = vpop.eup %7541  ;;  %v3555_v63 = vpack.c.bf16 %v7540_v61, %v7536_v51  ;;  %v3543_v24 = vsel %vm3440_vm5, %v7540_v61, 0.0  ;;  %v4160_v51 = vsel %vm3572_vm4, %v4060_v52, 0 }
 0x4d0   : > { %6956 = vmatprep.subr.bf16.mxu1 %v7496_v60  ;;  %3529 = vadd.xlane.f32.xlu1 %v3528_v62  ;;  %v3546_v56 = vsel %vm3440_vm5, %v7542_v37, 0.0  ;;  %v3556_v28 = vpack.c.bf16 %v7542_v37, %v7542_v37  ;;  %v4059_v37 = vld [vmem:[#allocation34 + $0x4] sm:$0xf] }
 0x4d1   : > { %3526 = vadd.xlane.f32.xlu0 %v3525_v27  ;;  %6958 = vmatprep.mubr.msk.bf16.mxu1 %vm3440_vm5, %v3555_v63  ;;  %v4113_v4 = vsel %vm3572_vm4, %v4059_v37, 0 }
 0x4d3   : > { %6957 = vmatpush3.bf16.msra.mxu1 %v7496_v60 }
 0x4d4   : > { %3547 = vadd.xlane.f32.xlu1 %v3546_v56  ;;  %6968 = vmatprep.subr.bf16.mxu1 %v8332_v0 }
 0x4d5   : > { %3544 = vadd.xlane.f32.xlu0 %v3543_v24 }
 0x4d6   : > { %6959 = vmatmul.mubr.msk.bf16.vlgmr.msra.gmra.mxu1 %vm3440_vm5, %v3556_v28 }
 0x4d7   : > { %6970 = vmatprep.mubr.msk.bf16.mxu1 %vm8333_vm0, %v8332_v0  ;;  %6969 = vmatpush3.bf16.msra.mxu1 %v3904_v59 }
 0x4d8   : > { %6980 = vmatprep.subr.bf16.mxu1 %v8332_v0 }
 0x538   : > { %v3515_v38 = vpop.xlane.xlu0 %3514 }
 0x539   : > { %7543 = vrcp.f32 %v3515_v38 }
 0x53c   : > { %v3518_v14 = vpop.xlane.xlu0 %3517 }
 0x546   : > { %v7544_v11 = vpop.eup %7543 }
 0x549   : > { %v3533_v8 = vpop.xlane.xlu1 %3532 }
 0x54a   : > { %7545 = vrcp.f32 %v3533_v8  ;;  %v7498_v8 = vld [vmem:[#allocation14] sm:$0xff]  }
 0x54b   : > { %7547 = vrcp.f32 %v3518_v14 }
 0x54d   : > { %v3521_v16 = vpop.xlane.xlu1 %3520 }
 0x551   : > { %v3536_v22 = vpop.xlane.xlu1 %3535 }
 0x552   : > { %v3524_v20 = vpop.xlane.xlu0 %3523 }
 0x553   : > { %7549 = vrcp.f32 %v3524_v20 }
 0x554   : > { %7551 = vrcp.f32 %v3521_v16  ;;  %v7499_v16 = vld [vmem:[#allocation22 + $0x8] sm:$0xff]  }
 0x555   : > { %v3542_v25 = vpop.xlane.xlu1 %3541  ;;  %7553 = vrcp.f32 %v3536_v22  ;;  %v7500_v22 = vld [vmem:[#allocation22] sm:$0xff]  }
 0x556   : > { %v3539_v30 = vpop.xlane.xlu0 %3538  ;;  %7555 = vrcp.f32 %v3542_v25  ;;  %v7501_v25 = vld [vmem:[#allocation19 + $0x8] sm:$0xff]  }
 0x557   : > { %v7546_v31 = vpop.eup %7545  ;;  %7557 = vrcp.f32 %v3539_v30  ;;  %v7502_v30 = vld [vmem:[#allocation3 + $0x14] ss:$0 sps:$4 sm:$0xff]  }
 0x558   : > { %v7548_v58 = vpop.eup %7547 }
 0x559   : > { %v3530_v41 = vpop.xlane.xlu1 %3529 }
 0x55a   : > { %v3527_v36 = vpop.xlane.xlu0 %3526 }
 0x55b   : > { %7559 = vrcp.f32 %v3527_v36  ;;  %v7506_v36 = vld [vmem:[#allocation3] sm:$0xff]  }
 0x55c   : > { %7561 = vrcp.f32 %v3530_v41 }
 0x55d   : > { %v3548_v60 = vpop.xlane.xlu1 %3547 }
 0x55e   : > { %v3545_v26 = vpop.xlane.xlu0 %3544 }
 0x55f   : > { %7563 = vrcp.f32 %v3545_v26 }
 0x560   : > { %v7550_v21 = vpop.eup %7549  ;;  %7565 = vrcp.f32 %v3548_v60 }
 0x561   : > { %v7552_v47 = vpop.eup %7551 }
 0x562   : > { %v7554_v55 = vpop.eup %7553 }
 0x563   : > { %v7556_v57 = vpop.eup %7555 }
 0x564   : > { %v7558_v27 = vpop.eup %7557 }
 0x568   : > { %v7560_v59 = vpop.eup %7559 }
 0x578   : > { %v6936_v9 = vpop.f32.mrf.mxu0 }
 0x579   : > { %v3836_v40 = vmul.f32 %v7552_v47, %v6936_v9  ;;  %v4275_v9 = vld [vmem:[%s1080_s25] sm:$0xff]  ;;  %s6089_s25 = sshll.u32 %s9387_s28, 4  ;;  %s9622_s25 = int_to_ptr.vmem [resolvable:$true] %s6089_s25 }
 0x57a   : > { %v3610_v45 = vpop.f32.mrf.mxu0  ;;  %v4276_v14 = vpack.c.bf16 %v4275_v9, %v4275_v9 }
 0x57b   : > { %v3834_v15 = vmul.f32 %v7544_v11, %v3610_v45  ;;  %v7562_v11 = vpop.eup %7561  ;;  %v4061_v45 = vld [vmem:[#allocation34 + $0xc] sm:$0xf] }
 0x57c   : > { %v6937_v17 = vpop.f32.mrf.mxu0 }
 0x57d   : > { %v3846_v18 = vpack.c.bf16 %v3834_v15, %v3834_v15  ;;  %v4207_v17 = vsel %vm3572_vm4, %v4061_v45, 0 }
 0x57e   : > { %v3613_v23 = vpop.f32.mrf.mxu0 }
 0x57f   : > { %6965 = vmatmul.mubr.msk.bf16.vlgmr.msra.gmra.mxu0 %vm3151_vm3, %v3846_v18  ;;  %v3835_v42 = vmul.f32 %v7548_v58, %v3613_v23 }
 0x580   : > { %6975 = vmatpush3.bf16.msra.mxu0 %v3950_v19  ;;  %6976 = vmatprep.mubr.msk.bf16.mxu0 %vm8333_vm0, %v8332_v0  ;;  %v7564_v19 = vpop.eup %7563 }
 0x581   : > { %6986 = vmatprep.subr.bf16.mxu0 %v8332_v0  ;;  %v4054_v10 = vpack.c.bf16 %v3836_v40, %v3835_v42  ;;  %v7566_v23 = vpop.eup %7565 }
 0x587   : > { %v6952_v54 = vpop.f32.mrf.mxu0 }
 0x588   : > { %v3842_v56 = vmul.f32 %v7558_v27, %v6952_v54 }
 0x589   : > { %v3742_v2 = vpop.f32.mrf.mxu0 }
 0x58a   : > { %v3840_v33 = vmul.f32 %v7546_v31, %v3742_v2  ;;  %v5016_v2 = vsel %vm3151_vm3, %v7502_v30, 0 }
 0x58b   : > { %v6953_v1 = vpop.f32.mrf.mxu0 }
 0x58c   : > { %v3848_v34 = vpack.c.bf16 %v3840_v33, %v3840_v33  ;;  %v7504_v33 = vld [vmem:[#allocation3 + $0x8] ss:$0 sps:$4 sm:$0xff]   ;;  %v7505_v1 = vld [vmem:[#allocation3 + $0xc] sm:$0xff]  }
 0x58d   : > { %v3745_v53 = vpop.f32.mrf.mxu0 }
 0x58e   : > { %v9305_v39 = vpop.f32.mrf.mxu1  ;;  %6977 = vmatmul.mubr.msk.bf16.vlgmr.msra.gmra.mxu0 %vm3151_vm3, %v3848_v34  ;;  %v3841_v61 = vmul.f32 %v7554_v55, %v3745_v53  ;;  %v4959_v34 = vsel %vm3151_vm3, %v7504_v33, 0 }
 0x58f   : > { %6987 = vmatpush3.bf16.msra.mxu0 %v4066_v35  ;;  %6988 = vmatprep.mubr.msk.bf16.mxu0 %vm8333_vm0, %v8332_v0  ;;  %v3839_v12 = vmul.f32 %v7562_v11, %v9305_v39  ;;  %v5013_v35 = vsel %vm3151_vm3, %v7505_v1, 0  ;;  %v4956_v39 = vsel %vm3151_vm3, %v7506_v36, 0 }
 0x590   : > { %v3676_v29 = vpop.f32.mrf.mxu1  ;;  %6998 = vmatprep.subr.bf16.mxu0 %v8332_v0  ;;  %v4056_v6 = vpack.c.bf16 %v3842_v56, %v3841_v61 }
 0x591   : > { %v3837_v48 = vmul.f32 %v7550_v21, %v3676_v29 }
 0x592   : > { %v6945_v44 = vpop.f32.mrf.mxu1 }
 0x593   : > { %v3847_v5 = vpack.c.bf16 %v3837_v48, %v3837_v48 }
 0x594   : > { %v3679_v50 = vpop.f32.mrf.mxu1 }
 0x595   : > { %6971 = vmatmul.mubr.msk.bf16.vlgmr.msra.gmra.mxu1 %vm3151_vm3, %v3847_v5  ;;  %v3838_v38 = vmul.f32 %v7560_v59, %v3679_v50  ;;  %v6637_v59 = vld [vmem:[#allocation26] ss:$0 sm:$0xff] }
 0x596   : > { %v6960_v46 = vpop.f32.mrf.mxu1  ;;  %6989 = vmatmul.mubr.msk.bf16.vlgmr.msra.gmra.mxu0 %vm3151_vm3, %v4054_v10  ;;  %6981 = vmatpush3.bf16.msra.mxu1 %v3996_v49 }
 0x597   : > { %6999 = vmatpush3.bf16.msra.mxu0 %v4160_v51  ;;  %6982 = vmatprep.mubr.msk.bf16.mxu1 %vm8333_vm0, %v8332_v0  ;;  %v4055_v15 = vpack.c.bf16 %v3839_v12, %v3838_v38  ;;  %v3845_v54 = vmul.f32 %v7566_v23, %v6960_v46 }
 0x598   : > { %v3808_v62 = vpop.f32.mrf.mxu1  ;;  %7000 = vmatprep.mubr.msk.bf16.mxu0 %vm8333_vm0, %v8332_v0  ;;  %7010 = vmatprep.subr.bf16.mxu0 %v8332_v0 }
 0x599   : > { %v3843_v63 = vmul.f32 %v7556_v57, %v3808_v62  ;;  %6992 = vmatprep.subr.bf16.mxu1 %v8332_v0  ;;  %v6631_v62 = vld [vmem:[%s9808_s16] ss:$0 sm:$0xff] }
 0x59a   : > { %v6961_v24 = vpop.f32.mrf.mxu1 }
 0x59b   : > { %v3849_v28 = vpack.c.bf16 %v3843_v63, %v3843_v63 }
 0x59c   : > { %v3811_v18 = vpop.f32.mrf.mxu1 }
 0x59d   : > { %6983 = vmatmul.mubr.msk.bf16.vlgmr.msra.gmra.mxu1 %vm3151_vm3, %v3849_v28  ;;  %v3844_v20 = vmul.f32 %v7564_v19, %v3811_v18 }
 0x59e   : > { %7001 = vmatmul.mubr.msk.bf16.vlgmr.msra.gmra.mxu0 %vm3151_vm3, %v4056_v6  ;;  %6993 = vmatpush3.bf16.msra.mxu1 %v4113_v4 }
 0x59f   : > { %7011 = vmatpush3.bf16.msra.mxu0 %v7497_v3  ;;  %6994 = vmatprep.mubr.msk.bf16.mxu1 %vm8333_vm0, %v8332_v0  ;;  %v4057_v31 = vpack.c.bf16 %v3845_v54, %v3844_v20 }
 0x5a0   : > { %7012 = vmatprep.subr.bf16.mxu0 %v8332_v0  ;;  %7014 = vmatprep.mubr.msk.bf16.mxu0 %vm8333_vm0, %v8332_v0 }
 0x5a1   : > { %7004 = vmatprep.subr.bf16.mxu1 %v8332_v0 }
 0x5a3   : > { %7013 = vmatpush3.bf16.msra.mxu0 %v7498_v8 }
 0x5a4   : > { %7026 = vmatprep.subr.bf16.mxu0 %v8332_v0 }
 0x5a5   : > { %6995 = vmatmul.mubr.msk.bf16.vlgmr.msra.gmra.mxu1 %vm3151_vm3, %v4055_v15 }
 0x5a6   : > { %7015 = vmatmul.mubr.msk.bf16.vlgmr.msra.gmra.mxu0 %vm1269_vm1, %v4276_v14  ;;  %7005 = vmatpush3.bf16.msra.mxu1 %v4207_v17 }
 0x5a7   : > { %7027 = vmatpush3.bf16.msra.mxu0 %v7499_v16  ;;  %7006 = vmatprep.mubr.msk.bf16.mxu1 %vm8333_vm0, %v8332_v0 }
 0x5a8   : > { %7028 = vmatprep.subr.bf16.mxu0 %v8332_v0  ;;  %7018 = vmatprep.subr.bf16.mxu1 %v8332_v0 }
 0x5a9   : > { %7030 = vmatprep.mubr.msk.bf16.mxu0 %vm8333_vm0, %v8332_v0 }
 0x5ab   : > { %7029 = vmatpush3.bf16.msra.mxu0 %v7500_v22 }
 0x5ac   : > { %7042 = vmatprep.subr.bf16.mxu0 %v8332_v0 }
 0x5ad   : > { %7007 = vmatmul.mubr.msk.bf16.vlgmr.msra.gmra.mxu1 %vm3151_vm3, %v4057_v31 }
 0x5ae   : > { %7019 = vmatpush3.bf16.msra.mxu1 %v7501_v25  ;;  %7031 = vmatmul.mubr.msk.bf16.vlgmr.msra.gmra.mxu0 %vm1269_vm1, %v4276_v14 }
 0x5af   : > { %7043 = vmatpush3.bf16.xpose.msra.mxu0 %v5016_v2  ;;  %7020 = vmatprep.subr.bf16.mxu1 %v8332_v0 }
 0x5b0   : > { %7022 = vmatprep.mubr.msk.bf16.mxu1 %vm8333_vm0, %v8332_v0  ;;  %7044 = vmatprep.subr.bf16.mxu0 %v8332_v0 }
 0x5b1   : > { %7046 = vmatprep.mubr.msk.bf16.mxu0 %vm8333_vm0, %v8332_v0 }
 0x5b2   : > { %7021 = vmatpush3.bf16.msra.mxu1 %v7503_v32  ;;  %v6636_v32 = vld [vmem:[%s9809_s3] ss:$0 sm:$0xff] }
 0x5b3   : > { %7034 = vmatprep.subr.bf16.mxu1 %v8332_v0 }
 0x5b5   : > { %7023 = vmatmul.mubr.msk.bf16.vlgmr.msra.gmra.mxu1 %vm1269_vm1, %v4276_v14 }
 0x5b6   : > { %7035 = vmatpush3.bf16.xpose.msra.mxu1 %v4959_v34  ;;  %7038 = vmatprep.mubr.msk.bf16.mxu1 %vm8333_vm0, %v8332_v0 }
 0x5b7   : > { %7045 = vmatpush3.bf16.xpose.msra.mxu0 %v5013_v35  ;;  %7036 = vmatprep.subr.bf16.mxu1 %v8332_v0 }
 0x5b8   : > { %7058 = vmatprep.subr.bf16.mxu0 %v8332_v0 }
 0x5be   : > { %7037 = vmatpush3.bf16.xpose.msra.mxu1 %v4956_v39 }
 0x5bf   : > { %7050 = vmatprep.subr.bf16.mxu1 %v8332_v0 }
 0x63f   : > { %v3894_v58 = vpop.f32.mrf.mxu0 }
 0x640   : > { %v4038_v49 = vsel %vm1269_vm1, %v3894_v58, 0.0 }
 0x641   : > { %v6966_v21 = vpop.f32.mrf.mxu0 }
 0x643   : > { %v3897_v41 = vpop.f32.mrf.mxu0 }
 0x645   : > { %v6967_v42 = vpop.f32.mrf.mxu0 }
 0x646   : > { %v6641_v42 = vld [vmem:[#allocation31] ss:$0 sm:$0xff] }
 0x64e   : > { %v3986_v29 = vpop.f32.mrf.mxu0 }
 0x64f   : > { %v4041_v46 = vsel %vm1269_vm1, %v3986_v29, 0.0 }
 0x650   : > { %v6978_v43 = vpop.f32.mrf.mxu0 }
 0x652   : > { %v3989_v47 = vpop.f32.mrf.mxu0 }
 0x654   : > { %v6979_v48 = vpop.f32.mrf.mxu0 }
 0x655   : > { %v3940_v52 = vpop.f32.mrf.mxu1 }
 0x656   : > { %v4039_v40 = vsel %vm1269_vm1, %v3940_v52, 0.0  ;;  %v4102_v44 = vpop.f32.mrf.mxu0 }
 0x657   : > { %v6972_v5 = vpop.f32.mrf.mxu1  ;;  %v4040_v50 = vadd.f32 %v4039_v40, %v4038_v49  ;;  %v4250_v12 = vsel %vm1269_vm1, %v4102_v44, 0.0 }
 0x658   : > { %v6990_v10 = vpop.f32.mrf.mxu0 }
 0x659   : > { %v3943_v51 = vpop.f32.mrf.mxu1  ;;  %v4042_v60 = vadd.f32 %v4041_v46, %v4040_v50 }
 0x65a   : > { %v4105_v53 = vpop.f32.mrf.mxu0 }
 0x65b   : > { %v6973_v26 = vpop.f32.mrf.mxu1  ;;  %v4257_v22 = vsel %vm1269_vm1, %v4105_v53, 0.0 }
 0x65c   : > { %v6991_v55 = vpop.f32.mrf.mxu0 }
 0x65d   : > { %v4032_v57 = vpop.f32.mrf.mxu1 }
 0x65e   : > { %v4043_v61 = vsel %vm1269_vm1, %v4032_v57, 0.0  ;;  %v4196_v37 = vpop.f32.mrf.mxu0 }
 0x65f   : > { %v4044_v27 = vadd.f32 %v4043_v61, %v4042_v60  ;;  %v6984_v63 = vpop.f32.mrf.mxu1  ;;  %v4253_v23 = vsel %vm1269_vm1, %v4196_v37, 0.0 }
 0x660   : > { %v7002_v56 = vpop.f32.mrf.mxu0 }
 0x661   : > { %v4052_v24 = vadd.f32 %v6631_v62, %v4044_v27  ;;  %v4035_v28 = vpop.f32.mrf.mxu1 }
 0x662   : > { %v4199_v3 = vpop.f32.mrf.mxu0 }
 0x663   : > { %v6985_v4 = vpop.f32.mrf.mxu1  ;;  %4053 = vst.msk [vmem:[%s1228_s15] sm:$0xff] %vm1269_vm1, %v4052_v24  ;;  %v4260_v34 = vsel %vm1269_vm1, %v4199_v3, 0.0 }
 0x664   : > { %v7003_v6 = vpop.f32.mrf.mxu0 }
 0x665   : > { %v4149_v38 = vpop.f32.mrf.mxu1 }
 0x666   : > { %v4251_v8 = vsel %vm1269_vm1, %v4149_v38, 0.0  ;;  %v4337_v9 = vpop.f32.mrf.mxu0 }
 0x667   : > { %v4338_v11 = vadd.f32 %v6637_v59, %v4337_v9  ;;  %v6996_v45 = vpop.f32.mrf.mxu1  ;;  %v4252_v15 = vadd.f32 %v4251_v8, %v4250_v12 }
 0x668   : > { %v7016_v14 = vpop.f32.mrf.mxu0 }
 0x669   : > { %v4343_v16 = vmul.f32 0.35355338, %v4338_v11  ;;  %v4152_v17 = vpop.f32.mrf.mxu1  ;;  %v4254_v31 = vadd.f32 %v4253_v23, %v4252_v15 }
 0x66a   : > { %v4258_v18 = vsel %vm1269_vm1, %v4152_v17, 0.0  ;;  %v4340_v19 = vpop.f32.mrf.mxu0 }
 0x66b   : > { %4474 = vrot.lane.b32.xlu1 %v4343_v16, %s8334_s14  ;;  %4471 = vrot.lane.b32.xlu0 %v4343_v16, %s8335_s9  ;;  %v6997_v20 = vpop.f32.mrf.mxu1  ;;  %v4259_v25 = vadd.f32 %v4258_v18, %v4257_v22 }
 0x66c   : > { %v7017_v54 = vpop.f32.mrf.mxu0 }
 0x66d   : > { %v4243_v30 = vpop.f32.mrf.mxu1  ;;  %v4261_v39 = vadd.f32 %v4260_v34, %v4259_v25 }
 0x66e   : > { %v4255_v2 = vsel %vm1269_vm1, %v4243_v30, 0.0  ;;  %v9396_v44 = vpop.f32.mrf.mxu0 }
 0x66f   : > { %v4256_v33 = vadd.f32 %v4255_v2, %v4254_v31  ;;  %4477 = vrot.lane.b32.xlu1 %v4343_v16, %s8336_s10  ;;  %v7008_v1 = vpop.f32.mrf.mxu1 }
 0x670   : > { %v7032_v5 = vpop.f32.mrf.mxu0 }
 0x671   : > { %v4271_v35 = vadd.f32 %v6636_v32, %v4256_v33  ;;  %v4246_v36 = vpop.f32.mrf.mxu1 }
 0x672   : > { %v4262_v58 = vsel %vm1269_vm1, %v4246_v36, 0.0  ;;  %v4467_v49 = vpop.f32.mrf.mxu0  ;;  %v7508_v36 = vld [vmem:[#allocation3 + $0x2c] ss:$0 sps:$4 sm:$0xff]  }
 0x673   : > { %4273 = vst.msk [vmem:[%s9387_s28] sm:$0xff] %vm1269_vm1, %v4271_v35  ;;  %v4263_v21 = vadd.f32 %v4262_v58, %v4261_v39  ;;  %v7009_v41 = vpop.f32.mrf.mxu1  ;;  %v7507_v35 = vld [vmem:[#allocation3 + $0x20] ss:$0 sps:$4 sm:$0xff]   ;;  %v5130_v5 = vsel %vm3151_vm3, %v7508_v36, 0 }
 0x674   : > { %v7033_v10 = vpop.f32.mrf.mxu0 }
 0x675   : > { %v4272_v29 = vadd.f32 %v6636_v32, %v4263_v21  ;;  %v4401_v43 = vpop.f32.mrf.mxu1 }
 0x676   : > { %v4402_v47 = vadd.f32 %v6641_v42, %v4401_v43 }
 0x677   : > { %4274 = vst.msk [vmem:[%s9387_s28 + $0x8] sm:$0xff] %vm1269_vm1, %v4272_v29  ;;  %v7024_v48 = vpop.f32.mrf.mxu1 }
 0x678   : > { %4624 = vrot.lane.b32.xlu1 %v4402_v47, %s8334_s14  ;;  %4621 = vrot.lane.b32.xlu0 %v4402_v47, %s8335_s9 }
 0x679   : > { %v4404_v52 = vpop.f32.mrf.mxu1 }
 0x67b   : > { %v7025_v40 = vpop.f32.mrf.mxu1 }
 0x67c   : > { %4627 = vrot.lane.b32.xlu0 %v4402_v47, %s8336_s10  ;;  %v5073_v40 = vsel %vm3151_vm3, %v7507_v35, 0 }
 0x6dd   : > { %v4475_v50 = vpop.permute.xlu1 %4474  ;;  %v4472_v26 = vpop.permute.xlu0 %4471 }
 0x6de   : > { %v4480_v51 = vcombine.low %v4343_v16, %v4475_v50  ;;  %v4481_v53 = vcombine.high %v4343_v16, %v4475_v50 }
 0x6e0   : > { %v4488_v60 = vrot.slane %v4480_v51, %v8948_v7  ;;  %v4495_v61 = vrot.slane %v4481_v53, %v8948_v7 }
 0x6e1   : > { %v4478_v46 = vpop.permute.xlu1 %4477 }
 0x6e2   : > { %v4496_v55 = vcombine.low %v4472_v26, %v4478_v46  ;;  %v4497_v57 = vcombine.high %v4472_v26, %v4478_v46 }
 0x6e4   : > { %v4504_v62 = vrot.slane %v4496_v55, %v8948_v7  ;;  %v4511_v37 = vrot.slane %v4497_v57, %v8948_v7 }
 0x6e6   : > { %v4512_v27 = vcombine.low %v4488_v60, %v4504_v62  ;;  %v4513_v63 = vcombine.high %v4488_v60, %v4504_v62  ;;  %v4528_v56 = vcombine.low %v4495_v61, %v4511_v37  ;;  %v4529_v24 = vcombine.high %v4495_v61, %v4511_v37  ;;  %v7509_v61 = vld [vmem:[#allocation3 + $0x18] sm:$0xff]   ;;  %v7510_v62 = vld [vmem:[#allocation3 + $0x24] sm:$0xff]  }
 0x6e8   : > { %v4520_v28 = vrot.slane %v4512_v27, %v8952_v13  ;;  %v4527_v3 = vrot.slane %v4513_v63, %v8952_v13  ;;  %v4536_v4 = vrot.slane %v4528_v56, %v8952_v13  ;;  %v4543_v6 = vrot.slane %v4529_v24, %v8952_v13 }
 0x6ea   : > { %v4548_v59 = vcombine.low %v4520_v28, %v4527_v3  ;;  %v6649_v38 = vcombine.high %v4520_v28, %v4527_v3  ;;  %v4564_v8 = vcombine.low %v4536_v4, %v4543_v6  ;;  %v6650_v9 = vcombine.high %v4536_v4, %v4543_v6  ;;  %v4625_v11 = vpop.permute.xlu1 %4624  ;;  %v4622_v45 = vpop.permute.xlu0 %4621 }
 0x6eb   : > { %v4630_v17 = vcombine.low %v4402_v47, %v4625_v11  ;;  %v4631_v18 = vcombine.high %v4402_v47, %v4625_v11  ;;  %v5070_v3 = vsel %vm3151_vm3, %v7509_v61, 0 }
 0x6ec   : > { %v4555_v12 = vrot.slane %v4548_v59, %v8948_v7  ;;  %v4563_v14 = vrot.slane %v6649_v38, %v8948_v7  ;;  %v4571_v15 = vrot.slane %v4564_v8, %v8948_v7  ;;  %v4579_v16 = vrot.slane %v6650_v9, %v8948_v7 }
 0x6ed   : > { %v4638_v31 = vrot.slane %v4630_v17, %v8948_v7  ;;  %v4645_v2 = vrot.slane %v4631_v18, %v8948_v7  ;;  %v5127_v59 = vsel %vm3151_vm3, %v7510_v62, 0 }
 0x6ee   : > { %v4580_v19 = vcombine.low %v4555_v12, %v4563_v14  ;;  %v4596_v20 = vcombine.low %v4571_v15, %v4579_v16  ;;  %v4628_v22 = vpop.permute.xlu0 %4627  ;;  %v4581_v53 = vcombine.high %v4555_v12, %v4563_v14  ;;  %v4597_v26 = vcombine.high %v4571_v15, %v4579_v16 }
 0x6ef   : > { %v4646_v23 = vcombine.low %v4622_v45, %v4628_v22  ;;  %v4647_v54 = vcombine.high %v4622_v45, %v4628_v22 }
 0x6f0   : > { %v4588_v25 = vrot.slane %v4580_v19, %v8952_v13  ;;  %v4604_v30 = vrot.slane %v4596_v20, %v8952_v13  ;;  %v4595_v63 = vrot.slane %v4581_v53, %v8952_v13  ;;  %v4611_v56 = vrot.slane %v4597_v26, %v8952_v13 }
 0x6f1   : > { %v4654_v32 = vrot.slane %v4646_v23, %v8948_v7  ;;  %v4661_v33 = vrot.slane %v4647_v54, %v8948_v7 }
 0x6f2   : > { %v4612_v1 = vcombine.low %v4588_v25, %v4604_v30  ;;  %v4613_v34 = vcombine.high %v4588_v25, %v4604_v30  ;;  %v4614_v9 = vcombine.low %v4595_v63, %v4611_v56  ;;  %v4615_v11 = vcombine.high %v4595_v63, %v4611_v56 }
 0x6f3   : > { %v4662_v39 = vcombine.low %v4638_v31, %v4654_v32  ;;  %v4663_v58 = vcombine.high %v4638_v31, %v4654_v32  ;;  %v4678_v21 = vcombine.low %v4645_v2, %v4661_v33  ;;  %v4679_v41 = vcombine.high %v4645_v2, %v4661_v33 }
 0x6f4   : > { %v9416_v42 = vpack.c.bf16 %v4612_v1, %v4612_v1  ;;  %v9418_v29 = vpack.c.bf16 %v4613_v34, %v4613_v34  ;;  %v4618_v16 = vpack.c.bf16 %v4614_v9, %v4614_v9  ;;  %v4619_v17 = vpack.c.bf16 %v4615_v11, %v4615_v11 }
 0x6f5   : > { %v4670_v43 = vrot.slane %v4662_v39, %v8952_v13  ;;  %v4677_v47 = vrot.slane %v4663_v58, %v8952_v13  ;;  %v4686_v48 = vrot.slane %v4678_v21, %v8952_v13  ;;  %v4693_v52 = vrot.slane %v4679_v41, %v8952_v13  ;;  %v6645_v21 = vld [vmem:[%s9810_s22] ss:$0 sm:$0xff] }
 0x6f6   : > { %7039 = vmatmul.mubr.msk.bf16.vlgmr.msra.gmra.mxu1 %vm3151_vm3, %v9416_v42  ;;  %7047 = vmatmul.mubr.msk.bf16.vlgmr.msra.gmra.mxu0 %vm3151_vm3, %v9418_v29 }
 0x6f7   : > { %v4698_v49 = vcombine.low %v4670_v43, %v4677_v47  ;;  %v6651_v10 = vcombine.high %v4670_v43, %v4677_v47  ;;  %v4714_v50 = vcombine.low %v4686_v48, %v4693_v52  ;;  %v6652_v51 = vcombine.high %v4686_v48, %v4693_v52  ;;  %7051 = vmatpush3.bf16.xpose.msra.mxu1 %v5073_v40 }
 0x6f8   : > { %7059 = vmatpush3.bf16.xpose.msra.mxu0 %v5130_v5  ;;  %7052 = vmatprep.subr.bf16.mxu1 %v8332_v0 }
 0x6f9   : > { %v4705_v46 = vrot.slane %v4698_v49, %v8948_v7  ;;  %v4713_v55 = vrot.slane %v6651_v10, %v8948_v7  ;;  %v4721_v57 = vrot.slane %v4714_v50, %v8948_v7  ;;  %v4729_v60 = vrot.slane %v6652_v51, %v8948_v7  ;;  %7060 = vmatprep.subr.bf16.mxu0 %v8332_v0 }
 0x6fa   : > { %7054 = vmatprep.mubr.msk.bf16.mxu1 %vm8333_vm0, %v8332_v0  ;;  %7062 = vmatprep.mubr.msk.bf16.mxu0 %vm8333_vm0, %v8332_v0 }
 0x6fb   : > { %v4730_v37 = vcombine.low %v4705_v46, %v4713_v55  ;;  %v4746_v27 = vcombine.low %v4721_v57, %v4729_v60  ;;  %v4731_v4 = vcombine.high %v4705_v46, %v4713_v55  ;;  %v4747_v6 = vcombine.high %v4721_v57, %v4729_v60 }
 0x6fd   : > { %v4738_v24 = vrot.slane %v4730_v37, %v8952_v13  ;;  %v4754_v28 = vrot.slane %v4746_v27, %v8952_v13  ;;  %v4745_v12 = vrot.slane %v4731_v4, %v8952_v13  ;;  %v4761_v14 = vrot.slane %v4747_v6, %v8952_v13 }
 0x6ff   : > { %7053 = vmatpush3.bf16.xpose.msra.mxu1 %v5070_v3  ;;  %v4762_v38 = vcombine.low %v4738_v24, %v4754_v28  ;;  %v4763_v8 = vcombine.high %v4738_v24, %v4754_v28  ;;  %v4764_v19 = vcombine.low %v4745_v12, %v4761_v14  ;;  %v4765_v22 = vcombine.high %v4745_v12, %v4761_v14 }
 0x700   : > { %7061 = vmatpush3.bf16.xpose.msra.mxu0 %v5127_v59  ;;  %7066 = vmatprep.subr.bf16.mxu1 %v8332_v0 }
 0x701   : > { %7072 = vmatprep.subr.bf16.mxu0 %v8332_v0  ;;  %v4766_v45 = vpack.c.bf16 %v4762_v38, %v4762_v38  ;;  %v4767_v15 = vpack.c.bf16 %v4763_v8, %v4763_v8  ;;  %v4768_v23 = vpack.c.bf16 %v4764_v19, %v4764_v19  ;;  %v4769_v54 = vpack.c.bf16 %v4765_v22, %v4765_v22 }
 0x703   : > { %v5173_v18 = vsel %vm3151_vm3, %v4766_v45, 0  ;;  %v5216_v20 = vsel %vm3151_vm3, %v4767_v15, 0  ;;  %v5259_v25 = vsel %vm3151_vm3, %v4768_v23, 0  ;;  %v5302_v30 = vsel %vm3151_vm3, %v4769_v54, 0 }
 0x706   : > { %7055 = vmatmul.mubr.msk.bf16.vlgmr.msra.gmra.mxu1 %vm3151_vm3, %v4618_v16 }
 0x707   : > { %7063 = vmatmul.mubr.msk.bf16.vlgmr.msra.gmra.mxu0 %vm3151_vm3, %v4619_v17  ;;  %7067 = vmatpush3.bf16.xpose.msra.mxu1 %v5173_v18 }
 0x708   : > { %7073 = vmatpush3.bf16.xpose.msra.mxu0 %v5216_v20  ;;  %7068 = vmatprep.mubr.msk.bf16.mxu1 %vm8333_vm0, %v8332_v0 }
 0x709   : > { %7074 = vmatprep.mubr.msk.bf16.mxu0 %vm8333_vm0, %v8332_v0  ;;  %7078 = vmatprep.subr.bf16.mxu1 %v8332_v0 }
 0x70a   : > { %7084 = vmatprep.subr.bf16.mxu0 %v8332_v0 }
 0x70e   : > { %7069 = vmatmul.mubr.msk.bf16.vlgmr.msra.gmra.mxu1 %vm3151_vm3, %v9416_v42  ;;  %v4465_v42 = vadd.f32 %v6645_v21, %v9396_v44 }
 0x70f   : > { %7075 = vmatmul.mubr.msk.bf16.vlgmr.msra.gmra.mxu0 %vm3151_vm3, %v9418_v29  ;;  %7079 = vmatpush3.bf16.xpose.msra.mxu1 %v5259_v25 }
 0x710   : > { %7085 = vmatpush3.bf16.xpose.msra.mxu0 %v5302_v30  ;;  %7080 = vmatprep.mubr.msk.bf16.mxu1 %vm8333_vm0, %v8332_v0 }
 0x711   : > { %7086 = vmatprep.mubr.msk.bf16.mxu0 %vm8333_vm0, %v8332_v0  ;;  %7090 = vmatprep.subr.bf16.mxu1 %v8332_v0 }
 0x712   : > { %7096 = vmatprep.subr.bf16.mxu0 %v8332_v0 }
 0x716   : > { %7081 = vmatmul.mubr.msk.bf16.vlgmr.msra.gmra.mxu1 %vm3151_vm3, %v4618_v16 }
 0x717   : > { %7087 = vmatmul.mubr.msk.bf16.vlgmr.msra.gmra.mxu0 %vm3151_vm3, %v4619_v17  ;;  %7092 = vmatprep.mubr.msk.bf16.mxu1 %vm8333_vm0, %v8332_v0 }
 0x718   : > { %7098 = vmatprep.mubr.msk.bf16.mxu0 %vm8333_vm0, %v8332_v0 }
 0x7b6   : > { %v9478_v31 = vpop.f32.mrf.mxu1  ;;  %v9480_v2 = vpop.f32.mrf.mxu0 }
 0x7b7   : > { %v5347_v32 = vsel %vm3440_vm5, %v9480_v2, -inf  ;;  %v5344_v33 = vsel %vm3440_vm5, %v9478_v31, -inf }
 0x7b8   : > { %5348 = vmax.xlane.f32.xlu0 %v5347_v32  ;;  %v7048_v1 = vpop.f32.mrf.mxu0  ;;  %5345 = vmax.xlane.f32.xlu1 %v5344_v33  ;;  %v7040_v34 = vpop.f32.mrf.mxu1 }
 0x7ba   : > { %v4998_v35 = vpop.f32.mrf.mxu1  ;;  %v5055_v36 = vpop.f32.mrf.mxu0 }
 0x7bc   : > { %v7041_v39 = vpop.f32.mrf.mxu1  ;;  %v7049_v58 = vpop.f32.mrf.mxu0 }
 0x7c6   : > { %v9487_v41 = vpop.f32.mrf.mxu1 }
 0x7c7   : > { %v9490_v29 = vpop.f32.mrf.mxu0  ;;  %v5350_v43 = vsel %vm3440_vm5, %v9487_v41, -inf }
 0x7c8   : > { %5351 = vmax.xlane.f32.xlu0 %v5350_v43  ;;  %v7056_v47 = vpop.f32.mrf.mxu1  ;;  %v5353_v6 = vsel %vm3440_vm5, %v9490_v29, -inf }
 0x7c9   : > { %v7064_v48 = vpop.f32.mrf.mxu0  ;;  %4774 = vrot.lane.b32.xlu1 %v4465_v42, %s8334_s14  ;;  %s9626_s14 = scalar_lea.sflag [#allocation39], %s1067_s27 }
 0x7ca   : > { %v5112_v52 = vpop.f32.mrf.mxu1 }
 0x7cb   : > { %v5169_v40 = vpop.f32.mrf.mxu0 }
 0x7cc   : > { %v7057_v5 = vpop.f32.mrf.mxu1 }
 0x7cd   : > { %v7065_v49 = vpop.f32.mrf.mxu0  ;;  %4777 = vrot.lane.b32.xlu1 %v4465_v42, %s8336_s10  ;;  %s8339_s10 = smov [#allocation38]  }
 0x7ce   : > { %v5209_v10 = vpop.f32.mrf.mxu1  ;;  %s8121_s17 = sshll.u32 %s8339_s10, 4  ;;  %s8122_s17 = int_to_ptr.vmem [resolvable:$false] %s8121_s17 }
 0x7cf   : > { %v9496_v50 = vpop.f32.mrf.mxu0  ;;  %v5356_v44 = vsel %vm3151_vm3, %v5209_v10, -inf  ;;  %s8123_s16 = scalar_lea.vmem %s8122_s17, 512  ;;  %p8124_p7 = scmp.lt.s32.totalorder %s9622_s25, %s8122_s17 }
 0x7d0   : > { %5357 = vmax.xlane.f32.xlu0 %v5356_v44  ;;  %v7070_v51 = vpop.f32.mrf.mxu1  ;;  %v5359_v28 = vsel %vm3151_vm3, %v9496_v50, -inf }
 0x7d1   : > { %v7076_v53 = vpop.f32.mrf.mxu0 }
 0x7d2   : > { %v5212_v26 = vpop.f32.mrf.mxu1 }
 0x7d3   : > { %v5255_v46 = vpop.f32.mrf.mxu0 }
 0x7d4   : > { %v7071_v55 = vpop.f32.mrf.mxu1 }
 0x7d5   : > { %v7077_v57 = vpop.f32.mrf.mxu0 }
 0x7d6   : > { %v9499_v60 = vpop.f32.mrf.mxu1 }
 0x7d7   : > { %v9501_v61 = vpop.f32.mrf.mxu0  ;;  %v5362_v3 = vsel %vm3151_vm3, %v9499_v60, -inf }
 0x7d8   : > { %v7082_v62 = vpop.f32.mrf.mxu1  ;;  %v5365_v4 = vsel %vm3151_vm3, %v9501_v61, -inf }
 0x7d9   : > { %v7088_v37 = vpop.f32.mrf.mxu0 }
 0x7da   : > { %v5298_v27 = vpop.f32.mrf.mxu1 }
 0x7db   : > { %v5341_v63 = vpop.f32.mrf.mxu0 }
 0x7dc   : > { %v7083_v56 = vpop.f32.mrf.mxu1 }
 0x7dd   : > { %v7089_v24 = vpop.f32.mrf.mxu0 }
 0x7e6   : > { %4771 = vrot.lane.b32.xlu0 %v4465_v42, %s8335_s9  ;;  %s8117_s9 = scalar_lea.vmem %s9622_s25, 256 }
 0x7e7   : > { %p8118_p3 = scmp.ne.s32.totalorder %s9622_s25, %s8117_s9  ;;  %p8125_p0 = scmp.lt.s32.totalorder %s8123_s16, %s8117_s9 }
 0x7e9   : > { %p8119_p12 = pnand %p8118_p3, %p9811_p2  ;;  %p8126_p13 = por %p8125_p0, %p8124_p7 }
 0x7eb   : > { %p8120_p6 = pneg %p8119_p12 }
 0x7ed   : > { %p8127_p5 = pnand %p8126_p13, %p8120_p6 }
 0x7f1   : > { %5360 = vmax.xlane.f32.xlu1 %v5359_v28 }
 0x7f5   : > { %5363 = vmax.xlane.f32.xlu1 %v5362_v3 }
 0x7f9   : > { %5366 = vmax.xlane.f32.xlu1 %v5365_v4 }
 0x805   : > { %5354 = vmax.xlane.f32.xlu0 %v5353_v6 }
 0x841   : > { %v5346_v59 = vpop.xlane.xlu1 %5345  ;;  %v9512_v38 = vpop.xlane.xlu0 %5348 }
 0x845   : > { %v4775_v9 = vpop.permute.xlu1 %4774 }
 0x846   : > { %v4780_v12 = vcombine.low %v4465_v42, %v4775_v9  ;;  %v4781_v14 = vcombine.high %v4465_v42, %v4775_v9 }
 0x848   : > { %v4788_v54 = vrot.slane %v4780_v12, %v8948_v7  ;;  %v4795_v25 = vrot.slane %v4781_v14, %v8948_v7 }
 0x849   : > { %v4778_v17 = vpop.permute.xlu1 %4777 }
 0x851   : > { %v9514_v8 = vpop.xlane.xlu0 %5351 }
 0x859   : > { %v5358_v11 = vpop.xlane.xlu0 %5357 }
 0x85a   : > { %v5368_v45 = vmax.f32 %v5346_v59, %v5358_v11 }
 0x85c   : > { %v5372_v15 = vsub.f32 %v9478_v31, %v5368_v45  ;;  %v5384_v16 = vsub.f32 %v5209_v10, %v5368_v45 }
 0x85d   : > { %v4772_v18 = vpop.permute.xlu0 %4771 }
 0x85e   : > { %v5376_v19 = vmul.f32 1.442695, %v5372_v15  ;;  %v5388_v20 = vmul.f32 1.442695, %v5384_v16  ;;  %v4796_v22 = vcombine.low %v4772_v18, %v4778_v17  ;;  %v4797_v23 = vcombine.high %v4772_v18, %v4778_v17 }
 0x860   : > { %7567 = vpow2.f32 %v5376_v19  ;;  %v4804_v30 = vrot.slane %v4796_v22, %v8948_v7  ;;  %v4811_v32 = vrot.slane %v4797_v23, %v8948_v7 }
 0x861   : > { %7569 = vpow2.f32 %v5388_v20 }
 0x862   : > { %v4812_v33 = vcombine.low %v4788_v54, %v4804_v30  ;;  %v4813_v1 = vcombine.high %v4788_v54, %v4804_v30  ;;  %v4828_v31 = vcombine.low %v4795_v25, %v4811_v32  ;;  %v4829_v34 = vcombine.high %v4795_v25, %v4811_v32 }
 0x864   : > { %v4820_v35 = vrot.slane %v4812_v33, %v8952_v13  ;;  %v4827_v36 = vrot.slane %v4813_v1, %v8952_v13  ;;  %v4836_v39 = vrot.slane %v4828_v31, %v8952_v13  ;;  %v4843_v58 = vrot.slane %v4829_v34, %v8952_v13  ;;  %v7511_v34 = vld [vmem:[#allocation4 + $0x8] ss:$0 sps:$4 sm:$0xff]  }
 0x866   : > { %v4848_v21 = vcombine.low %v4820_v35, %v4827_v36  ;;  %v6653_v42 = vcombine.high %v4820_v35, %v4827_v36  ;;  %v4864_v43 = vcombine.low %v4836_v39, %v4843_v58  ;;  %v6654_v47 = vcombine.high %v4836_v39, %v4843_v58 }
 0x868   : > { %v4855_v48 = vrot.slane %v4848_v21, %v8948_v7  ;;  %v4863_v52 = vrot.slane %v6653_v42, %v8948_v7  ;;  %v4871_v40 = vrot.slane %v4864_v43, %v8948_v7  ;;  %v4879_v5 = vrot.slane %v6654_v47, %v8948_v7  ;;  %v7512_v42 = vld [vmem:[#allocation4] sm:$0xff]  }
 0x869   : > { %v5629_v21 = vsel %vm3572_vm4, %v7511_v34, 0  ;;  %v7513_v43 = vld [vmem:[#allocation4 + $0x20] ss:$0 sps:$4 sm:$0xff]  }
 0x86a   : > { %v4880_v49 = vcombine.low %v4855_v48, %v4863_v52  ;;  %v4896_v10 = vcombine.low %v4871_v40, %v4879_v5  ;;  %v4881_v44 = vcombine.high %v4855_v48, %v4863_v52  ;;  %v4897_v51 = vcombine.high %v4871_v40, %v4879_v5  ;;  %v7514_v52 = vld [vmem:[#allocation4 + $0x18] sm:$0xff]   ;;  %v7515_v5 = vld [vmem:[#allocation4 + $0x14] ss:$0 sps:$4 sm:$0xff]  }
 0x86b   : > { %v5739_v48 = vsel %vm3572_vm4, %v7513_v43, 0 }
 0x86c   : > { %v4888_v53 = vrot.slane %v4880_v49, %v8952_v13  ;;  %v4904_v26 = vrot.slane %v4896_v10, %v8952_v13  ;;  %v4895_v46 = vrot.slane %v4881_v44, %v8952_v13  ;;  %v4911_v55 = vrot.slane %v4897_v51, %v8952_v13 }
 0x86d   : > { %v9533_v57 = vpop.eup %7567 }
 0x86e   : > { %v7570_v62 = vpop.eup %7569  ;;  %v5396_v37 = vsel %vm3440_vm5, %v9533_v57, 0.0  ;;  %v4912_v27 = vcombine.low %v4888_v53, %v4904_v26  ;;  %v4913_v7 = vcombine.high %v4888_v53, %v4904_v26  ;;  %v4914_v63 = vcombine.low %v4895_v46, %v4911_v55 }
 0x86f   : > { %5397 = vadd.xlane.f32.xlu0 %v5396_v37  ;;  %v5408_v28 = vsel %vm3151_vm3, %v7570_v62, 0.0  ;;  %v5428_v13 = vpack.c.bf16 %v7570_v62, %v7570_v62  ;;  %v5424_v47 = vpack.c.bf16 %v9533_v57, %v9533_v57  ;;  %v5684_v26 = vsel %vm3572_vm4, %v7515_v5, 0  ;;  %v7518_v37 = vld [vmem:[#allocation4 + $0x24] sm:$0xff]  }
 0x870   : > { %v4916_v56 = vpack.c.bf16 %v4912_v27, %v4912_v27  ;;  %v4917_v24 = vpack.c.bf16 %v4913_v7, %v4913_v7  ;;  %v4918_v6 = vpack.c.bf16 %v4914_v63, %v4914_v63  ;;  %v5848_v7 = vld [vmem:[#allocation35] sm:$0xf] }
 0x871   : > { %v5856_v63 = vsel %vm3572_vm4, %v5848_v7, 0 }
 0x872   : > { %v5436_v3 = vsel %vm3572_vm4, %v4916_v56, 0  ;;  %v5482_v4 = vsel %vm3572_vm4, %v4917_v24, 0  ;;  %v5528_v59 = vsel %vm3572_vm4, %v4918_v6, 0  ;;  %v5849_v56 = vld [vmem:[#allocation35 + $0x4] sm:$0xf] }
 0x873   : > { %5409 = vadd.xlane.f32.xlu0 %v5408_v28  ;;  %7091 = vmatpush3.bf16.msra.mxu1 %v5436_v3  ;;  %v5902_v24 = vsel %vm3572_vm4, %v5849_v56, 0 }
 0x874   : > { %7097 = vmatpush3.bf16.msra.mxu0 %v5482_v4  ;;  %7102 = vmatprep.subr.bf16.mxu1 %v8332_v0 }
 0x875   : > { %7108 = vmatprep.subr.bf16.mxu0 %v8332_v0 }
 0x876   : > { %7093 = vmatmul.mubr.msk.bf16.vlgmr.msra.gmra.mxu1 %vm3151_vm3, %v5428_v13 }
 0x877   : > { %7103 = vmatpush3.bf16.msra.mxu1 %v5528_v59  ;;  %7104 = vmatprep.mubr.msk.bf16.mxu1 %vm8333_vm0, %v8332_v0 }
 0x878   : > { %7114 = vmatprep.subr.bf16.mxu1 %v8332_v0 }
 0x87a   : > { %v5361_v9 = vpop.xlane.xlu1 %5360 }
 0x87b   : > { %v5369_v11 = vmax.f32 %v9512_v38, %v5361_v9  ;;  %v4915_v38 = vcombine.high %v4895_v46, %v4911_v55  ;;  %v7516_v46 = vld [vmem:[#allocation4 + $0xc] sm:$0xff]  }
 0x87c   : > { %v7517_v55 = vld [vmem:[#allocation4 + $0x2c] ss:$0 sps:$4 sm:$0xff]  }
 0x87d   : > { %v5373_v45 = vsub.f32 %v9480_v2, %v5369_v11  ;;  %v5385_v12 = vsub.f32 %v9496_v50, %v5369_v11  ;;  %v4919_v54 = vpack.c.bf16 %v4915_v38, %v4915_v38  ;;  %v5794_v62 = vsel %vm3572_vm4, %v7517_v55, 0 }
 0x87e   : > { %v5364_v14 = vpop.xlane.xlu1 %5363 }
 0x87f   : > { %v5378_v15 = vmul.f32 1.442695, %v5373_v45  ;;  %v5390_v16 = vmul.f32 1.442695, %v5385_v12  ;;  %v5370_v17 = vmax.f32 %v9514_v8, %v5364_v14  ;;  %v5574_v31 = vsel %vm3572_vm4, %v4919_v54, 0 }
 0x881   : > { %7571 = vpow2.f32 %v5378_v15  ;;  %v5374_v18 = vsub.f32 %v9487_v41, %v5370_v17  ;;  %v5386_v19 = vsub.f32 %v9499_v60, %v5370_v17 }
 0x882   : > { %7573 = vpow2.f32 %v5390_v16  ;;  %v5367_v2 = vpop.xlane.xlu1 %5366 }
 0x883   : > { %v5380_v20 = vmul.f32 1.442695, %v5374_v18  ;;  %v5392_v22 = vmul.f32 1.442695, %v5386_v19 }
 0x885   : > { %7575 = vpow2.f32 %v5380_v20 }
 0x886   : > { %7577 = vpow2.f32 %v5392_v22 }
 0x88e   : > { %v9553_v23 = vpop.eup %7571  ;;  %v5355_v50 = vpop.xlane.xlu0 %5354 }
 0x88f   : > { %v7574_v25 = vpop.eup %7573  ;;  %v5371_v30 = vmax.f32 %v5355_v50, %v5367_v2  ;;  %v5399_v8 = vsel %vm3440_vm5, %v9553_v23, 0.0  ;;  %v5425_v57 = vpack.c.bf16 %v9553_v23, %v9553_v23 }
 0x890   : > { %5400 = vadd.xlane.f32.xlu1 %v5399_v8  ;;  %v5411_v41 = vsel %vm3151_vm3, %v7574_v25, 0.0  ;;  %v5429_v60 = vpack.c.bf16 %v7574_v25, %v7574_v25  ;;  %v5850_v8 = vld [vmem:[#allocation35 + $0x8] sm:$0xf] }
 0x891   : > { %v5375_v32 = vsub.f32 %v9490_v29, %v5371_v30  ;;  %v5387_v33 = vsub.f32 %v9501_v61, %v5371_v30  ;;  %5412 = vadd.xlane.f32.xlu0 %v5411_v41 }
 0x892   : > { %v7576_v1 = vpop.eup %7575  ;;  %7099 = vmatmul.mubr.msk.bf16.vlgmr.msra.gmra.mxu0 %vm3151_vm3, %v5429_v60 }
 0x893   : > { %v7578_v35 = vpop.eup %7577  ;;  %v5382_v36 = vmul.f32 1.442695, %v5375_v32  ;;  %v5394_v39 = vmul.f32 1.442695, %v5387_v33  ;;  %7109 = vmatpush3.bf16.msra.mxu0 %v5574_v31  ;;  %v5402_v58 = vsel %vm3440_vm5, %v7576_v1, 0.0  ;;  %7110 = vmatprep.mubr.msk.bf16.mxu0 %vm8333_vm0, %v8332_v0  ;;  %v5426_v53 = vpack.c.bf16 %v7576_v1, %v7576_v1 }
 0x894   : > { %5403 = vadd.xlane.f32.xlu1 %v5402_v58  ;;  %v5414_v29 = vsel %vm3151_vm3, %v7578_v35, 0.0  ;;  %v5430_v61 = vpack.c.bf16 %v7578_v35, %v7578_v35  ;;  %7122 = vmatprep.subr.bf16.mxu0 %v8332_v0  ;;  %v5948_v1 = vsel %vm3572_vm4, %v5850_v8, 0 }
 0x895   : > { %7579 = vpow2.f32 %v5382_v36  ;;  %5415 = vadd.xlane.f32.xlu0 %v5414_v29 }
 0x896   : > { %7581 = vpow2.f32 %v5394_v39  ;;  %7105 = vmatmul.mubr.msk.bf16.vlgmr.msra.gmra.mxu1 %vm3151_vm3, %v5430_v61 }
 0x897   : > { %7115 = vmatpush3.bf16.msra.mxu1 %v5629_v21  ;;  %7118 = vmatprep.mubr.msk.bf16.mxu1 %vm8333_vm0, %v8332_v0 }
 0x898   : > { %7116 = vmatprep.subr.bf16.mxu1 %v8332_v0 }
 0x89b   : > { %7117 = vmatpush3.bf16.msra.mxu1 %v7512_v42 }
 0x89c   : > { %7130 = vmatprep.subr.bf16.mxu1 %v8332_v0 }
 0x89e   : > { %7119 = vmatmul.mubr.msk.bf16.vlgmr.msra.gmra.mxu1 %vm3440_vm5, %v5424_v47 }
 0x89f   : > { %7131 = vmatpush3.bf16.msra.mxu1 %v5739_v48  ;;  %7134 = vmatprep.mubr.msk.bf16.mxu1 %vm8333_vm0, %v8332_v0 }
 0x8a0   : > { %7132 = vmatprep.subr.bf16.mxu1 %v8332_v0 }
 0x8a2   : > { %v7580_v40 = vpop.eup %7579 }
 0x8a3   : > { %v7582_v49 = vpop.eup %7581  ;;  %7133 = vmatpush3.bf16.msra.mxu1 %v7514_v52  ;;  %v5405_v10 = vsel %vm3440_vm5, %v7580_v40, 0.0  ;;  %v5427_v27 = vpack.c.bf16 %v7580_v40, %v7580_v40 }
 0x8a4   : > { %v5417_v44 = vsel %vm3151_vm3, %v7582_v49, 0.0  ;;  %5406 = vadd.xlane.f32.xlu1 %v5405_v10  ;;  %v5431_v51 = vpack.c.bf16 %v7582_v49, %v7582_v49  ;;  %7146 = vmatprep.subr.bf16.mxu1 %v8332_v0 }
 0x8a5   : > { %5418 = vadd.xlane.f32.xlu0 %v5417_v44 }
 0x8a6   : > { %7111 = vmatmul.mubr.msk.bf16.vlgmr.msra.gmra.mxu0 %vm3151_vm3, %v5431_v51  ;;  %7135 = vmatmul.mubr.msk.bf16.vlgmr.msra.gmra.mxu1 %vm3440_vm5, %v5426_v53  ;;  %v5851_v51 = vld [vmem:[#allocation35 + $0xc] sm:$0xf] }
 0x8a7   : > { %7123 = vmatpush3.bf16.msra.mxu0 %v5684_v26  ;;  %7126 = vmatprep.mubr.msk.bf16.mxu0 %vm8333_vm0, %v8332_v0  ;;  %v5994_v55 = vsel %vm3572_vm4, %v5851_v51, 0 }
 0x8a8   : > { %7124 = vmatprep.subr.bf16.mxu0 %v8332_v0  ;;  %7148 = vmatprep.mubr.msk.bf16.mxu1 %vm8333_vm0, %v8332_v0 }
 0x8a9   : > { %7147 = vmatpush3.bf16.msra.mxu1 %v5856_v63 }
 0x8aa   : > { %7158 = vmatprep.subr.bf16.mxu1 %v8332_v0 }
 0x8ab   : > { %7125 = vmatpush3.bf16.msra.mxu0 %v7516_v46 }
 0x8ac   : > { %7138 = vmatprep.subr.bf16.mxu0 %v8332_v0 }
 0x8ae   : > { %7127 = vmatmul.mubr.msk.bf16.vlgmr.msra.gmra.mxu0 %vm3440_vm5, %v5425_v57 }
 0x8af   : > { %7139 = vmatpush3.bf16.msra.mxu0 %v5794_v62  ;;  %7142 = vmatprep.mubr.msk.bf16.mxu0 %vm8333_vm0, %v8332_v0 }
 0x8b0   : > { %7140 = vmatprep.subr.bf16.mxu0 %v8332_v0 }
 0x8b3   : > { %7141 = vmatpush3.bf16.msra.mxu0 %v7518_v37 }
 0x8b4   : > { %7152 = vmatprep.subr.bf16.mxu0 %v8332_v0 }
 0x8b6   : > { %7143 = vmatmul.mubr.msk.bf16.vlgmr.msra.gmra.mxu0 %vm3440_vm5, %v5427_v27 }
 0x8b7   : > { %7154 = vmatprep.mubr.msk.bf16.mxu0 %vm8333_vm0, %v8332_v0  ;;  %7153 = vmatpush3.bf16.msra.mxu0 %v5902_v24 }
 0x8b8   : > { %7164 = vmatprep.subr.bf16.mxu0 %v8332_v0 }
 0x8f8   : > { %v5398_v13 = vpop.xlane.xlu0 %5397 }
 0x8fc   : > { %v5410_v59 = vpop.xlane.xlu0 %5409 }
 0x8fd   : > { %v5420_v45 = vadd.f32 %v5410_v59, %v5398_v13 }
 0x8ff   : > { %7583 = vrcp.f32 %v5420_v45 }
 0x90c   : > { %v7584_v25 = vpop.eup %7583 }
 0x919   : > { %v5401_v9 = vpop.xlane.xlu1 %5400 }
 0x91a   : > { %v5413_v11 = vpop.xlane.xlu0 %5412 }
 0x91b   : > { %v5421_v50 = vadd.f32 %v5413_v11, %v5401_v9 }
 0x91d   : > { %v5404_v14 = vpop.xlane.xlu1 %5403 }
 0x91e   : > { %v5416_v15 = vpop.xlane.xlu0 %5415 }
 0x91f   : > { %v5422_v19 = vadd.f32 %v5416_v15, %v5404_v14 }
 0x921   : > { %7585 = vrcp.f32 %v5422_v19 }
 0x922   : > { %7587 = vrcp.f32 %v5421_v50 }
 0x92d   : > { %v5407_v32 = vpop.xlane.xlu1 %5406 }
 0x92e   : > { %v5419_v31 = vpop.xlane.xlu0 %5418  ;;  %v7586_v29 = vpop.eup %7585 }
 0x92f   : > { %v5423_v39 = vadd.f32 %v5419_v31, %v5407_v32  ;;  %v7588_v10 = vpop.eup %7587 }
 0x931   : > { %7589 = vrcp.f32 %v5423_v39 }
 0x936   : > { %v5472_v28 = vpop.f32.mrf.mxu1 }
 0x938   : > { %v7094_v3 = vpop.f32.mrf.mxu1 }
 0x93a   : > { %v5475_v4 = vpop.f32.mrf.mxu1 }
 0x93c   : > { %v7095_v6 = vpop.f32.mrf.mxu1 }
 0x93e   : > { %v7590_v27 = vpop.eup %7589 }
 0x952   : > { %v5518_v12 = vpop.f32.mrf.mxu0 }
 0x954   : > { %v7100_v16 = vpop.f32.mrf.mxu0 }
 0x956   : > { %v5521_v17 = vpop.f32.mrf.mxu0  ;;  %v5564_v18 = vpop.f32.mrf.mxu1 }
 0x958   : > { %v7101_v20 = vpop.f32.mrf.mxu0  ;;  %v7106_v22 = vpop.f32.mrf.mxu1 }
 0x95a   : > { %v5567_v38 = vpop.f32.mrf.mxu1 }
 0x95c   : > { %v7107_v23 = vpop.f32.mrf.mxu1 }
 0x95e   : > { %v5665_v2 = vpop.f32.mrf.mxu1 }
 0x95f   : > { %v5666_v54 = vadd.f32 %v5665_v2, %v5472_v28 }
 0x960   : > { %v7120_v30 = vpop.f32.mrf.mxu1 }
 0x961   : > { %v5840_v41 = vmul.f32 %v7584_v25, %v5666_v54 }
 0x962   : > { %v5668_v60 = vpop.f32.mrf.mxu1 }
 0x963   : > { %v5844_v33 = vpack.c.bf16 %v5840_v41, %v5840_v41 }
 0x964   : > { %v7121_v34 = vpop.f32.mrf.mxu1 }
 0x965   : > { %7149 = vmatmul.mubr.msk.bf16.vlgmr.msra.gmra.mxu1 %vm3151_vm3, %v5844_v33 }
 0x966   : > { %v5610_v35 = vpop.f32.mrf.mxu0  ;;  %v5775_v36 = vpop.f32.mrf.mxu1  ;;  %7159 = vmatpush3.bf16.msra.mxu1 %v5948_v1  ;;  %7160 = vmatprep.mubr.msk.bf16.mxu1 %vm8333_vm0, %v8332_v0 }
 0x967   : > { %v5776_v58 = vadd.f32 %v5775_v36, %v5564_v18 }
 0x968   : > { %v7112_v61 = vpop.f32.mrf.mxu0  ;;  %v7136_v21 = vpop.f32.mrf.mxu1 }
 0x969   : > { %v5842_v42 = vmul.f32 %v7586_v29, %v5776_v58 }
 0x96a   : > { %v5613_v43 = vpop.f32.mrf.mxu0  ;;  %v5778_v47 = vpop.f32.mrf.mxu1 }
 0x96b   : > { %v5846_v48 = vpack.c.bf16 %v5842_v42, %v5842_v42 }
 0x96c   : > { %v7113_v52 = vpop.f32.mrf.mxu0  ;;  %v7137_v40 = vpop.f32.mrf.mxu1 }
 0x96d   : > { %7161 = vmatmul.mubr.msk.bf16.vlgmr.msra.gmra.mxu1 %vm3151_vm3, %v5846_v48 }
 0x96e   : > { %v5720_v5 = vpop.f32.mrf.mxu0 }
 0x96f   : > { %v5721_v49 = vadd.f32 %v5720_v5, %v5518_v12 }
 0x970   : > { %v7128_v44 = vpop.f32.mrf.mxu0 }
 0x971   : > { %v5841_v53 = vmul.f32 %v7588_v10, %v5721_v49 }
 0x972   : > { %v5723_v26 = vpop.f32.mrf.mxu0 }
 0x973   : > { %v5845_v46 = vpack.c.bf16 %v5841_v53, %v5841_v53 }
 0x974   : > { %v7129_v57 = vpop.f32.mrf.mxu0 }
 0x975   : > { %7155 = vmatmul.mubr.msk.bf16.vlgmr.msra.gmra.mxu0 %vm3151_vm3, %v5845_v46 }
 0x976   : > { %v5830_v62 = vpop.f32.mrf.mxu0  ;;  %7165 = vmatpush3.bf16.msra.mxu0 %v5994_v55  ;;  %7166 = vmatprep.mubr.msk.bf16.mxu0 %vm8333_vm0, %v8332_v0 }
 0x977   : > { %v5831_v37 = vadd.f32 %v5830_v62, %v5610_v35 }
 0x978   : > { %v7144_v7 = vpop.f32.mrf.mxu0 }
 0x979   : > { %v5843_v63 = vmul.f32 %v7590_v27, %v5831_v37 }
 0x97a   : > { %v5833_v56 = vpop.f32.mrf.mxu0 }
 0x97b   : > { %v5847_v24 = vpack.c.bf16 %v5843_v63, %v5843_v63 }
 0x97c   : > { %v7145_v28 = vpop.f32.mrf.mxu0 }
 0x97d   : > { %7167 = vmatmul.mubr.msk.bf16.vlgmr.msra.gmra.mxu0 %vm3151_vm3, %v5847_v24 }
 0x97e   : > { %8130 = shalt.err (!%p8127_p5)
}
 0x97f   : > { %s8131_s27 = scalar_lea.hbm %s9619_s20, 256  ;;  %s8135_s3 = scalar_lea.hbm %s8492_s5, 512 }
 0x980   : > { %p8132_p8 = scmp.ne.s32.totalorder %s9619_s20, %s8131_s27  ;;  %p8136_p4 = scmp.lt.s32.totalorder %s9619_s20, %s8492_s5 }
 0x981   : > { %p8137_p11 = scmp.lt.s32.totalorder %s8135_s3, %s8131_s27 }
 0x982   : > { %p8133_p9 = pnand %p8132_p8, %p9811_p2 }
 0x983   : > { %p8138_p10 = por %p8137_p11, %p8136_p4 }
 0x984   : > { %p8134_p1 = pneg %p8133_p9 }
 0x986   : > { %p8139_p3 = pnand %p8138_p10, %p8134_p1 }
 0x988   : > { %8142 = shalt.err (!%p8139_p3)
}
 0x989   : > { %s8340_s28 = smov 128   ;;  %s8341_s22 = smov 8  }
 0x98a   : > { %7257 = dma.vmem_to_hbm [thread:$0]  (%p9811_p2), %s9622_s25, 256, %s9619_s20, %s9626_s14, %s8340_s28, %s8340_s28, %s8341_s22  }
 0x98b   : > { %s6695_s26 = sshll.u32 %s8520_s18, 7  ;;  %s6076_s9 = sshll.u32 %s1228_s15, 4  ;;  %s6077_s9 = int_to_ptr.vmem [resolvable:$true] %s6076_s9 }
 0x98c   : > { %s6074_s10 = scalar_lea.hbm %s8487_s13, %s6695_s26  ;;  %s6053_s17 = scalar_lea.sflag [#allocation7], %s8779_s2 }
 0x98d   : > { %s8143_s16 = scalar_lea.vmem %s6077_s9, 128  ;;  %s8342_s27 = smov [#allocation37]  }
 0x98e   : > { %p8144_p12 = scmp.ne.s32.totalorder %s6077_s9, %s8143_s16  ;;  %s8147_s3 = sshll.u32 %s8342_s27, 4  ;;  %s8148_s3 = int_to_ptr.vmem [resolvable:$false] %s8147_s3 }
 0x98f   : > { %s8149_s1 = scalar_lea.vmem %s8148_s3, 256  ;;  %p8150_p0 = scmp.lt.s32.totalorder %s6077_s9, %s8148_s3 }
 0x990   : > { %p8145_p6 = pnand %p8144_p12, %p9811_p2  ;;  %p8151_p13 = scmp.lt.s32.totalorder %s8149_s1, %s8143_s16 }
 0x992   : > { %p8146_p7 = pneg %p8145_p6  ;;  %p8152_p5 = por %p8151_p13, %p8150_p0 }
 0x994   : > { %p8153_p8 = pnand %p8152_p5, %p8146_p7 }
 0x996   : > { %8156 = shalt.err (!%p8153_p8)
}
 0x997   : > { %s8157_s20 = scalar_lea.hbm %s6074_s10, 128  ;;  %s8161_s2 = scalar_lea.hbm %s8487_s13, 256 }
 0x998   : > { %p8158_p9 = scmp.ne.s32.totalorder %s6074_s10, %s8157_s20  ;;  %p8162_p11 = scmp.lt.s32.totalorder %s6074_s10, %s8487_s13 }
 0x999   : > { %p8163_p10 = scmp.lt.s32.totalorder %s8161_s2, %s8157_s20 }
 0x99a   : > { %p8159_p1 = pnand %p8158_p9, %p9811_p2 }
 0x99b   : > { %p8164_p3 = por %p8163_p10, %p8162_p11 }
 0x99c   : > { %p8160_p4 = pneg %p8159_p1 }
 0x99e   : > { %p8165_p12 = pnand %p8164_p3, %p8160_p4 }
 0x9a0   : > { %8168 = shalt.err (!%p8165_p12)
}
 0x9a1   : > { %7256 = dma.vmem_to_hbm [thread:$0]  (%p9811_p2), %s6077_s9, 128, %s6074_s10, %s6053_s17  }
 0x9a2   : > { %s9812_s1 = sld [smem:[#allocation75_spill]]  ;;  %s1242_s25 = scalar_lea.vmem [#allocation40], %s8782_s30 }
 0x9a3   : > { %s9813_s15 = sld [smem:[#allocation76_spill]]  ;;  %s6105_s28 = sshll.u32 %s1242_s25, 4  ;;  %s6106_s28 = int_to_ptr.vmem [resolvable:$true] %s6105_s28 }
 0x9a4   : > { %s8169_s9 = scalar_lea.vmem %s6106_s28, 128  ;;  %s8343_s10 = smov [#allocation40]  }
 0x9a5   : > { %p8170_p6 = scmp.ne.s32.totalorder %s6106_s28, %s8169_s9  ;;  %s8173_s17 = sshll.u32 %s8343_s10, 4  ;;  %s8174_s17 = int_to_ptr.vmem [resolvable:$false] %s8173_s17 }
 0x9a6   : > { %s8175_s30 = scalar_lea.vmem %s8174_s17, 256  ;;  %p8176_p13 = scmp.lt.s32.totalorder %s6106_s28, %s8174_s17 }
 0x9a7   : > { %p8171_p7 = pnand %p8170_p6, %p9811_p2  ;;  %p8177_p5 = scmp.lt.s32.totalorder %s8175_s30, %s8169_s9 }
 0x9a8   : > { %v6691_v23 = vld [vmem:[%s9812_s1] ss:$0 sm:$0xff] }
 0x9a9   : > { %s6103_s22 = scalar_lea.hbm %s9813_s15, %s6695_s26  ;;  %p8172_p0 = pneg %p8171_p7 }
 0x9aa   : > { %p8178_p8 = por %p8177_p5, %p8176_p13 }
 0x9ac   : > { %p8179_p9 = pnand %p8178_p8, %p8172_p0 }
 0xa25   : > { %v5892_v0 = vpop.f32.mrf.mxu1 }
 0xa26   : > { %v6036_v15 = vsel %vm1269_vm1, %v5892_v0, 0.0 }
 0xa27   : > { %v7150_v3 = vpop.f32.mrf.mxu1 }
 0xa29   : > { %v5895_v4 = vpop.f32.mrf.mxu1 }
 0xa2b   : > { %v7151_v6 = vpop.f32.mrf.mxu1 }
 0xa2d   : > { %v5984_v13 = vpop.f32.mrf.mxu1 }
 0xa2e   : > { %v6039_v19 = vsel %vm1269_vm1, %v5984_v13, 0.0 }
 0xa2f   : > { %v7162_v59 = vpop.f32.mrf.mxu1 }
 0xa31   : > { %v5987_v9 = vpop.f32.mrf.mxu1 }
 0xa33   : > { %v7163_v11 = vpop.f32.mrf.mxu1 }
 0xa35   : > { %v5938_v45 = vpop.f32.mrf.mxu0 }
 0xa36   : > { %v6037_v12 = vsel %vm1269_vm1, %v5938_v45, 0.0 }
 0xa37   : > { %v7156_v14 = vpop.f32.mrf.mxu0  ;;  %v6038_v16 = vadd.f32 %v6037_v12, %v6036_v15 }
 0xa39   : > { %v5941_v17 = vpop.f32.mrf.mxu0  ;;  %v6040_v22 = vadd.f32 %v6039_v19, %v6038_v16 }
 0xa3b   : > { %v7157_v18 = vpop.f32.mrf.mxu0 }
 0xa3d   : > { %v6030_v20 = vpop.f32.mrf.mxu0 }
 0xa3e   : > { %v6041_v38 = vsel %vm1269_vm1, %v6030_v20, 0.0 }
 0xa3f   : > { %v6042_v2 = vadd.f32 %v6041_v38, %v6040_v22  ;;  %v7168_v50 = vpop.f32.mrf.mxu0 }
 0xa41   : > { %v6050_v54 = vadd.f32 %v6691_v23, %v6042_v2  ;;  %v6033_v25 = vpop.f32.mrf.mxu0 }
 0xa43   : > { %v7169_v30 = vpop.f32.mrf.mxu0  ;;  %6051 = vst.msk [vmem:[%s1242_s25] sm:$0xff] %vm1269_vm1, %v6050_v54 }
 0xa44   : > { %8182 = shalt.err (!%p8179_p9)
}
 0xa45   : > { %s8183_s18 = scalar_lea.hbm %s6103_s22, 128  ;;  %s8187_s26 = scalar_lea.hbm %s9813_s15, 256 }
 0xa46   : > { %p8184_p1 = scmp.ne.s32.totalorder %s6103_s22, %s8183_s18  ;;  %p8188_p10 = scmp.lt.s32.totalorder %s6103_s22, %s9813_s15 }
 0xa47   : > { %p8189_p3 = scmp.lt.s32.totalorder %s8187_s26, %s8183_s18 }
 0xa48   : > { %p8185_p4 = pnand %p8184_p1, %p9811_p2 }
 0xa49   : > { %p8190_p12 = por %p8189_p3, %p8188_p10 }
 0xa4a   : > { %p8186_p11 = pneg %p8185_p4 }
 0xa4c   : > { %p8191_p6 = pnand %p8190_p12, %p8186_p11 }
 0xa4e   : > { %8194 = shalt.err (!%p8191_p6)
}
 0xa4f   : > { %7258 = dma.vmem_to_hbm [thread:$0]  (%p9811_p2), %s6106_s28, 128, %s6103_s22, %s9626_s14  }
 0xa50 PF: > { %s9814_s16 = sld [smem:[#allocation80_spill]]  ;;  %s6117_s27 = sand.u32 1, %s8265_s7  }
 0xa51   : > { %p9816_p0 = scmp.ge.s32.totalorder %s8277_s11, 2  ;;  %s6118_s3 = scalar_lea.sflag [#allocation7], %s6117_s27 }
 0xa56   : > { %p9815_p7 = scmp.ne.s32.totalorder %s9814_s16, 0 }
 0xa58   : > { %p7325_p13 = pnand %p9816_p0, %p9815_p7 }
 0xa5a   : > { %p7326_p5 = pneg %p7325_p13 }
 0xa5c   : > { %8256 = dma.done.wait (%p7326_p5), %s6118_s3, 128  }
 0xa5d   : > { %8258 = vsyncadd (%p7326_p5), %s6118_s3, 4294967168  ;;  %s9817_s20 = sadd.s32 4294967294, %s8277_s11  }
 0xa5e   : > { %s6126_s2 = sand.u32 1, %s9817_s20  }
 0xa5f   : > { %s6127_s1 = scalar_lea.sflag [#allocation39], %s6126_s2 }
 0xa60   : > { %8260 = dma.done.wait (%p7326_p5), %s6127_s1, 384  }
 0xa61   : > { %8262 = vsyncadd (%p7326_p5), %s6127_s1, 4294966912  ;;  %s9818_s11 = sld [smem:[#allocation78_spill]]  ;;  %s9821_s7 = smov %s8269_s0 }
 0xa62   : > { %s9819_s4 = sld [smem:[#allocation77_spill]] }
 0xa63   : > { %s9820_s10 = sld [smem:[#allocation79_spill]] }
 0xa67   : > { %p88_p2 = scmp.ge.s32.totalorder %s9818_s11, 4  }
 0xa68   : > { %s9822_s0 = smov %s9819_s4 }
 0xa69   :  { %90 = sbr.rel (!%p88_p2) target bundleno = 79 (0x4f), region = 326 }
 0xa6e   :  { %6141 = vsyncpa [#allocation6], 1 }
 0xa6f   :  { %6143 = vsyncpa [#allocation6 + $0x1], 1 }
 0xa70   :  { %6144 = vsyncpa [#allocation9], 1 }
 0xa71   :  { %6146 = vsyncpa [#allocation9 + $0x1], 1 }
 0xa72   :  { %6147 = vsyncpa [#allocation12], 1 }
 0xa73   :  { %6148 = vsyncpa [#allocation15], 1 }
 0xa74   :  { %6149 = vsyncpa [#allocation18], 1 }
 0xa75   :  { %6150 = vsyncpa [#allocation21], 1 }
 0xa76   :  { %6151 = vsyncpa [#allocation24], 1 }
 0xa77   :  { %6152 = vsyncpa [#allocation27], 1 }
 0xa78   :  { %6153 = vsyncpa [#allocation30], 1 }
 0xa79   :  { %6154 = vsyncpa [#allocation33], 1 }
 0xa7a   :  { %6155 = vsyncpa [#allocation36], 1 }
 0xa7b   :  { %6156 = vsyncpa [#allocation7], 1 }
 0xa7c   :  { %6158 = vsyncpa [#allocation7 + $0x1], 1 }
 0xa7d   :  { %6159 = vsyncpa [#allocation39], 1 }
 0xa7e   :  { %6161 = vsyncpa [#allocation39 + $0x1], 1 }

</bundles_post_ra>
